<compile_context>
chip_gen: v7x
topology: tpu7x:2x2x1
jax: 0.10.0
libtpu: 0.0.40
codegen_flags: <defaults>
</compile_context>

<pallas_src>
import functools

import jax
import jax.numpy as jnp
from jax.experimental import pallas as pl
from jax.experimental.pallas import tpu as pltpu


def residual_block_kernel(x_ref, w1_ref, b1_ref, w2_ref, b2_ref, o_ref,
                          ap_ref, patch_ref, *, img_w, halo):
    # x_ref    : (1, S, CP)   one image, NHWC flattened over H*W, channels padded to CP
    # w*_ref   : (9*CP, CP)   weight slab, rows ordered (kh, kw, cin)
    # b*_ref   : (1, CP)
    # o_ref    : (1, S, CP)
    # ap_ref   : (halo + S + halo, CP) scratch: activation with zero halo rows
    # patch_ref: (S, 9*CP)    scratch: im2col patch matrix
    S = x_ref.shape[1]
    CP = x_ref.shape[2]

    # Zero the halo rows (the only rows never overwritten below).  They provide
    # the h-boundary zero padding for both convolutions.
    zhalo = jnp.zeros((halo, CP), jnp.float32)
    ap_ref[0:halo, :] = zhalo
    ap_ref[halo + S:halo + S + halo, :] = zhalo

    # w-boundary masks, computed ONCE per image (h-boundary zeros come for free
    # from the halo rows).  JAX does not CSE broadcast_in_dim, so hoist.
    ww = jax.lax.broadcasted_iota(jnp.int32, (S, 1), 0) % img_w
    not_left = (ww > 0).astype(jnp.float32)            # taps that read column w-1
    not_right = (ww < img_w - 1).astype(jnp.float32)   # taps that read column w+1

    taps = [(kh - 1, kw - 1) for kh in range(3) for kw in range(3)]

    def conv3x3(a, w_ref, b_ref):
        # a: (S, CP) float32.  Returns conv(a) + bias as (S, CP) float32.
        ap_ref[halo:halo + S, :] = a                   # aligned, unmasked store

        for t, (dh, dw) in enumerate(taps):
            shift = dh * img_w + dw                    # static Python int
            tap = ap_ref[halo + shift:halo + shift + S, :]
            if dw == -1:
                tap = tap * not_left
            elif dw == 1:
                tap = tap * not_right
            # lane-aligned (multiple-of-128) column block of the patch matrix
            patch_ref[:, t * CP:(t + 1) * CP] = tap

        # Single MXU matmul covering all 9 taps, f32 accumulation.
        y = jnp.dot(patch_ref[...], w_ref[...],
                    preferred_element_type=jnp.float32)
        return y + b_ref[...]

    x = x_ref[0].astype(jnp.float32)                   # (S, CP), lane-dense

    y1 = jnp.maximum(conv3x3(x, w1_ref, b1_ref), 0.0)      # conv1 + bias + ReLU
    y2 = conv3x3(y1, w2_ref, b2_ref)                        # conv2 + bias
    o_ref[0] = jnp.maximum(x + y2, 0.0).astype(o_ref.dtype)  # residual + ReLU


def residual_block(x_nchw, w1, b1, w2, b2):
    """x_nchw: (N, C, H, W) float32; w*: (C, C, 3, 3) OIHW; b*: (C,)."""
    n, c, h, w = x_nchw.shape
    s = h * w
    cp = ((c + 127) // 128) * 128            # pad channels to a full lane tile
    halo = ((w + 1 + 7) // 8) * 8            # >= w+1 rows, sublane aligned

    # NCHW -> flattened NHWC (N, H*W, C), channels zero-padded to cp.
    x_flat = jnp.transpose(x_nchw, (0, 2, 3, 1)).reshape(n, s, c)
    x_flat = jnp.pad(x_flat, ((0, 0), (0, 0), (0, cp - c)))

    def prep_w(wt):
        wt = jnp.pad(wt, ((0, cp - c), (0, cp - c), (0, 0), (0, 0)))  # OIHW, padded
        # -> (kh, kw, cin, cout) -> (9*cp, cp) slab, rows ordered (kh, kw, cin)
        return jnp.transpose(wt, (2, 3, 1, 0)).reshape(9 * cp, cp)

    def prep_b(bt):
        return jnp.pad(bt, ((0, cp - c),)).reshape(1, cp)

    w1s, w2s = prep_w(w1), prep_w(w2)
    b1s, b2s = prep_b(b1), prep_b(b2)

    kernel = functools.partial(residual_block_kernel, img_w=w, halo=halo)

    out_flat = pl.pallas_call(
        kernel,
        out_shape=jax.ShapeDtypeStruct((n, s, cp), x_nchw.dtype),
        grid_spec=pltpu.PrefetchScalarGridSpec(
            num_scalar_prefetch=0,
            grid=(n,),
            in_specs=[
                pl.BlockSpec((1, s, cp), lambda b: (b, 0, 0)),
                pl.BlockSpec((9 * cp, cp), lambda b: (0, 0)),
                pl.BlockSpec((1, cp), lambda b: (0, 0)),
                pl.BlockSpec((9 * cp, cp), lambda b: (0, 0)),
                pl.BlockSpec((1, cp), lambda b: (0, 0)),
            ],
            out_specs=pl.BlockSpec((1, s, cp), lambda b: (b, 0, 0)),
            scratch_shapes=[
                pltpu.VMEM((halo + s + halo, cp), jnp.float32),  # padded activation
                pltpu.VMEM((s, 9 * cp), jnp.float32),            # im2col patches
            ],
        ),
        compiler_params=pltpu.CompilerParams(
            dimension_semantics=("parallel",),
            vmem_limit_bytes=32 * 1024 * 1024,
        ),
    )(x_flat, w1s, b1s, w2s, b2s)

    # Drop the channel padding, back to NCHW.
    out = out_flat[:, :, :c].reshape(n, h, w, c)
    return jnp.transpose(out, (0, 3, 1, 2))


def ref_forward(x, w1, b1, w2, b2):
    """Pure-JAX reference identical to the PyTorch forward (NCHW)."""
    dn = jax.lax.conv_dimension_numbers(x.shape, w1.shape, ("NCHW", "OIHW", "NCHW"))
    y = jax.lax.conv_general_dilated(x, w1, (1, 1), "SAME", dimension_numbers=dn)
    y = jax.nn.relu(y + b1[None, :, None, None])
    y = jax.lax.conv_general_dilated(y, w2, (1, 1), "SAME", dimension_numbers=dn)
    y = y + b2[None, :, None, None]
    return jax.nn.relu(x + y)


if __name__ == "__main__":
    N, C, H, W = 2, 4, 16, 16

    key = jax.random.PRNGKey(0)
    kx, kw1, kb1, kw2, kb2 = jax.random.split(key, 5)

    x = jax.random.normal(kx, (N, C, H, W), dtype=jnp.float32)

    # Deterministic init, PyTorch-style uniform(-1/sqrt(fan_in), 1/sqrt(fan_in)).
    fan_in = C * 3 * 3
    bound = 1.0 / jnp.sqrt(jnp.float32(fan_in))
    w1 = jax.random.uniform(kw1, (C, C, 3, 3), jnp.float32, -bound, bound)
    b1 = jax.random.uniform(kb1, (C,), jnp.float32, -bound, bound)
    w2 = jax.random.uniform(kw2, (C, C, 3, 3), jnp.float32, -bound, bound)
    b2 = jax.random.uniform(kb2, (C,), jnp.float32, -bound, bound)

    out = jax.block_until_ready(residual_block(x, w1, b1, w2, b2))
    ref = jax.block_until_ready(ref_forward(x, w1, b1, w2, b2))

    assert out.shape == (N, C, H, W)
    assert jnp.allclose(out, ref, atol=1e-4, rtol=1e-4), "mismatch vs reference"

    print("KERNEL_OK")
</pallas_src>

<mosaic_0001>
module attributes {stable_mosaic.version = 11 : i64} {
  func.func @residual_block_kernel(%arg0: i32, %arg1: memref<1x256x128xf32, #tpu.memory_space<vmem>>, %arg2: memref<1152x128xf32, #tpu.memory_space<vmem>>, %arg3: memref<1x128xf32, #tpu.memory_space<vmem>>, %arg4: memref<1152x128xf32, #tpu.memory_space<vmem>>, %arg5: memref<1x128xf32, #tpu.memory_space<vmem>>, %arg6: memref<1x256x128xf32, #tpu.memory_space<vmem>>, %arg7: memref<304x128xf32, #tpu.memory_space<vmem>>, %arg8: memref<256x1152xf32, #tpu.memory_space<vmem>>) attributes {dimension_semantics = [#tpu.dimension_semantics<parallel>], iteration_bounds = array<i64: 2>, scalar_prefetch = 0 : i64, scratch_operands = 2 : i64, tpu.core_type = #tpu.core_type<tc>, window_params = [{transform_indices = @transform_0, window_bounds = array<i64: 1, 256, 128>}, {pipeline_mode = #tpu.pipeline_mode<synchronous>, transform_indices = @transform_1, window_bounds = array<i64: 1152, 128>}, {pipeline_mode = #tpu.pipeline_mode<synchronous>, transform_indices = @transform_2, window_bounds = array<i64: 1, 128>}, {pipeline_mode = #tpu.pipeline_mode<synchronous>, transform_indices = @transform_3, window_bounds = array<i64: 1152, 128>}, {pipeline_mode = #tpu.pipeline_mode<synchronous>, transform_indices = @transform_4, window_bounds = array<i64: 1, 128>}, {transform_indices = @transform_5, window_bounds = array<i64: 1, 256, 128>}]} {
    %cst = arith.constant 0.000000e+00 : f32
    %0 = vector.broadcast %cst : f32 to vector<24x128xf32>
    %c0 = arith.constant 0 : index
    %c0_0 = arith.constant 0 : index
    %1 = vector.load %arg7[%c0, %c0_0] : memref<304x128xf32, #tpu.memory_space<vmem>>, vector<24x128xf32>
    tpu.vector_store %arg7[%c0, %c0_0], %0 {strides = array<i32>} : memref<304x128xf32, #tpu.memory_space<vmem>>, vector<24x128xf32>,
    %c280 = arith.constant 280 : index
    %c0_1 = arith.constant 0 : index
    %2 = vector.load %arg7[%c280, %c0_1] : memref<304x128xf32, #tpu.memory_space<vmem>>, vector<24x128xf32>
    tpu.vector_store %arg7[%c280, %c0_1], %0 {strides = array<i32>} : memref<304x128xf32, #tpu.memory_space<vmem>>, vector<24x128xf32>,
    %3 = tpu.iota {dimensions = array<i32: 0>} : vector<256x1xi32>
    %c16_i32 = arith.constant 16 : i32
    %c0_i32 = arith.constant 0 : i32
    %4 = arith.cmpi eq, %c16_i32, %c0_i32 : i32
    %c1_i32 = arith.constant 1 : i32
    %5 = arith.select %4, %c1_i32, %c16_i32 : i32
    %6 = vector.broadcast %5 : i32 to vector<256x1xi32>
    %7 = arith.remsi %3, %6 : vector<256x1xi32>
    %c0_i32_2 = arith.constant 0 : i32
    %8 = vector.broadcast %c0_i32_2 : i32 to vector<256x1xi32>
    %9 = arith.cmpi ne, %7, %8 : vector<256x1xi32>
    %c0_i32_3 = arith.constant 0 : i32
    %10 = vector.broadcast %c0_i32_3 : i32 to vector<256x1xi32>
    %11 = arith.cmpi slt, %7, %10 : vector<256x1xi32>
    %c0_i32_4 = arith.constant 0 : i32
    %12 = arith.cmpi slt, %5, %c0_i32_4 : i32
    %13 = vector.broadcast %12 : i1 to vector<256x1xi1>
    %14 = vector.broadcast %13 : vector<256x1xi1> to vector<256x1xi1>
    %15 = arith.xori %11, %14 : vector<256x1xi1>
    %16 = arith.andi %15, %9 : vector<256x1xi1>
    %17 = vector.broadcast %5 : i32 to vector<256x1xi32>
    %18 = arith.addi %7, %17 : vector<256x1xi32>
    %19 = arith.select %16, %18, %7 : vector<256x1xi1>, vector<256x1xi32>
    %c0_i32_5 = arith.constant 0 : i32
    %20 = vector.broadcast %c0_i32_5 : i32 to vector<256x1xi32>
    %21 = arith.cmpi sgt, %19, %20 : vector<256x1xi32>
    %22 = arith.extui %21 : vector<256x1xi1> to vector<256x1xi32>
    %23 = arith.sitofp %22 : vector<256x1xi32> to vector<256x1xf32>
    %c15_i32 = arith.constant 15 : i32
    %24 = vector.broadcast %c15_i32 : i32 to vector<256x1xi32>
    %25 = arith.cmpi slt, %19, %24 : vector<256x1xi32>
    %26 = arith.extui %25 : vector<256x1xi1> to vector<256x1xi32>
    %27 = arith.sitofp %26 : vector<256x1xi32> to vector<256x1xf32>
    %c0_6 = arith.constant 0 : index
    %c0_7 = arith.constant 0 : index
    %c0_8 = arith.constant 0 : index
    %28 = vector.load %arg1[%c0_6, %c0_7, %c0_8] : memref<1x256x128xf32, #tpu.memory_space<vmem>>, vector<1x256x128xf32>
    %29 = vector.shape_cast %28 : vector<1x256x128xf32> to vector<256x128xf32>
    %c24 = arith.constant 24 : index
    %c0_9 = arith.constant 0 : index
    %30 = vector.load %arg7[%c24, %c0_9] : memref<304x128xf32, #tpu.memory_space<vmem>>, vector<256x128xf32>
    tpu.vector_store %arg7[%c24, %c0_9], %29 {strides = array<i32>} : memref<304x128xf32, #tpu.memory_space<vmem>>, vector<256x128xf32>,
    %c7 = arith.constant 7 : index
    %c0_10 = arith.constant 0 : index
    %31 = vector.load %arg7[%c7, %c0_10] : memref<304x128xf32, #tpu.memory_space<vmem>>, vector<256x128xf32>
    %32 = vector.broadcast %23 : vector<256x1xf32> to vector<256x128xf32>
    %33 = arith.mulf %31, %32 : vector<256x128xf32>
    %c0_11 = arith.constant 0 : index
    %c0_12 = arith.constant 0 : index
    %34 = vector.load %arg8[%c0_11, %c0_12] : memref<256x1152xf32, #tpu.memory_space<vmem>>, vector<256x128xf32>
    tpu.vector_store %arg8[%c0_11, %c0_12], %33 {strides = array<i32>} : memref<256x1152xf32, #tpu.memory_space<vmem>>, vector<256x128xf32>,
    %c8 = arith.constant 8 : index
    %c0_13 = arith.constant 0 : index
    %35 = vector.load %arg7[%c8, %c0_13] : memref<304x128xf32, #tpu.memory_space<vmem>>, vector<256x128xf32>
    %c0_14 = arith.constant 0 : index
    %c128 = arith.constant 128 : index
    %36 = vector.load %arg8[%c0_14, %c128] : memref<256x1152xf32, #tpu.memory_space<vmem>>, vector<256x128xf32>
    tpu.vector_store %arg8[%c0_14, %c128], %35 {strides = array<i32>} : memref<256x1152xf32, #tpu.memory_space<vmem>>, vector<256x128xf32>,
    %c9 = arith.constant 9 : index
    %c0_15 = arith.constant 0 : index
    %37 = vector.load %arg7[%c9, %c0_15] : memref<304x128xf32, #tpu.memory_space<vmem>>, vector<256x128xf32>
    %38 = vector.broadcast %27 : vector<256x1xf32> to vector<256x128xf32>
    %39 = arith.mulf %37, %38 : vector<256x128xf32>
    %c0_16 = arith.constant 0 : index
    %c256 = arith.constant 256 : index
    %40 = vector.load %arg8[%c0_16, %c256] : memref<256x1152xf32, #tpu.memory_space<vmem>>, vector<256x128xf32>
    tpu.vector_store %arg8[%c0_16, %c256], %39 {strides = array<i32>} : memref<256x1152xf32, #tpu.memory_space<vmem>>, vector<256x128xf32>,
    %c23 = arith.constant 23 : index
    %c0_17 = arith.constant 0 : index
    %41 = vector.load %arg7[%c23, %c0_17] : memref<304x128xf32, #tpu.memory_space<vmem>>, vector<256x128xf32>
    %42 = vector.broadcast %23 : vector<256x1xf32> to vector<256x128xf32>
    %43 = arith.mulf %41, %42 : vector<256x128xf32>
    %c0_18 = arith.constant 0 : index
    %c384 = arith.constant 384 : index
    %44 = vector.load %arg8[%c0_18, %c384] : memref<256x1152xf32, #tpu.memory_space<vmem>>, vector<256x128xf32>
    tpu.vector_store %arg8[%c0_18, %c384], %43 {strides = array<i32>} : memref<256x1152xf32, #tpu.memory_space<vmem>>, vector<256x128xf32>,
    %c24_19 = arith.constant 24 : index
    %c0_20 = arith.constant 0 : index
    %45 = vector.load %arg7[%c24_19, %c0_20] : memref<304x128xf32, #tpu.memory_space<vmem>>, vector<256x128xf32>
    %c0_21 = arith.constant 0 : index
    %c512 = arith.constant 512 : index
    %46 = vector.load %arg8[%c0_21, %c512] : memref<256x1152xf32, #tpu.memory_space<vmem>>, vector<256x128xf32>
    tpu.vector_store %arg8[%c0_21, %c512], %45 {strides = array<i32>} : memref<256x1152xf32, #tpu.memory_space<vmem>>, vector<256x128xf32>,
    %c25 = arith.constant 25 : index
    %c0_22 = arith.constant 0 : index
    %47 = vector.load %arg7[%c25, %c0_22] : memref<304x128xf32, #tpu.memory_space<vmem>>, vector<256x128xf32>
    %48 = vector.broadcast %27 : vector<256x1xf32> to vector<256x128xf32>
    %49 = arith.mulf %47, %48 : vector<256x128xf32>
    %c0_23 = arith.constant 0 : index
    %c640 = arith.constant 640 : index
    %50 = vector.load %arg8[%c0_23, %c640] : memref<256x1152xf32, #tpu.memory_space<vmem>>, vector<256x128xf32>
    tpu.vector_store %arg8[%c0_23, %c640], %49 {strides = array<i32>} : memref<256x1152xf32, #tpu.memory_space<vmem>>, vector<256x128xf32>,
    %c39 = arith.constant 39 : index
    %c0_24 = arith.constant 0 : index
    %51 = vector.load %arg7[%c39, %c0_24] : memref<304x128xf32, #tpu.memory_space<vmem>>, vector<256x128xf32>
    %52 = vector.broadcast %23 : vector<256x1xf32> to vector<256x128xf32>
    %53 = arith.mulf %51, %52 : vector<256x128xf32>
    %c0_25 = arith.constant 0 : index
    %c768 = arith.constant 768 : index
    %54 = vector.load %arg8[%c0_25, %c768] : memref<256x1152xf32, #tpu.memory_space<vmem>>, vector<256x128xf32>
    tpu.vector_store %arg8[%c0_25, %c768], %53 {strides = array<i32>} : memref<256x1152xf32, #tpu.memory_space<vmem>>, vector<256x128xf32>,
    %c40 = arith.constant 40 : index
    %c0_26 = arith.constant 0 : index
    %55 = vector.load %arg7[%c40, %c0_26] : memref<304x128xf32, #tpu.memory_space<vmem>>, vector<256x128xf32>
    %c0_27 = arith.constant 0 : index
    %c896 = arith.constant 896 : index
    %56 = vector.load %arg8[%c0_27, %c896] : memref<256x1152xf32, #tpu.memory_space<vmem>>, vector<256x128xf32>
    tpu.vector_store %arg8[%c0_27, %c896], %55 {strides = array<i32>} : memref<256x1152xf32, #tpu.memory_space<vmem>>, vector<256x128xf32>,
    %c41 = arith.constant 41 : index
    %c0_28 = arith.constant 0 : index
    %57 = vector.load %arg7[%c41, %c0_28] : memref<304x128xf32, #tpu.memory_space<vmem>>, vector<256x128xf32>
    %58 = vector.broadcast %27 : vector<256x1xf32> to vector<256x128xf32>
    %59 = arith.mulf %57, %58 : vector<256x128xf32>
    %c0_29 = arith.constant 0 : index
    %c1024 = arith.constant 1024 : index
    %60 = vector.load %arg8[%c0_29, %c1024] : memref<256x1152xf32, #tpu.memory_space<vmem>>, vector<256x128xf32>
    tpu.vector_store %arg8[%c0_29, %c1024], %59 {strides = array<i32>} : memref<256x1152xf32, #tpu.memory_space<vmem>>, vector<256x128xf32>,
    %c0_30 = arith.constant 0 : index
    %c0_31 = arith.constant 0 : index
    %61 = vector.load %arg8[%c0_30, %c0_31] : memref<256x1152xf32, #tpu.memory_space<vmem>>, vector<256x1152xf32>
    %c0_32 = arith.constant 0 : index
    %c0_33 = arith.constant 0 : index
    %62 = vector.load %arg2[%c0_32, %c0_33] : memref<1152x128xf32, #tpu.memory_space<vmem>>, vector<1152x128xf32>
    %cst_34 = arith.constant dense<0.000000e+00> : vector<256x128xf32>
    %63 = tpu.matmul %61, %62, %cst_34 {dimension_numbers = #tpu.dot_dimension_numbers<[1], [0], [0], [1], [0, 0, 1, 1], [], []>} : vector<256x1152xf32>, vector<1152x128xf32>, vector<256x128xf32> -> vector<256x128xf32>
    %c0_35 = arith.constant 0 : index
    %c0_36 = arith.constant 0 : index
    %64 = vector.load %arg3[%c0_35, %c0_36] : memref<1x128xf32, #tpu.memory_space<vmem>>, vector<1x128xf32>
    %65 = vector.broadcast %64 : vector<1x128xf32> to vector<256x128xf32>
    %66 = arith.addf %63, %65 : vector<256x128xf32>
    %cst_37 = arith.constant 0.000000e+00 : f32
    %67 = vector.broadcast %cst_37 : f32 to vector<256x128xf32>
    %68 = arith.maximumf %66, %67 : vector<256x128xf32>
    %c24_38 = arith.constant 24 : index
    %c0_39 = arith.constant 0 : index
    %69 = vector.load %arg7[%c24_38, %c0_39] : memref<304x128xf32, #tpu.memory_space<vmem>>, vector<256x128xf32>
    tpu.vector_store %arg7[%c24_38, %c0_39], %68 {strides = array<i32>} : memref<304x128xf32, #tpu.memory_space<vmem>>, vector<256x128xf32>,
    %c7_40 = arith.constant 7 : index
    %c0_41 = arith.constant 0 : index
    %70 = vector.load %arg7[%c7_40, %c0_41] : memref<304x128xf32, #tpu.memory_space<vmem>>, vector<256x128xf32>
    %71 = vector.broadcast %23 : vector<256x1xf32> to vector<256x128xf32>
    %72 = arith.mulf %70, %71 : vector<256x128xf32>
    %c0_42 = arith.constant 0 : index
    %c0_43 = arith.constant 0 : index
    %73 = vector.load %arg8[%c0_42, %c0_43] : memref<256x1152xf32, #tpu.memory_space<vmem>>, vector<256x128xf32>
    tpu.vector_store %arg8[%c0_42, %c0_43], %72 {strides = array<i32>} : memref<256x1152xf32, #tpu.memory_space<vmem>>, vector<256x128xf32>,
    %c8_44 = arith.constant 8 : index
    %c0_45 = arith.constant 0 : index
    %74 = vector.load %arg7[%c8_44, %c0_45] : memref<304x128xf32, #tpu.memory_space<vmem>>, vector<256x128xf32>
    %c0_46 = arith.constant 0 : index
    %c128_47 = arith.constant 128 : index
    %75 = vector.load %arg8[%c0_46, %c128_47] : memref<256x1152xf32, #tpu.memory_space<vmem>>, vector<256x128xf32>
    tpu.vector_store %arg8[%c0_46, %c128_47], %74 {strides = array<i32>} : memref<256x1152xf32, #tpu.memory_space<vmem>>, vector<256x128xf32>,
    %c9_48 = arith.constant 9 : index
    %c0_49 = arith.constant 0 : index
    %76 = vector.load %arg7[%c9_48, %c0_49] : memref<304x128xf32, #tpu.memory_space<vmem>>, vector<256x128xf32>
    %77 = vector.broadcast %27 : vector<256x1xf32> to vector<256x128xf32>
    %78 = arith.mulf %76, %77 : vector<256x128xf32>
    %c0_50 = arith.constant 0 : index
    %c256_51 = arith.constant 256 : index
    %79 = vector.load %arg8[%c0_50, %c256_51] : memref<256x1152xf32, #tpu.memory_space<vmem>>, vector<256x128xf32>
    tpu.vector_store %arg8[%c0_50, %c256_51], %78 {strides = array<i32>} : memref<256x1152xf32, #tpu.memory_space<vmem>>, vector<256x128xf32>,
    %c23_52 = arith.constant 23 : index
    %c0_53 = arith.constant 0 : index
    %80 = vector.load %arg7[%c23_52, %c0_53] : memref<304x128xf32, #tpu.memory_space<vmem>>, vector<256x128xf32>
    %81 = vector.broadcast %23 : vector<256x1xf32> to vector<256x128xf32>
    %82 = arith.mulf %80, %81 : vector<256x128xf32>
    %c0_54 = arith.constant 0 : index
    %c384_55 = arith.constant 384 : index
    %83 = vector.load %arg8[%c0_54, %c384_55] : memref<256x1152xf32, #tpu.memory_space<vmem>>, vector<256x128xf32>
    tpu.vector_store %arg8[%c0_54, %c384_55], %82 {strides = array<i32>} : memref<256x1152xf32, #tpu.memory_space<vmem>>, vector<256x128xf32>,
    %c24_56 = arith.constant 24 : index
    %c0_57 = arith.constant 0 : index
    %84 = vector.load %arg7[%c24_56, %c0_57] : memref<304x128xf32, #tpu.memory_space<vmem>>, vector<256x128xf32>
    %c0_58 = arith.constant 0 : index
    %c512_59 = arith.constant 512 : index
    %85 = vector.load %arg8[%c0_58, %c512_59] : memref<256x1152xf32, #tpu.memory_space<vmem>>, vector<256x128xf32>
    tpu.vector_store %arg8[%c0_58, %c512_59], %84 {strides = array<i32>} : memref<256x1152xf32, #tpu.memory_space<vmem>>, vector<256x128xf32>,
    %c25_60 = arith.constant 25 : index
    %c0_61 = arith.constant 0 : index
    %86 = vector.load %arg7[%c25_60, %c0_61] : memref<304x128xf32, #tpu.memory_space<vmem>>, vector<256x128xf32>
    %87 = vector.broadcast %27 : vector<256x1xf32> to vector<256x128xf32>
    %88 = arith.mulf %86, %87 : vector<256x128xf32>
    %c0_62 = arith.constant 0 : index
    %c640_63 = arith.constant 640 : index
    %89 = vector.load %arg8[%c0_62, %c640_63] : memref<256x1152xf32, #tpu.memory_space<vmem>>, vector<256x128xf32>
    tpu.vector_store %arg8[%c0_62, %c640_63], %88 {strides = array<i32>} : memref<256x1152xf32, #tpu.memory_space<vmem>>, vector<256x128xf32>,
    %c39_64 = arith.constant 39 : index
    %c0_65 = arith.constant 0 : index
    %90 = vector.load %arg7[%c39_64, %c0_65] : memref<304x128xf32, #tpu.memory_space<vmem>>, vector<256x128xf32>
    %91 = vector.broadcast %23 : vector<256x1xf32> to vector<256x128xf32>
    %92 = arith.mulf %90, %91 : vector<256x128xf32>
    %c0_66 = arith.constant 0 : index
    %c768_67 = arith.constant 768 : index
    %93 = vector.load %arg8[%c0_66, %c768_67] : memref<256x1152xf32, #tpu.memory_space<vmem>>, vector<256x128xf32>
    tpu.vector_store %arg8[%c0_66, %c768_67], %92 {strides = array<i32>} : memref<256x1152xf32, #tpu.memory_space<vmem>>, vector<256x128xf32>,
    %c40_68 = arith.constant 40 : index
    %c0_69 = arith.constant 0 : index
    %94 = vector.load %arg7[%c40_68, %c0_69] : memref<304x128xf32, #tpu.memory_space<vmem>>, vector<256x128xf32>
    %c0_70 = arith.constant 0 : index
    %c896_71 = arith.constant 896 : index
    %95 = vector.load %arg8[%c0_70, %c896_71] : memref<256x1152xf32, #tpu.memory_space<vmem>>, vector<256x128xf32>
    tpu.vector_store %arg8[%c0_70, %c896_71], %94 {strides = array<i32>} : memref<256x1152xf32, #tpu.memory_space<vmem>>, vector<256x128xf32>,
    %c41_72 = arith.constant 41 : index
    %c0_73 = arith.constant 0 : index
    %96 = vector.load %arg7[%c41_72, %c0_73] : memref<304x128xf32, #tpu.memory_space<vmem>>, vector<256x128xf32>
    %97 = vector.broadcast %27 : vector<256x1xf32> to vector<256x128xf32>
    %98 = arith.mulf %96, %97 : vector<256x128xf32>
    %c0_74 = arith.constant 0 : index
    %c1024_75 = arith.constant 1024 : index
    %99 = vector.load %arg8[%c0_74, %c1024_75] : memref<256x1152xf32, #tpu.memory_space<vmem>>, vector<256x128xf32>
    tpu.vector_store %arg8[%c0_74, %c1024_75], %98 {strides = array<i32>} : memref<256x1152xf32, #tpu.memory_space<vmem>>, vector<256x128xf32>,
    %c0_76 = arith.constant 0 : index
    %c0_77 = arith.constant 0 : index
    %100 = vector.load %arg8[%c0_76, %c0_77] : memref<256x1152xf32, #tpu.memory_space<vmem>>, vector<256x1152xf32>
    %c0_78 = arith.constant 0 : index
    %c0_79 = arith.constant 0 : index
    %101 = vector.load %arg4[%c0_78, %c0_79] : memref<1152x128xf32, #tpu.memory_space<vmem>>, vector<1152x128xf32>
    %cst_80 = arith.constant dense<0.000000e+00> : vector<256x128xf32>
    %102 = tpu.matmul %100, %101, %cst_80 {dimension_numbers = #tpu.dot_dimension_numbers<[1], [0], [0], [1], [0, 0, 1, 1], [], []>} : vector<256x1152xf32>, vector<1152x128xf32>, vector<256x128xf32> -> vector<256x128xf32>
    %c0_81 = arith.constant 0 : index
    %c0_82 = arith.constant 0 : index
    %103 = vector.load %arg5[%c0_81, %c0_82] : memref<1x128xf32, #tpu.memory_space<vmem>>, vector<1x128xf32>
    %104 = vector.broadcast %103 : vector<1x128xf32> to vector<256x128xf32>
    %105 = arith.addf %102, %104 : vector<256x128xf32>
    %106 = arith.addf %29, %105 : vector<256x128xf32>
    %cst_83 = arith.constant 0.000000e+00 : f32
    %107 = vector.broadcast %cst_83 : f32 to vector<256x128xf32>
    %108 = arith.maximumf %106, %107 : vector<256x128xf32>
    %c0_84 = arith.constant 0 : index
    %c0_85 = arith.constant 0 : index
    %c0_86 = arith.constant 0 : index
    %109 = vector.load %arg6[%c0_84, %c0_85, %c0_86] : memref<1x256x128xf32, #tpu.memory_space<vmem>>, vector<1x256x128xf32>
    %110 = vector.shape_cast %109 : vector<1x256x128xf32> to vector<256x128xf32>
    %111 = vector.shape_cast %108 : vector<256x128xf32> to vector<1x256x128xf32>
    tpu.vector_store %arg6[%c0_84, %c0_85, %c0_86], %111 {strides = array<i32>} : memref<1x256x128xf32, #tpu.memory_space<vmem>>, vector<1x256x128xf32>,
    return
  }
  func.func @transform_0(%arg0: i32) -> (i32, i32, i32) {
    %c0_i32 = arith.constant 0 : i32
    %c0_i32_0 = arith.constant 0 : i32
    %c0_i32_1 = arith.constant 0 : i32
    return %arg0, %c0_i32, %c0_i32_0 : i32, i32, i32
  }
  func.func @transform_1(%arg0: i32) -> (i32, i32) {
    %c0_i32 = arith.constant 0 : i32
    %c0_i32_0 = arith.constant 0 : i32
    %c0_i32_1 = arith.constant 0 : i32
    return %c0_i32, %c0_i32_0 : i32, i32
  }
  func.func @transform_2(%arg0: i32) -> (i32, i32) {
    %c0_i32 = arith.constant 0 : i32
    %c0_i32_0 = arith.constant 0 : i32
    %c0_i32_1 = arith.constant 0 : i32
    return %c0_i32, %c0_i32_0 : i32, i32
  }
  func.func @transform_3(%arg0: i32) -> (i32, i32) {
    %c0_i32 = arith.constant 0 : i32
    %c0_i32_0 = arith.constant 0 : i32
    %c0_i32_1 = arith.constant 0 : i32
    return %c0_i32, %c0_i32_0 : i32, i32
  }
  func.func @transform_4(%arg0: i32) -> (i32, i32) {
    %c0_i32 = arith.constant 0 : i32
    %c0_i32_0 = arith.constant 0 : i32
    %c0_i32_1 = arith.constant 0 : i32
    return %c0_i32, %c0_i32_0 : i32, i32
  }
  func.func @transform_5(%arg0: i32) -> (i32, i32, i32) {
    %c0_i32 = arith.constant 0 : i32
    %c0_i32_0 = arith.constant 0 : i32
    %c0_i32_1 = arith.constant 0 : i32
    return %arg0, %c0_i32, %c0_i32_0 : i32, i32, i32
  }
}

</mosaic_0001>

<bundles_post_ra>
// kernel: tpu_custom_call.1
= control target key start
LH: loop header
LB: loop body
LE: loop exit
PB: predicated region body
PF: predicated region fallthrough
CT: control target
= control target key end

     0   :  { %10 = vsyncpa [#allocation5], 0  ;;  %s9376_s0 = inlined_call_operand.hbm [shape: f32[2,256,128], index: 0, kind: input, shape index: {}]   ;;  %s9377_s1 = inlined_call_operand.hbm [shape: f32[1152,128], index: 1, kind: input, shape index: {}]   ;;  %s9378_s2 = inlined_call_operand.vmem [shape: f32[1,128], index: 2, kind: input, shape index: {}]   ;;  %s9379_s3 = inlined_call_operand.hbm [shape: f32[1152,128], index: 3, kind: input, shape index: {}]   ;;  %s9380_s4 = inlined_call_operand.vmem [shape: f32[1,128], index: 4, kind: input, shape index: {}]   ;;  %s9381_s5 = inlined_call_operand.hbm [shape: f32[2,256,128], index: 5, kind: output, shape index: {}]  }
   0x1   :  { %12 = vsyncpa [#allocation5 + $0x1], 0 }
   0x2   :  { %13 = vsyncpa [#allocation8], 0 }
   0x3   :  { %14 = vsyncpa [#allocation6], 0 }
   0x4   :  { %16 = vsyncpa [#allocation6 + $0x1], 0  ;;  %s7381_s18 = smov 0   ;;  %s7383_s19 = smov 0  }
   0x5   :  { %s7385_s20 = smov 0   ;;  %s7387_s21 = smov 0  }
   0x6 LB: > { %s7402_s22 = sadd.s32 4294967295, %s7339_s21   ;;  %s5881_s23 = sadd.s32 4294967294, %s7339_s21   ;;  %s7339_s21 = sphi %s7387_s21, %s9782_s21   ;;  %s7335_s20 = sphi %s7385_s20, %s9781_s20   ;;  %s7331_s19 = sphi %s7383_s19, %s9780_s19   ;;  %s7327_s18 = sphi %s7381_s18, %s9779_s18  }
   0x7   : > { %p42_p0 = scmp.ne.s32.totalorder %s7331_s19, %s7327_s18  ;;  %p9382_p1 = scmp.eq.s32.totalorder %s7402_s22, 0 }
   0x8   : > { %p156_p3 = scmp.eq.s32.totalorder %s5881_s23, 1  ;;  %p5882_p5 = scmp.ge.s32.totalorder %s7339_s21, 1 }
   0x9   : > { %p7411_p4 = por %p9382_p1, %p42_p0  ;;  %p163_p7 = scmp.lt.s32.totalorder %s7339_s21, 3 }
   0xa   : > { %p7416_p6 = por %p156_p3, %p42_p0  ;;  %s7341_s27 = smov [#allocation7]  }
   0xb   : > { %s9519_s24 = scalar_select %p7411_p4, 1, 0 }
   0xc   : > { %s9520_s25 = scalar_select %p7416_p6, 1, 0 }
   0xd   : > { %p7421_p8 = pnand %p5882_p5, %p163_p7  ;;  %s175_s28 = sshll.u32 %s7341_s27, 4  ;;  %s7425_s28 = int_to_ptr.vmem [resolvable:$true] %s175_s28 }
   0xe   : > { %s7342_s30 = smov [#allocation9]   ;;  %s7183_s9 = scalar_lea.hbm %s9377_s1, 18432 }
   0xf   : > { %p7115_p9 = pneg %p7421_p8  ;;  %s191_s6 = sshll.u32 %s7342_s30, 4  ;;  %s7436_s6 = int_to_ptr.vmem [resolvable:$true] %s191_s6 }
  0x10   : > { %p7184_p12 = scmp.ne.s32.totalorder %s9377_s1, %s7183_s9  ;;  %p7190_p5 = scmp.lt.u32.totalorder %s7183_s9, %s9377_s1 }
  0x11   : > { %p7432_p11 = pnand %p7115_p9, %p9382_p1 }
  0x13   : > { %p7185_p13 = pneg %p7432_p11 }
  0x15   : > { %p7186_p0 = pnand %p7185_p13, %p7184_p12 }
  0x17   : > { %p7187_p3 = pneg %p7186_p0 }
  0x19   : > { %p7192_p7 = pnand %p7190_p5, %p7187_p3 }
  0x1b   : > { %7195 = shalt.err (!%p7192_p7)
}
  0x1c   : > { %s7196_s14 = scalar_lea.vmem %s7425_s28, 18432  ;;  %p7204_p2 = scmp.lt.s32.totalorder %s7425_s28, %s7425_s28 }
  0x1d   : > { %p7197_p9 = scmp.ne.s32.totalorder %s7425_s28, %s7196_s14  ;;  %p7205_p12 = scmp.lt.s32.totalorder %s7196_s14, %s7196_s14 }
  0x1f   : > { %p7199_p10 = pnand %p7197_p9, %p7185_p13  ;;  %p7206_p0 = por %p7205_p12, %p7204_p2 }
  0x21   : > { %p7200_p1 = pneg %p7199_p10 }
  0x23   : > { %p7207_p6 = pnand %p7206_p0, %p7200_p1 }
  0x25   : > { %7210 = shalt.err (!%p7207_p6)
}
  0x26   : > { %s7343_s15 = smov 128   ;;  %s7344_s16 = smov 8  }
  0x27   : > { %7118 = dma.hbm_to_vmem [thread:$0]  (!%p7432_p11), %s9377_s1, 18432, %s7425_s28, [#allocation8], %s7343_s15, %s7343_s15, %s7344_s16  }
  0x28   : > { %s7211_s7 = scalar_lea.hbm %s9379_s3, 18432 }
  0x29   : > { %p7212_p1 = scmp.ne.s32.totalorder %s9379_s3, %s7211_s7  ;;  %p7218_p10 = scmp.lt.u32.totalorder %s7211_s7, %s9379_s3 }
  0x2b   : > { %p7214_p2 = pnand %p7212_p1, %p7185_p13 }
  0x2d   : > { %p7215_p6 = pneg %p7214_p2 }
  0x2f   : > { %p7220_p3 = pnand %p7218_p10, %p7215_p6 }
  0x31   : > { %7223 = shalt.err (!%p7220_p3)
}
  0x32   : > { %s7224_s28 = scalar_lea.vmem %s7436_s6, 18432  ;;  %p7232_p12 = scmp.lt.s32.totalorder %s7436_s6, %s7436_s6 }
  0x33   : > { %p7225_p5 = scmp.ne.s32.totalorder %s7436_s6, %s7224_s28  ;;  %p7233_p0 = scmp.lt.s32.totalorder %s7224_s28, %s7224_s28 }
  0x35   : > { %p7227_p7 = pnand %p7225_p5, %p7185_p13  ;;  %p7234_p1 = por %p7233_p0, %p7232_p12 }
  0x37   : > { %p7228_p9 = pneg %p7227_p7 }
  0x39   : > { %p7235_p2 = pnand %p7234_p1, %p7228_p9 }
  0x3b   : > { %7238 = shalt.err (!%p7235_p2)
}
  0x3c   : > { %7121 = dma.hbm_to_vmem [thread:$0]  (!%p7432_p11), %s9379_s3, 18432, %s7436_s6, [#allocation8], %s7343_s15, %s7343_s15, %s7344_s16  }
  0x3d   : > { %s7497_s29 = sadd.s32 1, %s7339_s21   ;;  %s29_s14 = sadd.s32 1, %s7335_s20 }
  0x3e   : > { %s26_s17 = ssub.s32 %s7339_s21, %s7497_s29  ;;  %p36_p13 = scmp.ne.s32.totalorder %s7335_s20, %s7331_s19 }
  0x3f   : > { %p27_p6 = scmp.eq.s32.totalorder %s26_s17, 0  ;;  %p37_p10 = scmp.eq.s32.totalorder %s7339_s21, 0 }
  0x40   : > { %p9523_p3 = scmp.eq.s32.totalorder %s7402_s22, 1  ;;  %p7132_p7 = scmp.lt.s32.totalorder %s7339_s21, 2 }
  0x41   : > { %s7513_s27 = scalar_select %p27_p6, %s7335_s20, %s29_s14  }
  0x42   : > { %p7507_p5 = por %p9523_p3, %p36_p13  ;;  %p38_p9 = por %p37_p10, %p36_p13 }
  0x43   : > { %s208_s30 = sand.u32 1, %s7335_s20   ;;  %s5933_s6 = sshll.u32 %s7339_s21, 12 }
  0x44   : > { %s9524_s23 = scalar_select %p7507_p5, 1, 0 }
  0x45   : > { %s5886_s7 = sshll.u32 %s208_s30, 8  ;;  %s7520_s10 = scalar_lea.hbm %s9376_s0, %s5933_s6 }
  0x46   : > { %s212_s11 = scalar_lea.vmem [#allocation4], %s5886_s7  ;;  %p7524_p11 = pnand %p7132_p7, %p38_p9 }
  0x47   : > { %s219_s28 = sshll.u32 %s212_s11, 4  ;;  %s7528_s13 = scalar_lea.sflag [#allocation5], %s208_s30  ;;  %s7522_s28 = int_to_ptr.vmem [resolvable:$true] %s219_s28 }
  0x48   : > { %s7239_s14 = scalar_lea.hbm %s7520_s10, 4096  ;;  %p7241_p0 = pneg %p7524_p11 }
  0x49   : > { %p7240_p12 = scmp.ne.s32.totalorder %s7520_s10, %s7239_s14  ;;  %s7244_s6 = scalar_lea.hbm %s9376_s0, 8192 }
  0x4a   : > { %p7245_p13 = scmp.lt.u32.totalorder %s7520_s10, %s9376_s0  ;;  %p7246_p6 = scmp.lt.u32.totalorder %s7244_s6, %s7239_s14 }
  0x4b   : > { %p7242_p1 = pnand %p7241_p0, %p7240_p12  ;;  %p7248_p3 = scmp.lt.u32.totalorder %s7239_s14, %s7520_s10 }
  0x4c   : > { %p7247_p10 = por %p7246_p6, %p7245_p13 }
  0x4d   : > { %p7243_p2 = pneg %p7242_p1 }
  0x4e   : > { %p7249_p7 = por %p7248_p3, %p7247_p10 }
  0x50   : > { %p7250_p9 = pnand %p7249_p7, %p7243_p2 }
  0x52   : > { %7253 = shalt.err (!%p7250_p9)
}
  0x53   : > { %s7254_s30 = scalar_lea.vmem %s7522_s28, 4096  ;;  %s7345_s11 = smov [#allocation4]  }
  0x54   : > { %p7255_p12 = scmp.ne.s32.totalorder %s7522_s28, %s7254_s30  ;;  %s7259_s17 = sshll.u32 %s7345_s11, 4  ;;  %s7260_s17 = int_to_ptr.vmem [resolvable:$false] %s7259_s17 }
  0x55   : > { %s7261_s7 = scalar_lea.vmem %s7260_s17, 8192  ;;  %p7262_p4 = scmp.lt.s32.totalorder %s7522_s28, %s7260_s17 }
  0x56   : > { %p7257_p1 = pnand %p7255_p12, %p7241_p0  ;;  %p7263_p13 = scmp.lt.s32.totalorder %s7261_s7, %s7254_s30 }
  0x58   : > { %p7258_p5 = pneg %p7257_p1  ;;  %p7264_p6 = por %p7263_p13, %p7262_p4 }
  0x5a   : > { %p7265_p10 = pnand %p7264_p6, %p7258_p5 }
  0x5c   : > { %7268 = shalt.err (!%p7265_p10)
}
  0x5d   : > { %7125 = dma.hbm_to_vmem [thread:$0]  (!%p7524_p11), %s7520_s10, 4096, %s7522_s28, %s7528_s13, %s7343_s15, %s7343_s15, %s7344_s16  }
  0x5e   : > { %231 = sbr.rel (%p7421_p8) target bundleno = 1536 (0x600), region = 40 }
  0x65   : > { %s7562_s14 = sand.u32 1, %s7331_s19   ;;  %p9526_p4 = scmp.ne.s32.totalorder %s9519_s24, 0 }
  0x66   : > { %s5890_s6 = sshll.u32 %s7562_s14, 8  ;;  %s234_s8 = scalar_lea.sflag [#allocation5], %s7562_s14 }
  0x67   : > { %s7568_s12 = scalar_lea.vmem [#allocation4], %s5890_s6 }
  0x68   : > { %7314 = dma.done.wait (%p9526_p4), %s234_s8, 4096  }
  0x69   : > { %7316 = vsyncadd (%p9526_p4), %s234_s8, 4294963200  ;;  %p9527_p5 = scmp.eq.s32.totalorder %s7402_s22, 0 }
  0x6b   : > { %7318 = dma.done.wait (%p9527_p5), [#allocation8], 36864   ;;  %p9528_p8 = pmov %p9527_p5 }
  0x6c   : > { %v9389_v0 = vmov 0.0|0.0   ;;  %v9385_v1 = vmov 0.0   ;;  %v2007_v2 = vld [vmem:[#allocation7] sm:$0xff]  ;;  %v2008_v3 = vld [vmem:[#allocation7 + $0x8] sm:$0xff]  ;;  %v2009_v4 = vld [vmem:[#allocation7 + $0x10] sm:$0xff]  ;;  %s9208_s10 = scalar_lea.vmem [#allocation10], %s5890_s6 }
  0x6d   : > { %7320 = vsyncadd (%p9528_p8), [#allocation8], 4294930432  ;;  %6191 = vmatprep.subr.bf16.mxu0 %v9389_v0  ;;  %273 = vst [vmem:[#allocation2 + $0x8] sm:$0xff] %v9385_v1  ;;  %2222 = vmatprep.mubr.f32.mxu0 %v9385_v1  ;;  %v6192_v5 = vpack.c.bf16 %v2008_v3, %v2007_v2  ;;  %v2010_v6 = vld [vmem:[#allocation7 + $0x18] sm:$0xff]  ;;  %v2011_v8 = vld [vmem:[#allocation7 + $0x20] sm:$0xff]  ;;  %s5934_s28 = sshll.u32 %s7402_s22, 12 }
  0x6e   : > { %272 = vst [vmem:[#allocation2] sm:$0xff] %v9385_v1  ;;  %274 = vst [vmem:[#allocation2 + $0x10] sm:$0xff] %v9385_v1  ;;  %v6195_v7 = vpack.c.bf16 %v2010_v6, %v2009_v4  ;;  %v2012_v9 = vld [vmem:[#allocation7 + $0x28] sm:$0xff]  ;;  %v2013_v11 = vld [vmem:[#allocation7 + $0x30] sm:$0xff]  ;;  %s5789_s13 = sshll.u32 %s9208_s10, 4  ;;  %s9328_s11 = scalar_lea.hbm %s9381_s5, %s5934_s28  ;;  %s9330_s13 = int_to_ptr.vmem [resolvable:$true] %s5789_s13 }
  0x6f   : > { %275 = vst [vmem:[#allocation2 + $0x118] sm:$0xff] %v9385_v1  ;;  %276 = vst [vmem:[#allocation2 + $0x120] sm:$0xff] %v9385_v1  ;;  %6193 = vmatpush1.bf16.msra.mxu0 %v6192_v5  ;;  %v6198_v10 = vpack.c.bf16 %v2012_v9, %v2011_v8  ;;  %v2014_v12 = vld [vmem:[#allocation7 + $0x38] sm:$0xff]  ;;  %v2015_v14 = vld [vmem:[#allocation7 + $0x40] sm:$0xff]  ;;  %v278_v5 = vlaneseq  ;;  %s5776_s22 = scalar_lea.sflag [#allocation6], %s7562_s14  ;;  %s7269_s17 = scalar_lea.vmem %s9330_s13, 4096 }
  0x70   : > { %277 = vst [vmem:[#allocation2 + $0x128] sm:$0xff] %v9385_v1  ;;  %6194 = vmatprep.subr.bf16.mxu0 %v9389_v0  ;;  %v6201_v13 = vpack.c.bf16 %v2014_v12, %v2013_v11  ;;  %v2016_v15 = vld [vmem:[#allocation7 + $0x48] sm:$0xff]  ;;  %v7590_v16 = vld [vmem:[%s7568_s12] sm:$0xff]  ;;  %v7597_v18 = vld [vmem:[%s7568_s12 + $0x10] sm:$0xff]  ;;  %p7270_p11 = scmp.ne.s32.totalorder %s9330_s13, %s7269_s17  ;;  %p9776_p0 = scmp.ne.s32.totalorder %s9524_s23, 0 }
  0x71   : > { %9529 = vst [vmem:[#allocation14_spill] sm:$0xff] %v7590_v16  ;;  %919 = vst [vmem:[#allocation2 + $0x18] sm:$0xff] %v7590_v16  ;;  %v7594_v17 = vld [vmem:[%s7568_s12 + $0x8] sm:$0xff]  ;;  %v7602_v19 = vld [vmem:[%s7568_s12 + $0x18] sm:$0xff]  ;;  %v6204_v21 = vpack.c.bf16 %v2016_v15, %v2015_v14  ;;  %v7713_v11 = vshrl.u32 %v278_v5, 7  ;;  %s7348_s7 = smov [#allocation10]  }
  0x72   : > { %9530 = vst [vmem:[#allocation15_spill] sm:$0xff] %v7594_v17  ;;  %9531 = vst [vmem:[#allocation16_spill] sm:$0xff] %v7597_v18  ;;  %v7605_v20 = vld [vmem:[%s7568_s12 + $0x20] sm:$0xff]  ;;  %v7610_v22 = vld [vmem:[%s7568_s12 + $0x28] sm:$0xff]  ;;  %p7271_p2 = pnand %p7270_p11, %p9776_p0  ;;  %s7273_s6 = sshll.u32 %s7348_s7, 4  ;;  %s7274_s6 = int_to_ptr.vmem [resolvable:$false] %s7273_s6 }
  0x73   : > { %6196 = vmatpush1.bf16.msra.mxu0 %v6195_v7  ;;  %920 = vst [vmem:[#allocation2 + $0x20] sm:$0xff] %v7594_v17  ;;  %921 = vst [vmem:[#allocation2 + $0x28] sm:$0xff] %v7597_v18  ;;  %v2017_v23 = vld [vmem:[#allocation7 + $0x50] sm:$0xff]  ;;  %v2018_v24 = vld [vmem:[#allocation7 + $0x58] sm:$0xff]  ;;  %v315_v15 = vand.u32 15, %v7713_v11  ;;  %s7275_s8 = scalar_lea.vmem %s7274_s6, 8192  ;;  %p7276_p7 = scmp.lt.s32.totalorder %s9330_s13, %s7274_s6 }
  0x74   : > { %6197 = vmatprep.subr.bf16.mxu0 %v9389_v0  ;;  %9532 = vst [vmem:[#allocation17_spill] sm:$0xff] %v7602_v19  ;;  %9533 = vst [vmem:[#allocation18_spill] sm:$0xff] %v7605_v20  ;;  %v7615_v25 = vld [vmem:[%s7568_s12 + $0x30] sm:$0xff]  ;;  %v7619_v26 = vld [vmem:[%s7568_s12 + $0x38] sm:$0xff]  ;;  %v6207_v30 = vpack.c.bf16 %v2018_v24, %v2017_v23  ;;  %p7272_p3 = pneg %p7271_p2  ;;  %p7277_p9 = scmp.lt.s32.totalorder %s7275_s8, %s7269_s17 }
  0x75   : > { %922 = vst [vmem:[#allocation2 + $0x30] sm:$0xff] %v7602_v19  ;;  %923 = vst [vmem:[#allocation2 + $0x38] sm:$0xff] %v7605_v20  ;;  %v7622_v27 = vld [vmem:[%s7568_s12 + $0x40] sm:$0xff]  ;;  %v7627_v28 = vld [vmem:[%s7568_s12 + $0x48] sm:$0xff]  ;;  %vm695_vm0 = vcmp.gt.s32.totalorder %v315_v15, 0 }
  0x76   : > { %9534 = vst [vmem:[#allocation19_spill] sm:$0xff] %v7610_v22  ;;  %924 = vst [vmem:[#allocation2 + $0x40] sm:$0xff] %v7610_v22  ;;  %v7630_v29 = vld [vmem:[%s7568_s12 + $0x50] sm:$0xff]  ;;  %v7635_v31 = vld [vmem:[%s7568_s12 + $0x58] sm:$0xff]  ;;  %p7278_p12 = por %p7277_p9, %p7276_p7 }
  0x77   : > { %6199 = vmatpush1.bf16.msra.mxu0 %v6198_v10  ;;  %9535 = vst [vmem:[#allocation20_spill] sm:$0xff] %v7615_v25  ;;  %925 = vst [vmem:[#allocation2 + $0x48] sm:$0xff] %v7615_v25  ;;  %v2019_v32 = vld [vmem:[#allocation7 + $0x60] sm:$0xff]  ;;  %v2020_v33 = vld [vmem:[#allocation7 + $0x68] sm:$0xff] }
  0x78   : > { %6200 = vmatprep.subr.bf16.mxu0 %v9389_v0  ;;  %9536 = vst [vmem:[#allocation21_spill] sm:$0xff] %v7619_v26  ;;  %9537 = vst [vmem:[#allocation22_spill] sm:$0xff] %v7622_v27  ;;  %v7640_v34 = vld [vmem:[%s7568_s12 + $0x60] sm:$0xff]  ;;  %v7644_v35 = vld [vmem:[%s7568_s12 + $0x68] sm:$0xff]  ;;  %v6210_v36 = vpack.c.bf16 %v2020_v33, %v2019_v32  ;;  %v281_v32 = vadd.s32 16, %v7713_v11  ;;  %p7279_p1 = pnand %p7278_p12, %p7272_p3 }
  0x79   : > { %926 = vst [vmem:[#allocation2 + $0x50] sm:$0xff] %v7619_v26  ;;  %927 = vst [vmem:[#allocation2 + $0x58] sm:$0xff] %v7622_v27  ;;  %v7648_v37 = vld [vmem:[%s7568_s12 + $0x70] sm:$0xff]  ;;  %v2022_v39 = vld [vmem:[#allocation7 + $0x78] sm:$0xff] }
  0x7a   : > { %9538 = vst [vmem:[#allocation23_spill] sm:$0xff] %v7627_v28  ;;  %9539 = vst [vmem:[#allocation24_spill] sm:$0xff] %v7630_v29  ;;  %v2021_v38 = vld [vmem:[#allocation7 + $0x70] sm:$0xff]  ;;  %v7653_v40 = vld [vmem:[%s7568_s12 + $0x78] sm:$0xff] }
  0x7b   : > { %6202 = vmatpush1.bf16.msra.mxu0 %v6201_v13  ;;  %928 = vst [vmem:[#allocation2 + $0x60] sm:$0xff] %v7627_v28  ;;  %929 = vst [vmem:[#allocation2 + $0x68] sm:$0xff] %v7630_v29  ;;  %v7657_v41 = vld [vmem:[%s7568_s12 + $0x80] sm:$0xff]  ;;  %v6213_v42 = vpack.c.bf16 %v2022_v39, %v2021_v38  ;;  %v7661_v43 = vld [vmem:[%s7568_s12 + $0x88] sm:$0xff] }
  0x7c   : > { %6203 = vmatprep.subr.bf16.mxu0 %v9389_v0  ;;  %9540 = vst [vmem:[#allocation25_spill] sm:$0xff] %v7635_v31  ;;  %930 = vst [vmem:[#allocation2 + $0x70] sm:$0xff] %v7635_v31  ;;  %v2023_v44 = vld [vmem:[#allocation7 + $0x80] sm:$0xff]  ;;  %v2024_v45 = vld [vmem:[#allocation7 + $0x88] sm:$0xff] }
  0x7d   : > { %9541 = vst [vmem:[#allocation26_spill] sm:$0xff] %v7640_v34  ;;  %931 = vst [vmem:[#allocation2 + $0x78] sm:$0xff] %v7640_v34  ;;  %v7666_v46 = vld [vmem:[%s7568_s12 + $0x90] sm:$0xff]  ;;  %v7670_v47 = vld [vmem:[%s7568_s12 + $0x98] sm:$0xff]  ;;  %v6216_v49 = vpack.c.bf16 %v2024_v45, %v2023_v44  ;;  %v329_v44 = vand.u32 15, %v281_v32 }
  0x7e   : > { %9542 = vst [vmem:[#allocation27_spill] sm:$0xff] %v7644_v35  ;;  %932 = vst [vmem:[#allocation2 + $0x80] sm:$0xff] %v7644_v35  ;;  %v7673_v48 = vld [vmem:[%s7568_s12 + $0xa0] sm:$0xff]  ;;  %v2025_v50 = vld [vmem:[#allocation7 + $0x90] sm:$0xff] }
  0x7f   : > { %6205 = vmatpush1.bf16.msra.mxu0 %v6204_v21  ;;  %9543 = vst [vmem:[#allocation28_spill] sm:$0xff] %v7648_v37  ;;  %933 = vst [vmem:[#allocation2 + $0x88] sm:$0xff] %v7648_v37  ;;  %v7678_v51 = vld [vmem:[%s7568_s12 + $0xa8] sm:$0xff]  ;;  %v7681_v52 = vld [vmem:[%s7568_s12 + $0xb0] sm:$0xff]  ;;  %vm697_vm1 = vcmp.gt.s32.totalorder %v329_v44, 0 }
  0x80   : > { %6206 = vmatprep.subr.bf16.mxu0 %v9389_v0  ;;  %9544 = vst [vmem:[#allocation29_spill] sm:$0xff] %v7653_v40  ;;  %934 = vst [vmem:[#allocation2 + $0x90] sm:$0xff] %v7653_v40  ;;  %v2026_v53 = vld [vmem:[#allocation7 + $0x98] sm:$0xff]  ;;  %v7690_v55 = vld [vmem:[%s7568_s12 + $0xc0] sm:$0xff] }
  0x81   : > { %9545 = vst [vmem:[#allocation30_spill] sm:$0xff] %v7657_v41  ;;  %935 = vst [vmem:[#allocation2 + $0x98] sm:$0xff] %v7657_v41  ;;  %v7687_v54 = vld [vmem:[%s7568_s12 + $0xb8] sm:$0xff]  ;;  %v6219_v56 = vpack.c.bf16 %v2026_v53, %v2025_v50  ;;  %v2027_v57 = vld [vmem:[#allocation7 + $0xa0] sm:$0xff] }
  0x82   : > { %9546 = vst [vmem:[#allocation31_spill] sm:$0xff] %v7661_v43  ;;  %936 = vst [vmem:[#allocation2 + $0xa0] sm:$0xff] %v7661_v43  ;;  %v2028_v58 = vld [vmem:[#allocation7 + $0xa8] sm:$0xff]  ;;  %v7700_v61 = vld [vmem:[%s7568_s12 + $0xd0] sm:$0xff] }
  0x83   : > { %6208 = vmatpush1.bf16.msra.mxu0 %v6207_v30  ;;  %9547 = vst [vmem:[#allocation32_spill] sm:$0xff] %v7666_v46  ;;  %937 = vst [vmem:[#allocation2 + $0xa8] sm:$0xff] %v7666_v46  ;;  %v7696_v59 = vld [vmem:[%s7568_s12 + $0xc8] sm:$0xff]  ;;  %v6222_v60 = vpack.c.bf16 %v2028_v58, %v2027_v57  ;;  %v2029_v62 = vld [vmem:[#allocation7 + $0xb0] sm:$0xff]  ;;  %v7733_v58 = vsel %vm697_vm1, 1.0, %v9385_v1 }
  0x84   : > { %6209 = vmatprep.subr.bf16.mxu0 %v9389_v0  ;;  %9548 = vst [vmem:[#allocation33_spill] sm:$0xff] %v7670_v47  ;;  %9549 = vst [vmem:[#allocation34_spill] sm:$0xff] %v7673_v48  ;;  %v2030_v63 = vld [vmem:[#allocation7 + $0xb8] sm:$0xff]  ;;  %v2031_v3 = vld [vmem:[#allocation7 + $0xc0] sm:$0xff] }
  0x85   : > { %938 = vst [vmem:[#allocation2 + $0xb0] sm:$0xff] %v7670_v47  ;;  %939 = vst [vmem:[#allocation2 + $0xb8] sm:$0xff] %v7673_v48  ;;  %v6225_v2 = vpack.c.bf16 %v2030_v63, %v2029_v62  ;;  %v2032_v4 = vld [vmem:[#allocation7 + $0xc8] sm:$0xff]  ;;  %v7706_v6 = vld [vmem:[%s7568_s12 + $0xd8] sm:$0xff] }
  0x86   : > { %9550 = vst [vmem:[#allocation35_spill] sm:$0xff] %v7678_v51  ;;  %9551 = vst [vmem:[#allocation36_spill] sm:$0xff] %v7681_v52  ;;  %v6228_v7 = vpack.c.bf16 %v2032_v4, %v2031_v3  ;;  %v7710_v8 = vld [vmem:[%s7568_s12 + $0xe0] sm:$0xff]  ;;  %v2033_v9 = vld [vmem:[#allocation7 + $0xd0] sm:$0xff] }
  0x87   : > { %6211 = vmatpush1.bf16.msra.mxu0 %v6210_v36  ;;  %940 = vst [vmem:[#allocation2 + $0xc0] sm:$0xff] %v7678_v51  ;;  %941 = vst [vmem:[#allocation2 + $0xc8] sm:$0xff] %v7681_v52  ;;  %v2034_v10 = vld [vmem:[#allocation7 + $0xd8] sm:$0xff]  ;;  %v2035_v13 = vld [vmem:[#allocation7 + $0xe0] sm:$0xff]  ;;  %v7725_v36 = vsel %vm695_vm0, 1.0, %v9385_v1 }
  0x88   : > { %6212 = vmatprep.subr.bf16.mxu0 %v9389_v0  ;;  %9552 = vst [vmem:[#allocation37_spill] sm:$0xff] %v7687_v54  ;;  %9553 = vst [vmem:[#allocation38_spill] sm:$0xff] %v7690_v55  ;;  %v6231_v12 = vpack.c.bf16 %v2034_v10, %v2033_v9  ;;  %v2036_v14 = vld [vmem:[#allocation7 + $0xe8] sm:$0xff]  ;;  %v2037_v24 = vld [vmem:[#allocation7 + $0xf0] sm:$0xff] }
  0x89   : > { %942 = vst [vmem:[#allocation2 + $0xd0] sm:$0xff] %v7687_v54  ;;  %943 = vst [vmem:[#allocation2 + $0xd8] sm:$0xff] %v7690_v55  ;;  %v7719_v21 = vld [vmem:[%s7568_s12 + $0xe8] sm:$0xff]  ;;  %v6234_v23 = vpack.c.bf16 %v2036_v14, %v2035_v13  ;;  %v2038_v30 = vld [vmem:[#allocation7 + $0xf8] sm:$0xff] }
  0x8a   : > { %9554 = vst [vmem:[#allocation39_spill] sm:$0xff] %v7696_v59  ;;  %944 = vst [vmem:[#allocation2 + $0xe0] sm:$0xff] %v7696_v59  ;;  %v6237_v33 = vpack.c.bf16 %v2038_v30, %v2037_v24  ;;  %v951_v38 = vld [vmem:[#allocation2 + $0x7] sm:$0xff]  ;;  %v2039_v39 = vld [vmem:[#allocation7 + $0x100] sm:$0xff] }
  0x8b   : > { %6214 = vmatpush1.bf16.msra.mxu0 %v6213_v42  ;;  %9555 = vst [vmem:[#allocation40_spill] sm:$0xff] %v7700_v61  ;;  %945 = vst [vmem:[#allocation2 + $0xe8] sm:$0xff] %v7700_v61  ;;  %v2040_v42 = vld [vmem:[#allocation7 + $0x108] sm:$0xff]  ;;  %v983_v45 = vmul.f32 %v7725_v36, %v951_v38  ;;  %v2041_v50 = vld [vmem:[#allocation7 + $0x110] sm:$0xff]  ;;  %v287_v38 = vadd.s32 64, %v7713_v11 }
  0x8c   : > { %6215 = vmatprep.subr.bf16.mxu0 %v9389_v0  ;;  %9556 = vst [vmem:[#allocation41_spill] sm:$0xff] %v7706_v6  ;;  %946 = vst [vmem:[#allocation2 + $0xf0] sm:$0xff] %v7706_v6  ;;  %v2042_v53 = vld [vmem:[#allocation7 + $0x118] sm:$0xff]  ;;  %v2044_v3 = vld [vmem:[#allocation7 + $0x128] sm:$0xff] }
  0x8d   : > { %9557 = vst [vmem:[#allocation42_spill] sm:$0xff] %v7710_v8  ;;  %947 = vst [vmem:[#allocation2 + $0xf8] sm:$0xff] %v7710_v8  ;;  %v952_v57 = vld [vmem:[#allocation2 + $0xf] sm:$0xff]  ;;  %v6243_v62 = vpack.c.bf16 %v2042_v53, %v2041_v50  ;;  %v2045_v9 = vld [vmem:[#allocation7 + $0x130] sm:$0xff]  ;;  %v371_v53 = vand.u32 15, %v287_v38 }
  0x8e   : > { %9558 = vst [vmem:[#allocation43_spill] sm:$0xff] %v7719_v21  ;;  %948 = vst [vmem:[#allocation2 + $0x100] sm:$0xff] %v7719_v21  ;;  %v2046_v10 = vld [vmem:[#allocation7 + $0x138] sm:$0xff]  ;;  %v2047_v24 = vld [vmem:[#allocation7 + $0x140] sm:$0xff] }
  0x8f   : > { %6217 = vmatpush1.bf16.msra.mxu0 %v6216_v49  ;;  %9559 = vst [vmem:[#allocation44_spill] sm:$0xff] %v7725_v36  ;;  %v6240_v49 = vpack.c.bf16 %v2040_v42, %v2039_v39  ;;  %v7749_v14 = vld [vmem:[#allocation2 + $0x27] sm:$0xff]  ;;  %v6249_v15 = vpack.c.bf16 %v2046_v10, %v2045_v9  ;;  %v2048_v30 = vld [vmem:[#allocation7 + $0x148] sm:$0xff]  ;;  %v7759_v44 = vld [vmem:[#allocation2 + $0x2f] sm:$0xff]  ;;  %vm703_vm4 = vcmp.gt.s32.totalorder %v371_v53, 0 }
  0x90   : > { %6218 = vmatprep.subr.bf16.mxu0 %v9389_v0  ;;  %v2049_v39 = vld [vmem:[#allocation7 + $0x150] sm:$0xff]  ;;  %v2050_v42 = vld [vmem:[#allocation7 + $0x158] sm:$0xff]  ;;  %v7794_v53 = vld [vmem:[#allocation2 + $0x57] sm:$0xff] }
  0x91   : > { %v6255_v50 = vpack.c.bf16 %v2050_v42, %v2049_v39  ;;  %v7779_v9 = vld [vmem:[#allocation2 + $0x47] sm:$0xff]  ;;  %v7789_v42 = vld [vmem:[#allocation2 + $0x4f] sm:$0xff] }
  0x92   : > { %v2057_v38 = vld [vmem:[#allocation7 + $0x190] sm:$0xff]  ;;  %v2058_v39 = vld [vmem:[#allocation7 + $0x198] sm:$0xff] }
  0x93   : > { %6220 = vmatpush1.bf16.msra.mxu0 %v6219_v56  ;;  %v283_v56 = vadd.s32 32, %v7713_v11 }
  0x94   : > { %6221 = vmatprep.subr.bf16.mxu0 %v9389_v0 }
  0x95   : > { %v343_v63 = vand.u32 15, %v283_v56  ;;  %v2051_v56 = vld [vmem:[#allocation7 + $0x160] sm:$0xff] }
  0x97   : > { %6223 = vmatpush1.bf16.msra.mxu0 %v6222_v60  ;;  %v7735_v60 = vld [vmem:[#allocation2 + $0x17] sm:$0xff]  ;;  %vm699_vm2 = vcmp.gt.s32.totalorder %v343_v63, 0 }
  0x98   : > { %6224 = vmatprep.subr.bf16.mxu0 %v9389_v0  ;;  %v985_v4 = vmul.f32 %v7733_v58, %v7735_v60  ;;  %v7747_v13 = vsel %vm699_vm2, 1.0, %v9385_v1 }
  0x99   : > { %9560 = vst [vmem:[#allocation45_spill] sm:$0xff] %v7747_v13  ;;  %v987_v32 = vmul.f32 %v7747_v13, %v7749_v14 }
  0x9b   : > { %6226 = vmatpush1.bf16.msra.mxu0 %v6225_v2  ;;  %v2043_v2 = vld [vmem:[#allocation7 + $0x120] sm:$0xff] }
  0x9c   : > { %6227 = vmatprep.subr.bf16.mxu0 %v9389_v0  ;;  %v6246_v5 = vpack.c.bf16 %v2044_v3, %v2043_v2  ;;  %v289_v2 = vadd.s32 80, %v7713_v11  ;;  %v2053_v3 = vld [vmem:[#allocation7 + $0x170] sm:$0xff] }
  0x9f   : > { %6229 = vmatpush1.bf16.msra.mxu0 %v6228_v7  ;;  %v285_v7 = vadd.s32 48, %v7713_v11 }
  0xa0   : > { %6230 = vmatprep.subr.bf16.mxu0 %v9389_v0 }
  0xa3   : > { %6232 = vmatpush1.bf16.msra.mxu0 %v6231_v12  ;;  %v7744_v12 = vld [vmem:[#allocation2 + $0x1f] sm:$0xff] }
  0xa4   : > { %6233 = vmatprep.subr.bf16.mxu0 %v9389_v0 }
  0xa7   : > { %6235 = vmatpush1.bf16.msra.mxu0 %v6234_v23  ;;  %v357_v23 = vand.u32 15, %v285_v7  ;;  %v7777_v7 = vsel %vm703_vm4, 1.0, %v9385_v1 }
  0xa8   : > { %6236 = vmatprep.subr.bf16.mxu0 %v9389_v0  ;;  %9562 = vst [vmem:[#allocation47_spill] sm:$0xff] %v7777_v7 }
  0xa9   : > { %vm701_vm3 = vcmp.gt.s32.totalorder %v357_v23, 0  ;;  %v2055_v23 = vld [vmem:[#allocation7 + $0x180] sm:$0xff] }
  0xab   : > { %6238 = vmatpush1.bf16.msra.mxu0 %v6237_v33  ;;  %v6252_v33 = vpack.c.bf16 %v2048_v30, %v2047_v24  ;;  %v2056_v24 = vld [vmem:[#allocation7 + $0x188] sm:$0xff]  ;;  %v991_v30 = vmul.f32 %v7777_v7, %v7779_v9 }
  0xac   : > { %6239 = vmatprep.subr.bf16.mxu0 %v9389_v0 }
  0xae   : > { %2223 = vmatmul.mubr.f32.vlgmr.msra.gmra.mrb[0].mxu0 %v983_v45  ;;  %v7762_v45 = vsel %vm701_vm3, 1.0, %v9385_v1 }
  0xaf   : > { %6241 = vmatpush1.bf16.msra.mxu0 %v6240_v49  ;;  %2227 = vmatprep.mubr.f32.mxu0 %v9385_v1  ;;  %9561 = vst [vmem:[#allocation46_spill] sm:$0xff] %v7762_v45  ;;  %v7764_v49 = vld [vmem:[#allocation2 + $0x37] sm:$0xff] }
  0xb0   : > { %6242 = vmatprep.subr.bf16.mxu0 %v9389_v0 }
  0xb2   : > { %2228 = vmatmul.mubr.f32.gmra.mrb[2].mxu0 %v952_v57  ;;  %v2052_v57 = vld [vmem:[#allocation7 + $0x168] sm:$0xff] }
  0xb3   : > { %2232 = vmatprep.mubr.f32.mxu0 %v7590_v16  ;;  %6244 = vmatpush1.bf16.msra.mxu0 %v6243_v62  ;;  %v989_v62 = vmul.f32 %v7762_v45, %v7764_v49  ;;  %v6258_v63 = vpack.c.bf16 %v2052_v57, %v2051_v56  ;;  %v6267_v56 = vpack.c.bf16 %v2058_v39, %v2057_v38  ;;  %v2063_v38 = vld [vmem:[#allocation7 + $0x1c0] sm:$0xff]  ;;  %v2064_v39 = vld [vmem:[#allocation7 + $0x1c8] sm:$0xff] }
  0xb4   : > { %6245 = vmatprep.subr.bf16.mxu0 %v9389_v0 }
  0xb6   : > { %2233 = vmatmul.mubr.f32.gmra.mrb[4].mxu0 %v985_v4  ;;  %v2054_v4 = vld [vmem:[#allocation7 + $0x178] sm:$0xff] }
  0xb7   : > { %2237 = vmatprep.mubr.f32.mxu0 %v7594_v17  ;;  %6247 = vmatpush1.bf16.msra.mxu0 %v6246_v5  ;;  %v7774_v5 = vld [vmem:[#allocation2 + $0x3f] sm:$0xff]  ;;  %v6261_v10 = vpack.c.bf16 %v2054_v4, %v2053_v3  ;;  %v293_v4 = vadd.s32 112, %v7713_v11 }
  0xb8   : > { %6248 = vmatprep.subr.bf16.mxu0 %v9389_v0 }
  0xba   : > { %2238 = vmatmul.mubr.f32.gmra.mrb[6].mxu0 %v7744_v12 }
  0xbb   : > { %2242 = vmatprep.mubr.f32.mxu0 %v7597_v18  ;;  %6250 = vmatpush1.bf16.msra.mxu0 %v6249_v15  ;;  %v385_v15 = vand.u32 15, %v289_v2  ;;  %v284_v18 = vadd.s32 40, %v7713_v11 }
  0xbc   : > { %6251 = vmatprep.subr.bf16.mxu0 %v9389_v0 }
  0xbd   : > { %vm705_vm5 = vcmp.gt.s32.totalorder %v385_v15, 0  ;;  %v2062_v15 = vld [vmem:[#allocation7 + $0x1b8] sm:$0xff] }
  0xbe   : > { %2243 = vmatmul.mubr.f32.gmra.mrb[8].mxu0 %v987_v32  ;;  %v6264_v32 = vpack.c.bf16 %v2056_v24, %v2055_v23  ;;  %v7804_v23 = vld [vmem:[#allocation2 + $0x5f] sm:$0xff] }
  0xbf   : > { %2247 = vmatprep.mubr.f32.mxu0 %v7602_v19  ;;  %6253 = vmatpush1.bf16.msra.mxu0 %v6252_v33  ;;  %v291_v33 = vadd.s32 96, %v7713_v11 }
  0xc0   : > { %6254 = vmatprep.subr.bf16.mxu0 %v9389_v0 }
  0xc1   : > { %v399_v57 = vand.u32 15, %v291_v33  ;;  %v413_v33 = vand.u32 15, %v293_v4 }
  0xc2   : > { %2248 = vmatmul.mubr.f32.gmra.mrb[10].mxu0 %v7759_v44 }
  0xc3   : > { %2252 = vmatprep.mubr.f32.mxu0 %v7605_v20  ;;  %6256 = vmatpush1.bf16.msra.mxu0 %v6255_v50  ;;  %v7792_v50 = vsel %vm705_vm5, 1.0, %v9385_v1  ;;  %vm707_vm6 = vcmp.gt.s32.totalorder %v399_v57, 0  ;;  %v6276_v57 = vpack.c.bf16 %v2064_v39, %v2063_v38  ;;  %vm709_vm7 = vcmp.gt.s32.totalorder %v413_v33, 0  ;;  %v2067_v33 = vld [vmem:[#allocation7 + $0x1e0] sm:$0xff]  ;;  %v2068_v38 = vld [vmem:[#allocation7 + $0x1e8] sm:$0xff] }
  0xc4   : > { %6257 = vmatprep.subr.bf16.mxu0 %v9389_v0  ;;  %9563 = vst [vmem:[#allocation48_spill] sm:$0xff] %v7792_v50  ;;  %v993_v2 = vmul.f32 %v7792_v50, %v7794_v53  ;;  %v7807_v24 = vsel %vm707_vm6, 1.0, %v9385_v1  ;;  %v7822_v4 = vsel %vm709_vm7, 1.0, %v9385_v1  ;;  %v297_v1 = vadd.s32 144, %v7713_v11 }
  0xc5   : > { %9564 = vst [vmem:[#allocation49_spill] sm:$0xff] %v7807_v24  ;;  %9565 = vst [vmem:[#allocation50_spill] sm:$0xff] %v7822_v4 }
  0xc6   : > { %2253 = vmatmul.mubr.f32.gmra.mrb[12].mxu0 %v989_v62  ;;  %v2059_v62 = vld [vmem:[#allocation7 + $0x1a0] sm:$0xff] }
  0xc7   : > { %2257 = vmatprep.mubr.f32.mxu0 %v7610_v22  ;;  %6259 = vmatpush1.bf16.msra.mxu0 %v6258_v63  ;;  %v2060_v63 = vld [vmem:[#allocation7 + $0x1a8] sm:$0xff] }
  0xc8   : > { %6260 = vmatprep.subr.bf16.mxu0 %v9389_v0  ;;  %v6270_v3 = vpack.c.bf16 %v2060_v63, %v2059_v62  ;;  %v295_v62 = vadd.s32 128, %v7713_v11  ;;  %v2065_v63 = vld [vmem:[#allocation7 + $0x1d0] sm:$0xff] }
  0xca   : > { %2258 = vmatmul.mubr.f32.gmra.mrb[14].mxu0 %v7774_v5 }
  0xcb   : > { %2262 = vmatprep.mubr.f32.mxu0 %v7615_v25  ;;  %6262 = vmatpush1.bf16.msra.mxu0 %v6261_v10  ;;  %v2061_v10 = vld [vmem:[#allocation7 + $0x1b0] sm:$0xff]  ;;  %v1111_v25 = vld [vmem:[#allocation2 + $0x9] sm:$0xff] }
  0xcc   : > { %6263 = vmatprep.subr.bf16.mxu0 %v9389_v0 }
  0xce   : > { %2263 = vmatmul.mubr.f32.gmra.mrb[16].mxu0 %v991_v30  ;;  %v7809_v30 = vld [vmem:[#allocation2 + $0x67] sm:$0xff] }
  0xcf   : > { %2267 = vmatprep.mubr.f32.mxu0 %v7619_v26  ;;  %6265 = vmatpush1.bf16.msra.mxu0 %v6264_v32  ;;  %v6273_v32 = vpack.c.bf16 %v2062_v15, %v2061_v10  ;;  %v7824_v10 = vld [vmem:[#allocation2 + $0x77] sm:$0xff] }
  0xd0   : > { %6266 = vmatprep.subr.bf16.mxu0 %v9389_v0  ;;  %v997_v39 = vmul.f32 %v7822_v4, %v7824_v10  ;;  %v2072_v26 = vld [vmem:[#allocation7 + $0x208] sm:$0xff] }
  0xd2   : > { %2268 = vmatmul.mubr.f32.gmra.mrb[18].mxu0 %v7789_v42 }
  0xd3   : > { %2272 = vmatprep.mubr.f32.mxu0 %v7622_v27  ;;  %6268 = vmatpush1.bf16.msra.mxu0 %v6267_v56  ;;  %v995_v56 = vmul.f32 %v7807_v24, %v7809_v30  ;;  %v918_v27 = vld [vmem:[%s7568_s12 + $0xf8] sm:$0xff] }
  0xd4   : > { %6269 = vmatprep.subr.bf16.mxu0 %v9389_v0  ;;  %950 = vst [vmem:[#allocation2 + $0x110] sm:$0xff] %v918_v27  ;;  %v282_v27 = vadd.s32 24, %v7713_v11 }
  0xd6   : > { %2273 = vmatmul.mubr.f32.gmra.mrb[20].mxu0 %v993_v2  ;;  %v2066_v2 = vld [vmem:[#allocation7 + $0x1d8] sm:$0xff]  ;;  %v336_v20 = vand.u32 15, %v282_v27  ;;  %v7956_v27 = vld [vmem:[#allocation2 + $0x19] sm:$0xff] }
  0xd7   : > { %2277 = vmatprep.mubr.f32.mxu0 %v7627_v28  ;;  %6271 = vmatpush1.bf16.msra.mxu0 %v6270_v3  ;;  %v7819_v3 = vld [vmem:[#allocation2 + $0x6f] sm:$0xff]  ;;  %v6279_v15 = vpack.c.bf16 %v2066_v2, %v2065_v63  ;;  %v7834_v63 = vld [vmem:[#allocation2 + $0x7f] sm:$0xff]  ;;  %v9566_v2 = vmov 0.0   ;;  %v7932_v28 = vld [vmem:[#allocation2 + $0xf7] sm:$0xff] }
  0xd8   : > { %6272 = vmatprep.subr.bf16.mxu0 %v9389_v0  ;;  %vm794_vm1 = vcmp.lt.s32.totalorder %v336_v20, 15  ;;  %v2078_v20 = vld [vmem:[#allocation7 + $0x238] sm:$0xff] }
  0xda   : > { %2278 = vmatmul.mubr.f32.gmra.mrb[22].mxu0 %v7804_v23 }
  0xdb   : > { %2282 = vmatprep.mubr.f32.mxu0 %v7630_v29  ;;  %6274 = vmatpush1.bf16.msra.mxu0 %v6273_v32  ;;  %v427_v32 = vand.u32 15, %v295_v62  ;;  %v2070_v62 = vld [vmem:[#allocation7 + $0x1f8] sm:$0xff] }
  0xdc   : > { %6275 = vmatprep.subr.bf16.mxu0 %v9389_v0  ;;  %v7839_v29 = vld [vmem:[#allocation2 + $0x87] sm:$0xff] }
  0xdd   : > { %vm711_vm8 = vcmp.gt.s32.totalorder %v427_v32, 0 }
  0xde   : > { %2283 = vmatmul.mubr.f32.gmra.mrb[24].mxu0 %v995_v56  ;;  %v6282_v56 = vpack.c.bf16 %v2068_v38, %v2067_v33  ;;  %v441_v33 = vand.u32 15, %v297_v1  ;;  %v299_v38 = vadd.s32 160, %v7713_v11 }
  0xdf   : > { %2287 = vmatprep.mubr.f32.mxu0 %v7635_v31  ;;  %6277 = vmatpush1.bf16.msra.mxu0 %v6276_v57  ;;  %v2069_v57 = vld [vmem:[#allocation7 + $0x1f0] sm:$0xff]  ;;  %v7837_v31 = vsel %vm711_vm8, 1.0, %v9566_v2 }
  0xe0   : > { %6278 = vmatprep.subr.bf16.mxu0 %v9389_v0  ;;  %9567 = vst [vmem:[#allocation51_spill] sm:$0xff] %v7837_v31  ;;  %v999_v32 = vmul.f32 %v7837_v31, %v7839_v29  ;;  %vm713_vm9 = vcmp.gt.s32.totalorder %v441_v33, 0  ;;  %v7862_v33 = vld [vmem:[#allocation2 + $0x9f] sm:$0xff] }
  0xe1   : > { %v7852_v1 = vsel %vm713_vm9, 1.0, %v9566_v2 }
  0xe2   : > { %2288 = vmatmul.mubr.f32.gmra.mrb[26].mxu0 %v7819_v3  ;;  %9568 = vst [vmem:[#allocation52_spill] sm:$0xff] %v7852_v1 }
  0xe3   : > { %2292 = vmatprep.mubr.f32.mxu0 %v7640_v34  ;;  %6280 = vmatpush1.bf16.msra.mxu0 %v6279_v15  ;;  %v6285_v15 = vpack.c.bf16 %v2070_v62, %v2069_v57  ;;  %v455_v57 = vand.u32 15, %v299_v38 }
  0xe4   : > { %6281 = vmatprep.subr.bf16.mxu0 %v9389_v0 }
  0xe5   : > { %vm715_vm10 = vcmp.gt.s32.totalorder %v455_v57, 0  ;;  %v303_v57 = vadd.s32 192, %v7713_v11 }
  0xe6   : > { %2293 = vmatmul.mubr.f32.gmra.mrb[28].mxu0 %v997_v39  ;;  %v7849_v39 = vld [vmem:[#allocation2 + $0x8f] sm:$0xff] }
  0xe7   : > { %2297 = vmatprep.mubr.f32.mxu0 %v7644_v35  ;;  %6283 = vmatpush1.bf16.msra.mxu0 %v6282_v56  ;;  %v7854_v56 = vld [vmem:[#allocation2 + $0x97] sm:$0xff] }
  0xe8   : > { %6284 = vmatprep.subr.bf16.mxu0 %v9389_v0  ;;  %v1001_v62 = vmul.f32 %v7852_v1, %v7854_v56 }
  0xea   : > { %2298 = vmatmul.mubr.f32.gmra.mrb[30].mxu0 %v7834_v63 }
  0xeb   : > { %2302 = vmatprep.mubr.f32.mxu0 %v7648_v37  ;;  %6286 = vmatpush1.bf16.msra.mxu0 %v6285_v15  ;;  %v301_v15 = vadd.s32 176, %v7713_v11 }
  0xec   : > { %6287 = vmatprep.subr.bf16.mxu0 %v9389_v0  ;;  %v7867_v0 = vld [vmem:[#allocation2 + $0xa7] sm:$0xff] }
  0xed   : > { %v469_v38 = vand.u32 15, %v301_v15  ;;  %v483_v15 = vand.u32 15, %v303_v57 }
  0xee   : > { %2303 = vmatmul.mubr.f32.gmra.mrb[32].mxu0 %v999_v32  ;;  %v7865_v32 = vsel %vm715_vm10, 1.0, %v9566_v2 }
  0xef   : > { %2307 = vmatprep.mubr.f32.mxu0 %v7653_v40  ;;  %9569 = vst [vmem:[#allocation53_spill] sm:$0xff] %v7865_v32  ;;  %v1003_v40 = vmul.f32 %v7865_v32, %v7867_v0  ;;  %vm717_vm11 = vcmp.gt.s32.totalorder %v469_v38, 0  ;;  %vm719_vm12 = vcmp.gt.s32.totalorder %v483_v15, 0  ;;  %v7888_v38 = vld [vmem:[#allocation2 + $0xbf] sm:$0xff]  ;;  %v7901_v15 = vld [vmem:[#allocation2 + $0xcf] sm:$0xff] }
  0xf2   : > { %2308 = vmatmul.mubr.f32.gmra.mrb[34].mxu0 %v7849_v39 }
  0xf3   : > { %2312 = vmatprep.mubr.f32.mxu0 %v7657_v41  ;;  %v7880_v41 = vld [vmem:[#allocation2 + $0xb7] sm:$0xff] }
  0xf6   : > { %2313 = vmatmul.mubr.f32.gmra.mrb[36].mxu0 %v1001_v62  ;;  %v7875_v62 = vld [vmem:[#allocation2 + $0xaf] sm:$0xff] }
  0xf7   : > { %2317 = vmatprep.mubr.f32.mxu0 %v7661_v43  ;;  %v7878_v43 = vsel %vm717_vm11, 1.0, %v9566_v2 }
  0xf8   : > { %9570 = vst [vmem:[#allocation54_spill] sm:$0xff] %v7878_v43  ;;  %v1005_v37 = vmul.f32 %v7878_v43, %v7880_v41 }
  0xfa   : > { %2318 = vmatmul.mubr.f32.gmra.mrb[38].mxu0 %v7862_v33 }
  0xfb   : > { %2322 = vmatprep.mubr.f32.mxu0 %v7666_v46  ;;  %v7893_v46 = vld [vmem:[#allocation2 + $0xc7] sm:$0xff] }
  0xfe   : > { %2323 = vmatmul.mubr.f32.gmra.mrb[40].mxu0 %v1003_v40  ;;  %v305_v40 = vadd.s32 208, %v7713_v11 }
  0xff   : > { %2327 = vmatprep.mubr.f32.mxu0 %v7670_v47  ;;  %v7891_v47 = vsel %vm719_vm12, 1.0, %v9566_v2 }
 0x100   : > { %9571 = vst [vmem:[#allocation55_spill] sm:$0xff] %v7891_v47  ;;  %v497_v57 = vand.u32 15, %v305_v40  ;;  %v1007_v35 = vmul.f32 %v7891_v47, %v7893_v46  ;;  %v7906_v40 = vld [vmem:[#allocation2 + $0xd7] sm:$0xff] }
 0x102   : > { %2328 = vmatmul.mubr.f32.gmra.mrb[42].mxu0 %v7875_v62  ;;  %vm721_vm13 = vcmp.gt.s32.totalorder %v497_v57, 0  ;;  %v7914_v57 = vld [vmem:[#allocation2 + $0xdf] sm:$0xff] }
 0x103   : > { %2332 = vmatprep.mubr.f32.mxu0 %v7673_v48 }
 0x106   : > { %2333 = vmatmul.mubr.f32.gmra.mrb[44].mxu0 %v1005_v37  ;;  %v307_v37 = vadd.s32 224, %v7713_v11 }
 0x107   : > { %2337 = vmatprep.mubr.f32.mxu0 %v7678_v51  ;;  %v7904_v51 = vsel %vm721_vm13, 1.0, %v9566_v2 }
 0x108   : > { %9572 = vst [vmem:[#allocation56_spill] sm:$0xff] %v7904_v51  ;;  %v511_v48 = vand.u32 15, %v307_v37  ;;  %v7919_v37 = vld [vmem:[#allocation2 + $0xe7] sm:$0xff] }
 0x10a   : > { %2338 = vmatmul.mubr.f32.gmra.mrb[46].mxu0 %v7888_v38  ;;  %vm723_vm14 = vcmp.gt.s32.totalorder %v511_v48, 0  ;;  %v917_v48 = vld [vmem:[%s7568_s12 + $0xf0] sm:$0xff] }
 0x10b   : > { %2342 = vmatprep.mubr.f32.mxu0 %v7681_v52  ;;  %v1009_v52 = vmul.f32 %v7904_v51, %v7906_v40  ;;  %949 = vst [vmem:[#allocation2 + $0x108] sm:$0xff] %v917_v48 }
 0x10e   : > { %2343 = vmatmul.mubr.f32.gmra.mrb[48].mxu0 %v1007_v35  ;;  %v309_v35 = vadd.s32 240, %v7713_v11 }
 0x10f   : > { %2347 = vmatprep.mubr.f32.mxu0 %v7687_v54  ;;  %v7917_v54 = vsel %vm723_vm14, 1.0, %v9566_v2 }
 0x110   : > { %9573 = vst [vmem:[#allocation57_spill] sm:$0xff] %v7917_v54  ;;  %v525_v34 = vand.u32 15, %v309_v35  ;;  %v280_v35 = vadd.s32 8, %v7713_v11 }
 0x112   : > { %2348 = vmatmul.mubr.f32.gmra.mrb[50].mxu0 %v7901_v15  ;;  %vm725_vm15 = vcmp.gt.s32.totalorder %v525_v34, 0  ;;  %v322_v34 = vand.u32 15, %v280_v35 }
 0x113   : > { %2352 = vmatprep.mubr.f32.mxu0 %v7690_v55  ;;  %v1011_v55 = vmul.f32 %v7917_v54, %v7919_v37 }
 0x114   : > { %vm792_vm0 = vcmp.lt.s32.totalorder %v322_v34, 15  ;;  %v1241_v34 = vmul.f32 %v7733_v58, %v7749_v14 }
 0x115   : > { %v7948_v35 = vsel %vm792_vm0, 1.0, %v9566_v2 }
 0x116   : > { %2353 = vmatmul.mubr.f32.gmra.mrb[52].mxu0 %v1009_v52  ;;  %v7927_v52 = vld [vmem:[#allocation2 + $0xef] sm:$0xff] }
 0x117   : > { %2357 = vmatprep.mubr.f32.mxu0 %v7696_v59  ;;  %v7930_v59 = vsel %vm725_vm15, 1.0, %v9566_v2 }
 0x118   : > { %9574 = vst [vmem:[#allocation58_spill] sm:$0xff] %v7930_v59  ;;  %v1013_v48 = vmul.f32 %v7930_v59, %v7932_v28 }
 0x11a   : > { %2358 = vmatmul.mubr.f32.gmra.mrb[54].mxu0 %v7914_v57 }
 0x11b   : > { %2362 = vmatprep.mubr.f32.mxu0 %v7700_v61  ;;  %v1239_v61 = vmul.f32 %v7725_v36, %v7735_v60 }
 0x11e   : > { %2363 = vmatmul.mubr.f32.gmra.mrb[56].mxu0 %v1011_v55  ;;  %v7941_v55 = vld [vmem:[#allocation2 + $0xff] sm:$0xff] }
 0x11f   : > { %2367 = vmatprep.mubr.f32.mxu0 %v7706_v6  ;;  %v2071_v6 = vld [vmem:[#allocation7 + $0x200] sm:$0xff] }
 0x120   : > { %v6288_v22 = vpack.c.bf16 %v2072_v26, %v2071_v6  ;;  %v2075_v26 = vld [vmem:[#allocation7 + $0x220] sm:$0xff]  ;;  %v2076_v6 = vld [vmem:[#allocation7 + $0x228] sm:$0xff] }
 0x122   : > { %2368 = vmatmul.mubr.f32.gmra.mrb[58].mxu0 %v7927_v52 }
 0x123   : > { %2372 = vmatprep.mubr.f32.mxu0 %v7710_v8  ;;  %v2073_v8 = vld [vmem:[#allocation7 + $0x210] sm:$0xff] }
 0x126   : > { %2373 = vmatmul.mubr.f32.gmra.mrb[60].mxu0 %v1013_v48  ;;  %v1112_v48 = vld [vmem:[#allocation2 + $0x11] sm:$0xff] }
 0x127   : > { %2377 = vmatprep.mubr.f32.mxu0 %v7719_v21  ;;  %v2074_v21 = vld [vmem:[#allocation7 + $0x218] sm:$0xff]  ;;  %v1144_v60 = vmul.f32 %v7948_v35, %v1112_v48 }
 0x128   : > { %v6291_v19 = vpack.c.bf16 %v2074_v21, %v2073_v8  ;;  %v350_v8 = vand.u32 15, %v284_v18  ;;  %v2077_v21 = vld [vmem:[#allocation7 + $0x230] sm:$0xff]  ;;  %v2079_v18 = vld [vmem:[#allocation7 + $0x240] sm:$0xff] }
 0x129   : > { %v6297_v48 = vpack.c.bf16 %v2078_v20, %v2077_v21  ;;  %v2082_v21 = vld [vmem:[#allocation7 + $0x258] sm:$0xff] }
 0x12a   : > { %2378 = vmatmul.mubr.f32.gmra.mrb[62].mxu0 %v7941_v55  ;;  %vm796_vm2 = vcmp.lt.s32.totalorder %v350_v8, 15  ;;  %v2081_v8 = vld [vmem:[#allocation7 + $0x250] sm:$0xff] }
 0x12b   : > { %2447 = vmatprep.mubr.f32.mxu0 %v1239_v61  ;;  %v9575_v61 = vmov 0.0|0.0  }
 0x12e   : > { %2448 = vmatmul.mubr.f32.vlgmr.msra.gmra.mrb[0].mxu0 %v1111_v25  ;;  %v7961_v25 = vld [vmem:[#allocation2 + $0x21] sm:$0xff] }
 0x12f   : > { %6289 = vmatpush1.bf16.msra.mxu0 %v6288_v22  ;;  %2452 = vmatprep.mubr.f32.mxu0 %v7744_v12  ;;  %v7959_v22 = vsel %vm794_vm1, 1.0, %v9566_v2  ;;  %v6294_v12 = vpack.c.bf16 %v2076_v6, %v2075_v26  ;;  %v7972_v26 = vld [vmem:[#allocation2 + $0x29] sm:$0xff]  ;;  %v7975_v6 = vsel %vm796_vm2, 1.0, %v9566_v2 }
 0x130   : > { %6290 = vmatprep.subr.bf16.mxu0 %v9575_v61  ;;  %v1146_v14 = vmul.f32 %v7959_v22, %v7961_v25 }
 0x132   : > { %2453 = vmatmul.mubr.f32.gmra.mrb[2].mxu0 %v1144_v60  ;;  %v286_v60 = vadd.s32 56, %v7713_v11 }
 0x133   : > { %2457 = vmatprep.mubr.f32.mxu0 %v1241_v34  ;;  %6292 = vmatpush1.bf16.msra.mxu0 %v6291_v19  ;;  %v1243_v19 = vmul.f32 %v7747_v13, %v7764_v49  ;;  %v2080_v34 = vld [vmem:[#allocation7 + $0x248] sm:$0xff]  ;;  %v2106_v13 = vld [vmem:[#allocation7 + $0x318] sm:$0xff] }
 0x134   : > { %6293 = vmatprep.subr.bf16.mxu0 %v9575_v61  ;;  %v6300_v49 = vpack.c.bf16 %v2080_v34, %v2079_v18  ;;  %v2084_v18 = vld [vmem:[#allocation7 + $0x268] sm:$0xff] }
 0x135   : > { %v7988_v34 = vld [vmem:[#allocation2 + $0x39] sm:$0xff] }
 0x136   : > { %2458 = vmatmul.mubr.f32.gmra.mrb[4].mxu0 %v7956_v27 }
 0x137   : > { %2462 = vmatprep.mubr.f32.mxu0 %v7759_v44  ;;  %6295 = vmatpush1.bf16.msra.mxu0 %v6294_v12  ;;  %v7977_v44 = vld [vmem:[#allocation2 + $0x31] sm:$0xff]  ;;  %v364_v12 = vand.u32 15, %v286_v60 }
 0x138   : > { %6296 = vmatprep.subr.bf16.mxu0 %v9575_v61  ;;  %v1148_v20 = vmul.f32 %v7975_v6, %v7977_v44  ;;  %v2083_v60 = vld [vmem:[#allocation7 + $0x260] sm:$0xff] }
 0x139   : > { %vm798_vm3 = vcmp.lt.s32.totalorder %v364_v12, 15  ;;  %v2085_v12 = vld [vmem:[#allocation7 + $0x270] sm:$0xff] }
 0x13a   : > { %2463 = vmatmul.mubr.f32.gmra.mrb[6].mxu0 %v1146_v14  ;;  %v1245_v14 = vmul.f32 %v7762_v45, %v7779_v9  ;;  %v7991_v17 = vsel %vm798_vm3, 1.0, %v9566_v2  ;;  %v6306_v9 = vpack.c.bf16 %v2084_v18, %v2083_v60  ;;  %v2088_v60 = vld [vmem:[#allocation7 + $0x288] sm:$0xff]  ;;  %v8004_v18 = vld [vmem:[#allocation2 + $0x49] sm:$0xff]  ;;  %v2105_v45 = vld [vmem:[#allocation7 + $0x310] sm:$0xff] }
 0x13b   : > { %2467 = vmatprep.mubr.f32.mxu0 %v1243_v19  ;;  %6298 = vmatpush1.bf16.msra.mxu0 %v6297_v48  ;;  %v6303_v19 = vpack.c.bf16 %v2082_v21, %v2081_v8  ;;  %v288_v48 = vadd.s32 72, %v7713_v11  ;;  %v2086_v8 = vld [vmem:[#allocation7 + $0x278] sm:$0xff] }
 0x13c   : > { %6299 = vmatprep.subr.bf16.mxu0 %v9575_v61 }
 0x13e   : > { %2468 = vmatmul.mubr.f32.gmra.mrb[8].mxu0 %v7972_v26 }
 0x13f   : > { %2472 = vmatprep.mubr.f32.mxu0 %v7774_v5  ;;  %6301 = vmatpush1.bf16.msra.mxu0 %v6300_v49  ;;  %v7993_v5 = vld [vmem:[#allocation2 + $0x41] sm:$0xff]  ;;  %v378_v49 = vand.u32 15, %v288_v48  ;;  %v2087_v48 = vld [vmem:[#allocation7 + $0x280] sm:$0xff] }
 0x140   : > { %6302 = vmatprep.subr.bf16.mxu0 %v9575_v61  ;;  %v1150_v21 = vmul.f32 %v7991_v17, %v7993_v5 }
 0x141   : > { %vm800_vm4 = vcmp.lt.s32.totalorder %v378_v49, 15  ;;  %v2089_v49 = vld [vmem:[#allocation7 + $0x290] sm:$0xff] }
 0x142   : > { %2473 = vmatmul.mubr.f32.gmra.mrb[10].mxu0 %v1148_v20  ;;  %v1247_v20 = vmul.f32 %v7777_v7, %v7794_v53  ;;  %v8007_v16 = vsel %vm800_vm4, 1.0, %v9566_v2  ;;  %v6312_v53 = vpack.c.bf16 %v2088_v60, %v2087_v48  ;;  %v1249_v2 = vmul.f32 %v7792_v50, %v7809_v30  ;;  %v8020_v48 = vld [vmem:[#allocation2 + $0x59] sm:$0xff]  ;;  %v8022_v60 = vld [vmem:[#allocation2 + $0x8] sm:$0xff] }
 0x143   : > { %2477 = vmatprep.mubr.f32.mxu0 %v1245_v14  ;;  %6304 = vmatpush1.bf16.msra.mxu0 %v6303_v19  ;;  %v6309_v14 = vpack.c.bf16 %v2086_v8, %v2085_v12  ;;  %v290_v19 = vadd.s32 88, %v7713_v11  ;;  %v2090_v12 = vld [vmem:[#allocation7 + $0x298] sm:$0xff] }
 0x144   : > { %6305 = vmatprep.subr.bf16.mxu0 %v9575_v61  ;;  %v8027_v7 = vld [vmem:[#allocation2 + $0x61] sm:$0xff] }
 0x146   : > { %2478 = vmatmul.mubr.f32.gmra.mrb[12].mxu0 %v7988_v34 }
 0x147   : > { %2482 = vmatprep.mubr.f32.mxu0 %v7789_v42  ;;  %6307 = vmatpush1.bf16.msra.mxu0 %v6306_v9  ;;  %v8009_v42 = vld [vmem:[#allocation2 + $0x51] sm:$0xff]  ;;  %v392_v9 = vand.u32 15, %v290_v19 }
 0x148   : > { %6308 = vmatprep.subr.bf16.mxu0 %v9575_v61  ;;  %v1152_v8 = vmul.f32 %v8007_v16, %v8009_v42  ;;  %v2092_v19 = vld [vmem:[#allocation7 + $0x2a8] sm:$0xff] }
 0x149   : > { %vm802_vm5 = vcmp.lt.s32.totalorder %v392_v9, 15  ;;  %v2093_v9 = vld [vmem:[#allocation7 + $0x2b0] sm:$0xff] }
 0x14a   : > { %2483 = vmatmul.mubr.f32.gmra.mrb[14].mxu0 %v1150_v21  ;;  %v6315_v21 = vpack.c.bf16 %v2090_v12, %v2089_v49  ;;  %v2094_v49 = vld [vmem:[#allocation7 + $0x2b8] sm:$0xff] }
 0x14b   : > { %2487 = vmatprep.mubr.f32.mxu0 %v1247_v20  ;;  %6310 = vmatpush1.bf16.msra.mxu0 %v6309_v14  ;;  %v292_v20 = vadd.s32 104, %v7713_v11  ;;  %v2091_v14 = vld [vmem:[#allocation7 + $0x2a0] sm:$0xff] }
 0x14c   : > { %6311 = vmatprep.subr.bf16.mxu0 %v9575_v61  ;;  %v6318_v30 = vpack.c.bf16 %v2092_v19, %v2091_v14  ;;  %v2096_v14 = vld [vmem:[#allocation7 + $0x2c8] sm:$0xff]  ;;  %v8038_v19 = vld [vmem:[#allocation2 + $0x69] sm:$0xff] }
 0x14e   : > { %2488 = vmatmul.mubr.f32.gmra.mrb[16].mxu0 %v8004_v18 }
 0x14f   : > { %2492 = vmatprep.mubr.f32.mxu0 %v7804_v23  ;;  %6313 = vmatpush1.bf16.msra.mxu0 %v6312_v53  ;;  %v8025_v23 = vsel %vm802_vm5, 1.0, %v8022_v60  ;;  %v406_v53 = vand.u32 15, %v292_v20  ;;  %v2095_v20 = vld [vmem:[#allocation7 + $0x2c0] sm:$0xff] }
 0x150   : > { %6314 = vmatprep.subr.bf16.mxu0 %v9575_v61  ;;  %v1154_v12 = vmul.f32 %v8025_v23, %v8027_v7 }
 0x151   : > { %vm804_vm6 = vcmp.lt.s32.totalorder %v406_v53, 15  ;;  %v2097_v53 = vld [vmem:[#allocation7 + $0x2d0] sm:$0xff] }
 0x152   : > { %2493 = vmatmul.mubr.f32.gmra.mrb[18].mxu0 %v1152_v8  ;;  %v1251_v8 = vmul.f32 %v7807_v24, %v7824_v10  ;;  %v8041_v50 = vsel %vm804_vm6, 1.0, %v8022_v60  ;;  %v6324_v10 = vpack.c.bf16 %v2096_v14, %v2095_v20  ;;  %v2100_v20 = vld [vmem:[#allocation7 + $0x2e8] sm:$0xff] }
 0x153   : > { %2497 = vmatprep.mubr.f32.mxu0 %v1249_v2  ;;  %6316 = vmatpush1.bf16.msra.mxu0 %v6315_v21  ;;  %v6321_v2 = vpack.c.bf16 %v2094_v49, %v2093_v9  ;;  %v294_v21 = vadd.s32 120, %v7713_v11  ;;  %v2098_v9 = vld [vmem:[#allocation7 + $0x2d8] sm:$0xff]  ;;  %v8054_v14 = vld [vmem:[#allocation2 + $0x79] sm:$0xff] }
 0x154   : > { %6317 = vmatprep.subr.bf16.mxu0 %v9575_v61 }
 0x156   : > { %2498 = vmatmul.mubr.f32.gmra.mrb[20].mxu0 %v8020_v48 }
 0x157   : > { %2502 = vmatprep.mubr.f32.mxu0 %v7819_v3  ;;  %6319 = vmatpush1.bf16.msra.mxu0 %v6318_v30  ;;  %v8043_v3 = vld [vmem:[#allocation2 + $0x71] sm:$0xff]  ;;  %v420_v30 = vand.u32 15, %v294_v21 }
 0x158   : > { %6320 = vmatprep.subr.bf16.mxu0 %v9575_v61  ;;  %v1156_v49 = vmul.f32 %v8041_v50, %v8043_v3  ;;  %v2099_v21 = vld [vmem:[#allocation7 + $0x2e0] sm:$0xff] }
 0x159   : > { %vm806_vm7 = vcmp.lt.s32.totalorder %v420_v30, 15  ;;  %v2101_v30 = vld [vmem:[#allocation7 + $0x2f0] sm:$0xff] }
 0x15a   : > { %2503 = vmatmul.mubr.f32.gmra.mrb[22].mxu0 %v1154_v12  ;;  %v1253_v12 = vmul.f32 %v7822_v4, %v7839_v29  ;;  %v8057_v24 = vsel %vm806_vm7, 1.0, %v8022_v60  ;;  %v6330_v29 = vpack.c.bf16 %v2100_v20, %v2099_v21  ;;  %v8075_v20 = vld [vmem:[#allocation2 + $0x91] sm:$0xff] }
 0x15b   : > { %2507 = vmatprep.mubr.f32.mxu0 %v1251_v8  ;;  %6322 = vmatpush1.bf16.msra.mxu0 %v6321_v2  ;;  %v6327_v8 = vpack.c.bf16 %v2098_v9, %v2097_v53  ;;  %v296_v2 = vadd.s32 136, %v7713_v11  ;;  %v2102_v53 = vld [vmem:[#allocation7 + $0x2f8] sm:$0xff] }
 0x15c   : > { %6323 = vmatprep.subr.bf16.mxu0 %v9575_v61 }
 0x15e   : > { %2508 = vmatmul.mubr.f32.gmra.mrb[24].mxu0 %v8038_v19 }
 0x15f   : > { %2512 = vmatprep.mubr.f32.mxu0 %v7834_v63  ;;  %6325 = vmatpush1.bf16.msra.mxu0 %v6324_v10  ;;  %v8059_v63 = vld [vmem:[#allocation2 + $0x81] sm:$0xff]  ;;  %v434_v10 = vand.u32 15, %v296_v2  ;;  %v8070_v2 = vld [vmem:[#allocation2 + $0x89] sm:$0xff] }
 0x160   : > { %6326 = vmatprep.subr.bf16.mxu0 %v9575_v61  ;;  %v1158_v9 = vmul.f32 %v8057_v24, %v8059_v63 }
 0x161   : > { %vm808_vm8 = vcmp.lt.s32.totalorder %v434_v10, 15  ;;  %v300_v10 = vadd.s32 168, %v7713_v11 }
 0x162   : > { %2513 = vmatmul.mubr.f32.gmra.mrb[26].mxu0 %v1156_v49  ;;  %v1255_v49 = vmul.f32 %v7837_v31, %v7854_v56  ;;  %v8073_v21 = vsel %vm808_vm8, 1.0, %v8022_v60 }
 0x163   : > { %2517 = vmatprep.mubr.f32.mxu0 %v1253_v12  ;;  %6328 = vmatpush1.bf16.msra.mxu0 %v6327_v8  ;;  %v6333_v12 = vpack.c.bf16 %v2102_v53, %v2101_v30  ;;  %v298_v8 = vadd.s32 152, %v7713_v11  ;;  %v1160_v56 = vmul.f32 %v8073_v21, %v8075_v20  ;;  %v8085_v30 = vld [vmem:[#allocation2 + $0x99] sm:$0xff] }
 0x164   : > { %6329 = vmatprep.subr.bf16.mxu0 %v9575_v61 }
 0x166   : > { %2518 = vmatmul.mubr.f32.gmra.mrb[28].mxu0 %v8054_v14 }
 0x167   : > { %2522 = vmatprep.mubr.f32.mxu0 %v7849_v39  ;;  %6331 = vmatpush1.bf16.msra.mxu0 %v6330_v29  ;;  %v448_v39 = vand.u32 15, %v298_v8  ;;  %v1257_v29 = vmul.f32 %v7852_v1, %v7867_v0  ;;  %v1259_v0 = vmul.f32 %v7865_v32, %v7880_v41  ;;  %v8099_v8 = vld [vmem:[#allocation2 + $0xa9] sm:$0xff]  ;;  %v1261_v41 = vmul.f32 %v7878_v43, %v7893_v46  ;;  %v2136_v32 = vld [vmem:[#allocation7 + $0x408] sm:$0xff] }
 0x168   : > { %6332 = vmatprep.subr.bf16.mxu0 %v9575_v61  ;;  %v1263_v46 = vmul.f32 %v7891_v47, %v7906_v40  ;;  %v2135_v43 = vld [vmem:[#allocation7 + $0x400] sm:$0xff]  ;;  %v1265_v40 = vmul.f32 %v7904_v51, %v7919_v37  ;;  %v2140_v37 = vld [vmem:[#allocation7 + $0x428] sm:$0xff] }
 0x169   : > { %vm810_vm9 = vcmp.lt.s32.totalorder %v448_v39, 15  ;;  %v6383_v31 = vpack.c.bf16 %v2136_v32, %v2135_v43  ;;  %v8141_v43 = vld [vmem:[#allocation2 + $0xd9] sm:$0xff] }
 0x16a   : > { %2523 = vmatmul.mubr.f32.gmra.mrb[30].mxu0 %v1158_v9  ;;  %v8088_v53 = vsel %vm810_vm9, 1.0, %v8022_v60  ;;  %v8090_v9 = vld [vmem:[#allocation2 + $0xa1] sm:$0xff] }
 0x16b   : > { %2527 = vmatprep.mubr.f32.mxu0 %v1255_v49  ;;  %6334 = vmatpush1.bf16.msra.mxu0 %v6333_v12  ;;  %v462_v49 = vand.u32 15, %v300_v10  ;;  %v302_v12 = vadd.s32 184, %v7713_v11  ;;  %v304_v10 = vadd.s32 200, %v7713_v11 }
 0x16c   : > { %6335 = vmatprep.subr.bf16.mxu0 %v9575_v61  ;;  %6384 = vmatprep.subr.bf16.mxu1 %v6383_v31 }
 0x16d   : > { %vm812_vm10 = vcmp.lt.s32.totalorder %v462_v49, 15  ;;  %v8113_v49 = vld [vmem:[#allocation2 + $0xb9] sm:$0xff]  ;;  %6386 = vmatpush3.bf16.msra.mxu1 %v6383_v31 }
 0x16e   : > { %2528 = vmatmul.mubr.f32.gmra.mrb[32].mxu0 %v8070_v2  ;;  %v8102_v39 = vsel %vm812_vm10, 1.0, %v8022_v60 }
 0x16f   : > { %2532 = vmatprep.mubr.f32.mxu0 %v7862_v33  ;;  %v1162_v33 = vmul.f32 %v8088_v53, %v8090_v9  ;;  %9576 = vst [vmem:[#allocation59_spill] sm:$0xff] %v8102_v39 }
 0x172   : > { %2533 = vmatmul.mubr.f32.gmra.mrb[34].mxu0 %v1160_v56  ;;  %v8104_v56 = vld [vmem:[#allocation2 + $0xb1] sm:$0xff] }
 0x173   : > { %2537 = vmatprep.mubr.f32.mxu0 %v1257_v29  ;;  %v476_v29 = vand.u32 15, %v302_v12  ;;  %v490_v12 = vand.u32 15, %v304_v10  ;;  %v8132_v10 = vld [vmem:[#allocation2 + $0xd1] sm:$0xff] }
 0x175   : > { %vm814_vm11 = vcmp.lt.s32.totalorder %v476_v29, 15  ;;  %vm816_vm12 = vcmp.lt.s32.totalorder %v490_v12, 15  ;;  %v306_v29 = vadd.s32 216, %v7713_v11  ;;  %v2137_v12 = vld [vmem:[#allocation7 + $0x410] sm:$0xff] }
 0x176   : > { %2538 = vmatmul.mubr.f32.gmra.mrb[36].mxu0 %v8085_v30 }
 0x177   : > { %2542 = vmatprep.mubr.f32.mxu0 %v7875_v62  ;;  %v1164_v62 = vmul.f32 %v8102_v39, %v8104_v56  ;;  %v504_v1 = vand.u32 15, %v306_v29  ;;  %v8146_v29 = vld [vmem:[#allocation2 + $0xe1] sm:$0xff] }
 0x179   : > { %vm818_vm13 = vcmp.lt.s32.totalorder %v504_v1, 15 }
 0x17a   : > { %2543 = vmatmul.mubr.f32.gmra.mrb[38].mxu0 %v1162_v33  ;;  %v8116_v33 = vsel %vm814_vm11, 1.0, %v8022_v60  ;;  %v8144_v32 = vsel %vm818_vm13, 1.0, %v8022_v60 }
 0x17b   : > { %2547 = vmatprep.mubr.f32.mxu0 %v1259_v0  ;;  %9577 = vst [vmem:[#allocation60_spill] sm:$0xff] %v8116_v33  ;;  %v8118_v0 = vld [vmem:[#allocation2 + $0xc1] sm:$0xff]  ;;  %9579 = vst [vmem:[#allocation62_spill] sm:$0xff] %v8144_v32  ;;  %v1170_v1 = vmul.f32 %v8144_v32, %v8146_v29 }
 0x17e   : > { %2548 = vmatmul.mubr.f32.gmra.mrb[40].mxu0 %v8099_v8 }
 0x17f   : > { %2552 = vmatprep.mubr.f32.mxu0 %v7888_v38  ;;  %v1166_v38 = vmul.f32 %v8116_v33, %v8118_v0 }
 0x182   : > { %2553 = vmatmul.mubr.f32.gmra.mrb[42].mxu0 %v1164_v62  ;;  %v8127_v62 = vld [vmem:[#allocation2 + $0xc9] sm:$0xff] }
 0x183   : > { %2557 = vmatprep.mubr.f32.mxu0 %v1261_v41  ;;  %v8130_v41 = vsel %vm816_vm12, 1.0, %v8022_v60 }
 0x184   : > { %9578 = vst [vmem:[#allocation61_spill] sm:$0xff] %v8130_v41 }
 0x186   : > { %2558 = vmatmul.mubr.f32.gmra.mrb[44].mxu0 %v8113_v49 }
 0x187   : > { %2562 = vmatprep.mubr.f32.mxu0 %v7901_v15  ;;  %v1168_v15 = vmul.f32 %v8130_v41, %v8132_v10 }
 0x18a   : > { %2563 = vmatmul.mubr.f32.gmra.mrb[46].mxu0 %v1166_v38  ;;  %v2138_v38 = vld [vmem:[#allocation7 + $0x418] sm:$0xff] }
 0x18b   : > { %2567 = vmatprep.mubr.f32.mxu0 %v1263_v46  ;;  %v308_v46 = vadd.s32 232, %v7713_v11  ;;  %v6387_v47 = vpack.c.bf16 %v2138_v38, %v2137_v12  ;;  %v2142_v12 = vld [vmem:[#allocation7 + $0x438] sm:$0xff] }
 0x18d   : > { %6388 = vmatprep.subr.bf16.mxu1 %v6387_v47  ;;  %v518_v31 = vand.u32 15, %v308_v46  ;;  %v8155_v46 = vld [vmem:[#allocation2 + $0xe9] sm:$0xff] }
 0x18e   : > { %2568 = vmatmul.mubr.f32.gmra.mrb[48].mxu0 %v8127_v62  ;;  %6390 = vmatpush3.bf16.msra.mxu1 %v6387_v47  ;;  %v310_v47 = vadd.s32 248, %v7713_v11 }
 0x18f   : > { %2572 = vmatprep.mubr.f32.mxu0 %v7914_v57  ;;  %v2139_v57 = vld [vmem:[#allocation7 + $0x420] sm:$0xff]  ;;  %vm820_vm14 = vcmp.lt.s32.totalorder %v518_v31, 15 }
 0x190   : > { %v6391_v51 = vpack.c.bf16 %v2140_v37, %v2139_v57  ;;  %v8158_v57 = vsel %vm820_vm14, 1.0, %v8022_v60  ;;  %v8160_v37 = vld [vmem:[#allocation2 + $0xf1] sm:$0xff] }
 0x191   : > { %9580 = vst [vmem:[#allocation63_spill] sm:$0xff] %v8158_v57  ;;  %v1172_v11 = vmul.f32 %v8158_v57, %v8160_v37 }
 0x192   : > { %2573 = vmatmul.mubr.f32.gmra.mrb[50].mxu0 %v1168_v15  ;;  %6392 = vmatprep.subr.bf16.mxu1 %v6391_v51  ;;  %v1267_v15 = vmul.f32 %v7917_v54, %v7932_v28  ;;  %v2144_v28 = vld [vmem:[#allocation7 + $0x448] sm:$0xff]  ;;  %v532_v54 = vand.u32 15, %v310_v47 }
 0x193   : > { %2577 = vmatprep.mubr.f32.mxu0 %v1265_v40  ;;  %6394 = vmatpush3.bf16.msra.mxu1 %v6391_v51  ;;  %v2141_v40 = vld [vmem:[#allocation7 + $0x430] sm:$0xff] }
 0x194   : > { %v6395_v38 = vpack.c.bf16 %v2142_v12, %v2141_v40  ;;  %v1237_v51 = vld [vmem:[#allocation2 + $0x107] sm:$0xff]  ;;  %vm822_vm15 = vcmp.lt.s32.totalorder %v532_v54, 15  ;;  %v8167_v12 = vld [vmem:[#allocation2 + $0xf9] sm:$0xff] }
 0x195   : > { %v1269_v31 = vmul.f32 %v7930_v59, %v1237_v51  ;;  %v8170_v47 = vsel %vm822_vm15, 1.0, %v8022_v60 }
 0x196   : > { %2578 = vmatmul.mubr.f32.gmra.mrb[52].mxu0 %v8141_v43  ;;  %6396 = vmatprep.subr.bf16.mxu1 %v6395_v38  ;;  %9581 = vst [vmem:[#allocation64_spill] sm:$0xff] %v8170_v47 }
 0x197   : > { %2582 = vmatprep.mubr.f32.mxu0 %v7927_v52  ;;  %6398 = vmatpush3.bf16.msra.mxu1 %v6395_v38  ;;  %v2143_v52 = vld [vmem:[#allocation7 + $0x440] sm:$0xff]  ;;  %v8172_v38 = vld [vmem:[#allocation2 + $0x101] sm:$0xff] }
 0x198   : > { %v6399_v4 = vpack.c.bf16 %v2144_v28, %v2143_v52  ;;  %v2147_v52 = vld [vmem:[#allocation7 + $0x460] sm:$0xff]  ;;  %v1174_v54 = vmul.f32 %v8170_v47, %v8172_v38 }
 0x199   : > { %v1238_v28 = vld [vmem:[#allocation2 + $0x10f] sm:$0xff] }
 0x19a   : > { %2583 = vmatmul.mubr.f32.gmra.mrb[54].mxu0 %v1170_v1  ;;  %6400 = vmatprep.subr.bf16.mxu1 %v6399_v4  ;;  %v2145_v1 = vld [vmem:[#allocation7 + $0x450] sm:$0xff] }
 0x19b   : > { %2587 = vmatprep.mubr.f32.mxu0 %v1267_v15  ;;  %6402 = vmatpush3.bf16.msra.mxu1 %v6399_v4  ;;  %v2146_v15 = vld [vmem:[#allocation7 + $0x458] sm:$0xff]  ;;  %v2149_v4 = vld [vmem:[#allocation7 + $0x470] sm:$0xff] }
 0x19c   : > { %v6403_v40 = vpack.c.bf16 %v2146_v15, %v2145_v1  ;;  %v2104_v1 = vld [vmem:[#allocation7 + $0x308] sm:$0xff] }
 0x19e   : > { %2588 = vmatmul.mubr.f32.gmra.mrb[56].mxu0 %v8155_v46  ;;  %6404 = vmatprep.subr.bf16.mxu1 %v6403_v40 }
 0x19f   : > { %2592 = vmatprep.mubr.f32.mxu0 %v7941_v55  ;;  %6406 = vmatpush3.bf16.msra.mxu1 %v6403_v40  ;;  %v2148_v55 = vld [vmem:[#allocation7 + $0x468] sm:$0xff] }
 0x1a0   : > { %v6407_v51 = vpack.c.bf16 %v2148_v55, %v2147_v52  ;;  %v1303_v40 = vld [vmem:[#allocation2 + $0x18] sm:$0xff]  ;;  %v1400_v52 = vmul.f32 %v7948_v35, %v7961_v25 }
 0x1a1   : > { %v1624_v55 = vld [vmem:[#allocation2 + $0x31] sm:$0xff] }
 0x1a2   : > { %2593 = vmatmul.mubr.f32.gmra.mrb[58].mxu0 %v1172_v11  ;;  %6408 = vmatprep.subr.bf16.mxu1 %v6407_v51  ;;  %v2150_v11 = vld [vmem:[#allocation7 + $0x478] sm:$0xff]  ;;  %v2108_v25 = vld [vmem:[#allocation7 + $0x328] sm:$0xff] }
 0x1a3   : > { %2597 = vmatprep.mubr.f32.mxu0 %v1269_v31  ;;  %6410 = vmatpush3.bf16.msra.mxu1 %v6407_v51  ;;  %v2103_v31 = vld [vmem:[#allocation7 + $0x300] sm:$0xff]  ;;  %v6411_v15 = vpack.c.bf16 %v2150_v11, %v2149_v4  ;;  %v1656_v51 = vmul.f32 %v7948_v35, %v1624_v55  ;;  %v8184_v11 = vld [vmem:[#allocation2 + $0x28] sm:$0xff]  ;;  %v2112_v55 = vld [vmem:[#allocation7 + $0x348] sm:$0xff] }
 0x1a4   : > { %v6336_v59 = vpack.c.bf16 %v2104_v1, %v2103_v31  ;;  %v2107_v4 = vld [vmem:[#allocation7 + $0x320] sm:$0xff]  ;;  %v1402_v31 = vmul.f32 %v7959_v22, %v7977_v44 }
 0x1a5   : > { %6412 = vmatprep.subr.bf16.mxu1 %v6411_v15  ;;  %v6342_v1 = vpack.c.bf16 %v2108_v25, %v2107_v4  ;;  %v2111_v44 = vld [vmem:[#allocation7 + $0x340] sm:$0xff]  ;;  %v2113_v4 = vld [vmem:[#allocation7 + $0x350] sm:$0xff]  ;;  %v2114_v25 = vld [vmem:[#allocation7 + $0x358] sm:$0xff] }
 0x1a6   : > { %2598 = vmatmul.mubr.f32.gmra.mrb[60].mxu0 %v8167_v12 }
 0x1a7   : > { %2602 = vmatprep.mubr.f32.mxu0 %v1238_v28  ;;  %6414 = vmatpush3.bf16.msra.mxu1 %v6411_v15  ;;  %v1623_v28 = vld [vmem:[#allocation2 + $0x29] sm:$0xff]  ;;  %v1626_v15 = vld [vmem:[#allocation2 + $0x41] sm:$0xff] }
 0x1a8   : > { %6415 = vmatprep.subr.bf16.mxu1 %v9575_v61  ;;  %6063 = vmatprep.mubr.f32.mxu1 %v1623_v28  ;;  %v8196_v28 = vld [vmem:[#allocation2 + $0x38] sm:$0xff] }
 0x1aa   : > { %2603 = vmatmul.mubr.f32.gmra.mrb[62].mxu0 %v1174_v54  ;;  %6064 = vmatmul.mubr.f32.vlgmr.msra.gmra.mrb[0].mxu1 %v1656_v51  ;;  %v6339_v54 = vpack.c.bf16 %v2106_v13, %v2105_v45  ;;  %v1625_v13 = vld [vmem:[#allocation2 + $0x39] sm:$0xff]  ;;  %v1658_v45 = vmul.f32 %v7959_v22, %v1626_v15  ;;  %v1404_v51 = vmul.f32 %v7975_v6, %v7993_v5  ;;  %v2115_v5 = vld [vmem:[#allocation7 + $0x360] sm:$0xff] }
 0x1ab   : > { %2672 = vmatprep.mubr.f32.mxu0 %v7956_v27  ;;  %v1304_v27 = vld [vmem:[#allocation2 + $0x20] sm:$0xff]  ;;  %6066 = vmatprep.mubr.f32.mxu1 %v1625_v13  ;;  %v6351_v15 = vpack.c.bf16 %v2114_v25, %v2113_v4  ;;  %v1406_v13 = vmul.f32 %v7991_v17, %v8009_v42  ;;  %v2119_v42 = vld [vmem:[#allocation7 + $0x380] sm:$0xff]  ;;  %v8221_v4 = vld [vmem:[#allocation2 + $0x58] sm:$0xff]  ;;  %v1408_v25 = vmul.f32 %v8007_v16, %v8027_v7 }
 0x1ae   : > { %2673 = vmatmul.mubr.f32.vlgmr.msra.gmra.mrb[0].mxu0 %v1303_v40  ;;  %v2110_v40 = vld [vmem:[#allocation7 + $0x338] sm:$0xff]  ;;  %6067 = vmatmul.mubr.f32.gmra.mrb[2].mxu1 %v1658_v45 }
 0x1af   : > { %6337 = vmatpush1.bf16.msra.mxu0 %v6336_v59  ;;  %2677 = vmatprep.mubr.f32.mxu0 %v1400_v52  ;;  %v2109_v59 = vld [vmem:[#allocation7 + $0x330] sm:$0xff] }
 0x1b0   : > { %6338 = vmatprep.subr.bf16.mxu0 %v9575_v61  ;;  %v6345_v52 = vpack.c.bf16 %v2110_v40, %v2109_v59  ;;  %v2116_v59 = vld [vmem:[#allocation7 + $0x368] sm:$0xff]  ;;  %v8208_v40 = vld [vmem:[#allocation2 + $0x48] sm:$0xff] }
 0x1b1   : > { %v6354_v45 = vpack.c.bf16 %v2116_v59, %v2115_v5  ;;  %v1631_v5 = vld [vmem:[#allocation2 + $0x69] sm:$0xff]  ;;  %v1664_v59 = vmul.f32 %v8007_v16, %v8043_v3 }
 0x1b2   : > { %2678 = vmatmul.mubr.f32.gmra.mrb[2].mxu0 %v1304_v27  ;;  %v6348_v27 = vpack.c.bf16 %v2112_v55, %v2111_v44  ;;  %v2118_v44 = vld [vmem:[#allocation7 + $0x378] sm:$0xff]  ;;  %v1629_v55 = vld [vmem:[#allocation2 + $0x59] sm:$0xff] }
 0x1b3   : > { %2682 = vmatprep.mubr.f32.mxu0 %v7972_v26  ;;  %6340 = vmatpush1.bf16.msra.mxu0 %v6339_v54  ;;  %v8191_v26 = vld [vmem:[#allocation2 + $0x30] sm:$0xff] }
 0x1b4   : > { %6341 = vmatprep.subr.bf16.mxu0 %v9575_v61  ;;  %v1628_v54 = vld [vmem:[#allocation2 + $0x51] sm:$0xff] }
 0x1b6   : > { %2683 = vmatmul.mubr.f32.gmra.mrb[4].mxu0 %v8184_v11 }
 0x1b7   : > { %2687 = vmatprep.mubr.f32.mxu0 %v1402_v31  ;;  %6343 = vmatpush1.bf16.msra.mxu0 %v6342_v1  ;;  %v1627_v31 = vld [vmem:[#allocation2 + $0x49] sm:$0xff]  ;;  %v1660_v1 = vmul.f32 %v7975_v6, %v1628_v54  ;;  %v2120_v54 = vld [vmem:[#allocation7 + $0x388] sm:$0xff] }
 0x1b8   : > { %6344 = vmatprep.subr.bf16.mxu0 %v9575_v61  ;;  %6069 = vmatprep.mubr.f32.mxu1 %v1627_v31  ;;  %v6360_v31 = vpack.c.bf16 %v2120_v54, %v2119_v42  ;;  %v1666_v42 = vmul.f32 %v8025_v23, %v8059_v63  ;;  %v8243_v54 = vld [vmem:[#allocation2 + $0x70] sm:$0xff] }
 0x1b9   : > { %6070 = vmatmul.mubr.f32.gmra.mrb[4].mxu1 %v1660_v1  ;;  %v2121_v1 = vld [vmem:[#allocation7 + $0x390] sm:$0xff] }
 0x1ba   : > { %2688 = vmatmul.mubr.f32.gmra.mrb[6].mxu0 %v8191_v26  ;;  %6072 = vmatprep.mubr.f32.mxu1 %v1629_v55 }
 0x1bb   : > { %2692 = vmatprep.mubr.f32.mxu0 %v7988_v34  ;;  %6346 = vmatpush1.bf16.msra.mxu0 %v6345_v52  ;;  %v8203_v34 = vld [vmem:[#allocation2 + $0x40] sm:$0xff] }
 0x1bc   : > { %6347 = vmatprep.subr.bf16.mxu0 %v9575_v61  ;;  %v2117_v52 = vld [vmem:[#allocation7 + $0x370] sm:$0xff] }
 0x1be   : > { %2693 = vmatmul.mubr.f32.gmra.mrb[8].mxu0 %v8196_v28 }
 0x1bf   : > { %2697 = vmatprep.mubr.f32.mxu0 %v1404_v51  ;;  %6349 = vmatpush1.bf16.msra.mxu0 %v6348_v27  ;;  %v1662_v51 = vmul.f32 %v7991_v17, %v8027_v7  ;;  %v6357_v27 = vpack.c.bf16 %v2118_v44, %v2117_v52  ;;  %v2123_v7 = vld [vmem:[#allocation7 + $0x3a0] sm:$0xff]  ;;  %v8235_v52 = vld [vmem:[#allocation2 + $0x68] sm:$0xff]  ;;  %v1410_v44 = vmul.f32 %v8025_v23, %v8043_v3 }
 0x1c0   : > { %6350 = vmatprep.subr.bf16.mxu0 %v9575_v61  ;;  %v2127_v3 = vld [vmem:[#allocation7 + $0x3c0] sm:$0xff] }
 0x1c1   : > { %6073 = vmatmul.mubr.f32.gmra.mrb[6].mxu1 %v1662_v51  ;;  %v2125_v51 = vld [vmem:[#allocation7 + $0x3b0] sm:$0xff] }
 0x1c2   : > { %2698 = vmatmul.mubr.f32.gmra.mrb[10].mxu0 %v8203_v34  ;;  %6075 = vmatprep.mubr.f32.mxu1 %v1631_v5  ;;  %v2129_v5 = vld [vmem:[#allocation7 + $0x3d0] sm:$0xff] }
 0x1c3   : > { %2702 = vmatprep.mubr.f32.mxu0 %v8004_v18  ;;  %6352 = vmatpush1.bf16.msra.mxu0 %v6351_v15  ;;  %v8216_v18 = vld [vmem:[#allocation2 + $0x50] sm:$0xff]  ;;  %v2122_v15 = vld [vmem:[#allocation7 + $0x398] sm:$0xff] }
 0x1c4   : > { %6353 = vmatprep.subr.bf16.mxu0 %v9575_v61 }
 0x1c5   : > { %6076 = vmatmul.mubr.f32.gmra.mrb[8].mxu1 %v1664_v59  ;;  %v2130_v59 = vld [vmem:[#allocation7 + $0x3d8] sm:$0xff] }
 0x1c6   : > { %2703 = vmatmul.mubr.f32.gmra.mrb[12].mxu0 %v8208_v40  ;;  %6078 = vmatprep.mubr.f32.mxu1 %v8054_v14 }
 0x1c7   : > { %2707 = vmatprep.mubr.f32.mxu0 %v1406_v13  ;;  %6355 = vmatpush1.bf16.msra.mxu0 %v6354_v45  ;;  %v6363_v13 = vpack.c.bf16 %v2122_v15, %v2121_v1  ;;  %v2124_v45 = vld [vmem:[#allocation7 + $0x3a8] sm:$0xff]  ;;  %v1412_v1 = vmul.f32 %v8041_v50, %v8059_v63  ;;  %v2131_v63 = vld [vmem:[#allocation7 + $0x3e0] sm:$0xff] }
 0x1c8   : > { %6356 = vmatprep.subr.bf16.mxu0 %v9575_v61  ;;  %v6366_v55 = vpack.c.bf16 %v2124_v45, %v2123_v7  ;;  %v8257_v7 = vld [vmem:[#allocation2 + $0x80] sm:$0xff]  ;;  %v2132_v45 = vld [vmem:[#allocation7 + $0x3e8] sm:$0xff] }
 0x1c9   : > { %6079 = vmatmul.mubr.f32.gmra.mrb[10].mxu1 %v1666_v42  ;;  %v2134_v42 = vld [vmem:[#allocation7 + $0x3f8] sm:$0xff] }
 0x1ca   : > { %2708 = vmatmul.mubr.f32.gmra.mrb[14].mxu0 %v8216_v18  ;;  %6081 = vmatprep.mubr.f32.mxu1 %v8070_v2 }
 0x1cb   : > { %2712 = vmatprep.mubr.f32.mxu0 %v8020_v48  ;;  %6358 = vmatpush1.bf16.msra.mxu0 %v6357_v27  ;;  %v8229_v48 = vld [vmem:[#allocation2 + $0x60] sm:$0xff]  ;;  %v2126_v27 = vld [vmem:[#allocation7 + $0x3b8] sm:$0xff] }
 0x1cc   : > { %6359 = vmatprep.subr.bf16.mxu0 %v9575_v61 }
 0x1ce   : > { %2713 = vmatmul.mubr.f32.gmra.mrb[16].mxu0 %v8221_v4 }
 0x1cf   : > { %2717 = vmatprep.mubr.f32.mxu0 %v1408_v25  ;;  %6361 = vmatpush1.bf16.msra.mxu0 %v6360_v31  ;;  %v2128_v25 = vld [vmem:[#allocation7 + $0x3c8] sm:$0xff] }
 0x1d0   : > { %6362 = vmatprep.subr.bf16.mxu0 %v9575_v61  ;;  %v8249_v31 = vld [vmem:[#allocation2 + $0x78] sm:$0xff]  ;;  %v6372_v15 = vpack.c.bf16 %v2128_v25, %v2127_v3  ;;  %v8271_v3 = vld [vmem:[#allocation2 + $0x90] sm:$0xff]  ;;  %v1416_v25 = vmul.f32 %v8073_v21, %v8090_v9 }
 0x1d2   : > { %2718 = vmatmul.mubr.f32.gmra.mrb[18].mxu0 %v8229_v48 }
 0x1d3   : > { %2722 = vmatprep.mubr.f32.mxu0 %v8038_v19  ;;  %6364 = vmatpush1.bf16.msra.mxu0 %v6363_v13  ;;  %v6369_v19 = vpack.c.bf16 %v2126_v27, %v2125_v51  ;;  %v1668_v13 = vmul.f32 %v8041_v50, %v8075_v20  ;;  %v6378_v51 = vpack.c.bf16 %v2132_v45, %v2131_v63  ;;  %v2133_v27 = vld [vmem:[#allocation7 + $0x3f0] sm:$0xff]  ;;  %v8320_v45 = vld [vmem:[#allocation2 + $0xd0] sm:$0xff] }
 0x1d4   : > { %6365 = vmatprep.subr.bf16.mxu0 %v9575_v61  ;;  %v1678_v63 = vmul.f32 %v8116_v33, %v8146_v29 }
 0x1d5   : > { %6082 = vmatmul.mubr.f32.gmra.mrb[12].mxu1 %v1668_v13  ;;  %v1676_v13 = vmul.f32 %v8102_v39, %v8132_v10 }
 0x1d6   : > { %2723 = vmatmul.mubr.f32.gmra.mrb[20].mxu0 %v8235_v52  ;;  %6084 = vmatprep.mubr.f32.mxu1 %v8085_v30 }
 0x1d7   : > { %2727 = vmatprep.mubr.f32.mxu0 %v1410_v44  ;;  %6367 = vmatpush1.bf16.msra.mxu0 %v6366_v55  ;;  %v8263_v44 = vld [vmem:[#allocation2 + $0x88] sm:$0xff]  ;;  %v1414_v55 = vmul.f32 %v8057_v24, %v8075_v20  ;;  %v8277_v20 = vld [vmem:[#allocation2 + $0x98] sm:$0xff] }
 0x1d8   : > { %6368 = vmatprep.subr.bf16.mxu0 %v9575_v61 }
 0x1da   : > { %2728 = vmatmul.mubr.f32.gmra.mrb[22].mxu0 %v8243_v54 }
 0x1db   : > { %2732 = vmatprep.mubr.f32.mxu0 %v8054_v14  ;;  %6370 = vmatpush1.bf16.msra.mxu0 %v6369_v19  ;;  %v6375_v14 = vpack.c.bf16 %v2130_v59, %v2129_v5  ;;  %v1670_v19 = vmul.f32 %v8057_v24, %v8090_v9  ;;  %v1418_v9 = vmul.f32 %v8088_v53, %v8104_v56  ;;  %v8296_v59 = vld [vmem:[#allocation2 + $0xb0] sm:$0xff] }
 0x1dc   : > { %6371 = vmatprep.subr.bf16.mxu0 %v9575_v61  ;;  %v1674_v5 = vmul.f32 %v8088_v53, %v8118_v0 }
 0x1dd   : > { %6085 = vmatmul.mubr.f32.gmra.mrb[14].mxu1 %v1670_v19  ;;  %v8344_v19 = vld [vmem:[#allocation2 + $0xf0] sm:$0xff] }
 0x1de   : > { %2733 = vmatmul.mubr.f32.gmra.mrb[24].mxu0 %v8249_v31  ;;  %6087 = vmatprep.mubr.f32.mxu1 %v8099_v8 }
 0x1df   : > { %2737 = vmatprep.mubr.f32.mxu0 %v1412_v1  ;;  %6373 = vmatpush1.bf16.msra.mxu0 %v6372_v15  ;;  %v1672_v1 = vmul.f32 %v8073_v21, %v8104_v56  ;;  %v8284_v15 = vld [vmem:[#allocation2 + $0xa0] sm:$0xff]  ;;  %v1420_v56 = vmul.f32 %v8102_v39, %v8118_v0  ;;  %v1422_v0 = vmul.f32 %v8116_v33, %v8132_v10  ;;  %v4462_v33 = vld [vmem:[#allocation9 + $0x1d8] sm:$0xff] }
 0x1e0   : > { %6374 = vmatprep.subr.bf16.mxu0 %v9575_v61  ;;  %v1424_v10 = vmul.f32 %v8130_v41, %v8146_v29  ;;  %v1426_v29 = vmul.f32 %v8144_v32, %v8160_v37 }
 0x1e1   : > { %6088 = vmatmul.mubr.f32.gmra.mrb[16].mxu1 %v1672_v1  ;;  %v8354_v1 = vld [vmem:[#allocation2 + $0x100] sm:$0xff] }
 0x1e2   : > { %2738 = vmatmul.mubr.f32.gmra.mrb[26].mxu0 %v8257_v7  ;;  %6090 = vmatprep.mubr.f32.mxu1 %v8113_v49 }
 0x1e3   : > { %2742 = vmatprep.mubr.f32.mxu0 %v8070_v2  ;;  %6376 = vmatpush1.bf16.msra.mxu0 %v6375_v14  ;;  %v6381_v2 = vpack.c.bf16 %v2134_v42, %v2133_v27  ;;  %v8308_v14 = vld [vmem:[#allocation2 + $0xc0] sm:$0xff]  ;;  %v1682_v27 = vmul.f32 %v8144_v32, %v8172_v38  ;;  %v1397_v42 = vld [vmem:[#allocation2 + $0x109] sm:$0xff] }
 0x1e4   : > { %6377 = vmatprep.subr.bf16.mxu0 %v9575_v61  ;;  %v4458_v32 = vld [vmem:[#allocation9 + $0x1b8] sm:$0xff] }
 0x1e5   : > { %6091 = vmatmul.mubr.f32.gmra.mrb[18].mxu1 %v1674_v5  ;;  %v1653_v5 = vld [vmem:[#allocation2 + $0x119] sm:$0xff] }
 0x1e6   : > { %2743 = vmatmul.mubr.f32.gmra.mrb[28].mxu0 %v8263_v44  ;;  %6093 = vmatprep.mubr.f32.mxu1 %v8127_v62 }
 0x1e7   : > { %2747 = vmatprep.mubr.f32.mxu0 %v1414_v55  ;;  %6379 = vmatpush1.bf16.msra.mxu0 %v6378_v51  ;;  %v1680_v55 = vmul.f32 %v8130_v41, %v8160_v37  ;;  %v8332_v51 = vld [vmem:[#allocation2 + $0xe0] sm:$0xff]  ;;  %v1428_v37 = vmul.f32 %v8158_v57, %v8172_v38 }
 0x1e8   : > { %6380 = vmatprep.subr.bf16.mxu0 %v9575_v61  ;;  %v1463_v38 = vld [vmem:[#allocation2 + $0x27] sm:$0xff] }
 0x1e9   : > { %6094 = vmatmul.mubr.f32.gmra.mrb[20].mxu1 %v1676_v13  ;;  %v8359_v13 = vld [vmem:[#allocation2 + $0x108] sm:$0xff] }
 0x1ea   : > { %2748 = vmatmul.mubr.f32.gmra.mrb[30].mxu0 %v8271_v3  ;;  %6096 = vmatprep.mubr.f32.mxu1 %v8141_v43  ;;  %9582 = vst [vmem:[#allocation65_spill] sm:$0xff] %v8359_v13 }
 0x1eb   : > { %2752 = vmatprep.mubr.f32.mxu0 %v8085_v30  ;;  %6382 = vmatpush1.bf16.msra.mxu0 %v6381_v2  ;;  %v8289_v30 = vld [vmem:[#allocation2 + $0xa8] sm:$0xff]  ;;  %v1398_v2 = vld [vmem:[#allocation2 + $0x111] sm:$0xff] }
 0x1ed   : > { %6097 = vmatmul.mubr.f32.gmra.mrb[22].mxu1 %v1678_v63  ;;  %v1495_v63 = vmul.f32 %v7725_v36, %v1463_v38 }
 0x1ee   : > { %2753 = vmatmul.mubr.f32.gmra.mrb[32].mxu0 %v8277_v20  ;;  %6099 = vmatprep.mubr.f32.mxu1 %v8155_v46 }
 0x1ef   : > { %2757 = vmatprep.mubr.f32.mxu0 %v1416_v25  ;;  %v1684_v25 = vmul.f32 %v8158_v57, %v1398_v2 }
 0x1f1   : > { %6100 = vmatmul.mubr.f32.gmra.mrb[24].mxu1 %v1680_v55  ;;  %v4404_v55 = vld [vmem:[#allocation9 + $0x8] sm:$0xff] }
 0x1f2   : > { %2758 = vmatmul.mubr.f32.gmra.mrb[34].mxu0 %v8284_v15  ;;  %6102 = vmatprep.mubr.f32.mxu1 %v8167_v12 }
 0x1f3   : > { %2762 = vmatprep.mubr.f32.mxu0 %v8099_v8  ;;  %v8301_v8 = vld [vmem:[#allocation2 + $0xb8] sm:$0xff] }
 0x1f5   : > { %6103 = vmatmul.mubr.f32.gmra.mrb[26].mxu1 %v1682_v27 }
 0x1f6   : > { %2763 = vmatmul.mubr.f32.gmra.mrb[36].mxu0 %v8289_v30  ;;  %6105 = vmatprep.mubr.f32.mxu1 %v1397_v42 }
 0x1f7   : > { %2767 = vmatprep.mubr.f32.mxu0 %v1418_v9  ;;  %v1430_v9 = vmul.f32 %v8170_v47, %v1398_v2  ;;  %v4407_v2 = vld [vmem:[#allocation9 + $0x20] sm:$0xff] }
 0x1f9   : > { %6106 = vmatmul.mubr.f32.gmra.mrb[28].mxu1 %v1684_v25  ;;  %v1464_v25 = vld [vmem:[#allocation2 + $0x2f] sm:$0xff] }
 0x1fa   : > { %2768 = vmatmul.mubr.f32.gmra.mrb[38].mxu0 %v8296_v59  ;;  %6108 = vmatprep.mubr.f32.mxu1 %v1653_v5 }
 0x1fb   : > { %2772 = vmatprep.mubr.f32.mxu0 %v8113_v49  ;;  %v8313_v49 = vld [vmem:[#allocation2 + $0xc8] sm:$0xff] }
 0x1fe   : > { %2773 = vmatmul.mubr.f32.gmra.mrb[40].mxu0 %v8301_v8 }
 0x1ff   : > { %2777 = vmatprep.mubr.f32.mxu0 %v1420_v56 }
 0x202   : > { %2778 = vmatmul.mubr.f32.gmra.mrb[42].mxu0 %v8308_v14 }
 0x203   : > { %2782 = vmatprep.mubr.f32.mxu0 %v8127_v62  ;;  %v8325_v62 = vld [vmem:[#allocation2 + $0xd8] sm:$0xff] }
 0x206   : > { %2783 = vmatmul.mubr.f32.gmra.mrb[44].mxu0 %v8313_v49 }
 0x207   : > { %2787 = vmatprep.mubr.f32.mxu0 %v1422_v0  ;;  %v8363_v0 = vld [vmem:[#allocation2 + $0x110] sm:$0xff] }
 0x208   : > { %9583 = vst [vmem:[#allocation66_spill] sm:$0xff] %v8363_v0 }
 0x20a   : > { %2788 = vmatmul.mubr.f32.gmra.mrb[46].mxu0 %v8320_v45 }
 0x20b   : > { %2792 = vmatprep.mubr.f32.mxu0 %v8141_v43  ;;  %v8337_v43 = vld [vmem:[#allocation2 + $0xe8] sm:$0xff] }
 0x20e   : > { %2793 = vmatmul.mubr.f32.gmra.mrb[48].mxu0 %v8325_v62 }
 0x20f   : > { %2797 = vmatprep.mubr.f32.mxu0 %v1424_v10  ;;  %v4403_v10 = vld [vmem:[#allocation9] sm:$0xff] }
 0x210   : > { %v6416_v27 = vpack.c.bf16 %v4404_v55, %v4403_v10  ;;  %v1466_v10 = vld [vmem:[#allocation2 + $0x3f] sm:$0xff]  ;;  %v1467_v55 = vld [vmem:[#allocation2 + $0x47] sm:$0xff] }
 0x212   : > { %2798 = vmatmul.mubr.f32.gmra.mrb[50].mxu0 %v8332_v51  ;;  %6417 = vmatpush1.bf16.msra.mxu1 %v6416_v27  ;;  %v9584_v27 = vld [vmem:[#allocation45_spill] sm:$0xff] }
 0x213   : > { %2802 = vmatprep.mubr.f32.mxu0 %v8155_v46  ;;  %v8348_v46 = vld [vmem:[#allocation2 + $0xf8] sm:$0xff]  ;;  %6418 = vmatprep.subr.bf16.mxu1 %v9575_v61 }
 0x216   : > { %2803 = vmatmul.mubr.f32.gmra.mrb[52].mxu0 %v8337_v43 }
 0x217   : > { %2807 = vmatprep.mubr.f32.mxu0 %v1426_v29  ;;  %v4405_v29 = vld [vmem:[#allocation9 + $0x10] sm:$0xff] }
 0x21a   : > { %2808 = vmatmul.mubr.f32.gmra.mrb[54].mxu0 %v8344_v19 }
 0x21b   : > { %2812 = vmatprep.mubr.f32.mxu0 %v8167_v12  ;;  %v1654_v12 = vld [vmem:[#allocation2 + $0x121] sm:$0xff] }
 0x21c   : > { %v1686_v56 = vmul.f32 %v8170_v47, %v1654_v12  ;;  %v4456_v47 = vld [vmem:[#allocation9 + $0x1a8] sm:$0xff] }
 0x21e   : > { %2813 = vmatmul.mubr.f32.gmra.mrb[56].mxu0 %v8348_v46  ;;  %6109 = vmatmul.mubr.f32.gmra.mrb[30].mxu1 %v1686_v56  ;;  %v4410_v56 = vld [vmem:[#allocation9 + $0x38] sm:$0xff] }
 0x21f   : > { %2817 = vmatprep.mubr.f32.mxu0 %v1428_v37  ;;  %4618 = vmatprep.mubr.f32.mxu1 %v8022_v60  ;;  %v4408_v60 = vld [vmem:[#allocation9 + $0x28] sm:$0xff] }
 0x220   : > { %v6422_v12 = vpack.c.bf16 %v4408_v60, %v4407_v2  ;;  %v4415_v60 = vld [vmem:[#allocation9 + $0x60] sm:$0xff] }
 0x222   : > { %2818 = vmatmul.mubr.f32.gmra.mrb[58].mxu0 %v8354_v1 }
 0x223   : > { %2822 = vmatprep.mubr.f32.mxu0 %v1397_v42  ;;  %v4406_v42 = vld [vmem:[#allocation9 + $0x18] sm:$0xff] }
 0x224   : > { %v6419_v37 = vpack.c.bf16 %v4406_v42, %v4405_v29  ;;  %v1499_v42 = vmul.f32 %v9584_v27, %v1467_v55 }
 0x226   : > { %2823 = vmatmul.mubr.f32.gmra.mrb[60].mxu0 %v8359_v13  ;;  %6420 = vmatpush1.bf16.msra.mxu1 %v6419_v37  ;;  %v4413_v37 = vld [vmem:[#allocation9 + $0x50] sm:$0xff] }
 0x227   : > { %2827 = vmatprep.mubr.f32.mxu0 %v1430_v9  ;;  %v1465_v9 = vld [vmem:[#allocation2 + $0x37] sm:$0xff]  ;;  %6421 = vmatprep.subr.bf16.mxu1 %v9575_v61 }
 0x228   : > { %v1497_v5 = vmul.f32 %v7733_v58, %v1465_v9  ;;  %v1469_v9 = vld [vmem:[#allocation2 + $0x57] sm:$0xff] }
 0x22a   : > { %2828 = vmatmul.mubr.f32.gmra.mrb[62].mxu0 %v8363_v0  ;;  %6423 = vmatpush1.bf16.msra.mxu1 %v6422_v12 }
 0x22b   : > { %2897 = vmatprep.mubr.f32.mxu0 %v8184_v11  ;;  %v4409_v11 = vld [vmem:[#allocation9 + $0x30] sm:$0xff]  ;;  %6424 = vmatprep.subr.bf16.mxu1 %v9575_v61 }
 0x22c   : > { %v6425_v38 = vpack.c.bf16 %v4410_v56, %v4409_v11  ;;  %v4417_v56 = vld [vmem:[#allocation9 + $0x70] sm:$0xff] }
 0x22e   : > { %2898 = vmatmul.mubr.f32.vlgmr.msra.gmra.mrb[0].mxu0 %v1495_v63  ;;  %v4411_v63 = vld [vmem:[#allocation9 + $0x40] sm:$0xff]  ;;  %6426 = vmatpush1.bf16.msra.mxu1 %v6425_v38 }
 0x22f   : > { %2902 = vmatprep.mubr.f32.mxu0 %v8191_v26  ;;  %v4412_v26 = vld [vmem:[#allocation9 + $0x48] sm:$0xff]  ;;  %6427 = vmatprep.subr.bf16.mxu1 %v9575_v61 }
 0x230   : > { %v6428_v29 = vpack.c.bf16 %v4412_v26, %v4411_v63  ;;  %v4419_v63 = vld [vmem:[#allocation9 + $0x80] sm:$0xff]  ;;  %v1470_v26 = vld [vmem:[#allocation2 + $0x5f] sm:$0xff] }
 0x232   : > { %2903 = vmatmul.mubr.f32.gmra.mrb[2].mxu0 %v1464_v25  ;;  %6429 = vmatpush1.bf16.msra.mxu1 %v6428_v29  ;;  %v1468_v25 = vld [vmem:[#allocation2 + $0x4f] sm:$0xff]  ;;  %v9586_v29 = vld [vmem:[#allocation47_spill] sm:$0xff] }
 0x233   : > { %2907 = vmatprep.mubr.f32.mxu0 %v8196_v28  ;;  %v4414_v28 = vld [vmem:[#allocation9 + $0x58] sm:$0xff]  ;;  %6430 = vmatprep.subr.bf16.mxu1 %v9575_v61 }
 0x234   : > { %v6431_v2 = vpack.c.bf16 %v4414_v28, %v4413_v37  ;;  %v4421_v37 = vld [vmem:[#allocation9 + $0x90] sm:$0xff] }
 0x236   : > { %2908 = vmatmul.mubr.f32.gmra.mrb[4].mxu0 %v1497_v5  ;;  %6432 = vmatpush1.bf16.msra.mxu1 %v6431_v2  ;;  %v9585_v5 = vld [vmem:[#allocation46_spill] sm:$0xff] }
 0x237   : > { %2912 = vmatprep.mubr.f32.mxu0 %v8203_v34  ;;  %v4416_v34 = vld [vmem:[#allocation9 + $0x68] sm:$0xff]  ;;  %v1501_v11 = vmul.f32 %v9585_v5, %v1469_v9  ;;  %6433 = vmatprep.subr.bf16.mxu1 %v9575_v61  ;;  %v4423_v2 = vld [vmem:[#allocation9 + $0xa0] sm:$0xff]  ;;  %v9587_v9 = vld [vmem:[#allocation48_spill] sm:$0xff] }
 0x238   : > { %v6434_v12 = vpack.c.bf16 %v4416_v34, %v4415_v60  ;;  %v1472_v60 = vld [vmem:[#allocation2 + $0x6f] sm:$0xff]  ;;  %v1473_v34 = vld [vmem:[#allocation2 + $0x77] sm:$0xff] }
 0x23a   : > { %2913 = vmatmul.mubr.f32.gmra.mrb[6].mxu0 %v1466_v10  ;;  %6435 = vmatpush1.bf16.msra.mxu1 %v6434_v12  ;;  %v1471_v10 = vld [vmem:[#allocation2 + $0x67] sm:$0xff]  ;;  %v1505_v12 = vmul.f32 %v9587_v9, %v1473_v34  ;;  %v1481_v34 = vld [vmem:[#allocation2 + $0xb7] sm:$0xff] }
 0x23b   : > { %2917 = vmatprep.mubr.f32.mxu0 %v8208_v40  ;;  %v4418_v40 = vld [vmem:[#allocation9 + $0x78] sm:$0xff]  ;;  %6436 = vmatprep.subr.bf16.mxu1 %v9575_v61 }
 0x23c   : > { %v6437_v38 = vpack.c.bf16 %v4418_v40, %v4417_v56  ;;  %v4427_v40 = vld [vmem:[#allocation9 + $0xc0] sm:$0xff] }
 0x23e   : > { %2918 = vmatmul.mubr.f32.gmra.mrb[8].mxu0 %v1499_v42  ;;  %6438 = vmatpush1.bf16.msra.mxu1 %v6437_v38  ;;  %v1503_v42 = vmul.f32 %v9586_v29, %v1471_v10  ;;  %v1474_v38 = vld [vmem:[#allocation2 + $0x7f] sm:$0xff] }
 0x23f   : > { %2922 = vmatprep.mubr.f32.mxu0 %v8216_v18  ;;  %v4420_v18 = vld [vmem:[#allocation9 + $0x88] sm:$0xff]  ;;  %6439 = vmatprep.subr.bf16.mxu1 %v9575_v61 }
 0x240   : > { %v6440_v55 = vpack.c.bf16 %v4420_v18, %v4419_v63  ;;  %v1475_v63 = vld [vmem:[#allocation2 + $0x87] sm:$0xff] }
 0x242   : > { %2923 = vmatmul.mubr.f32.gmra.mrb[10].mxu0 %v1468_v25  ;;  %6441 = vmatpush1.bf16.msra.mxu1 %v6440_v55  ;;  %v4429_v55 = vld [vmem:[#allocation9 + $0xd0] sm:$0xff] }
 0x243   : > { %2927 = vmatprep.mubr.f32.mxu0 %v8221_v4  ;;  %v4422_v4 = vld [vmem:[#allocation9 + $0x98] sm:$0xff]  ;;  %6442 = vmatprep.subr.bf16.mxu1 %v9575_v61 }
 0x244   : > { %v6443_v28 = vpack.c.bf16 %v4422_v4, %v4421_v37  ;;  %v1477_v37 = vld [vmem:[#allocation2 + $0x97] sm:$0xff] }
 0x245   : > { %v9589_v4 = vld [vmem:[#allocation50_spill] sm:$0xff] }
 0x246   : > { %2928 = vmatmul.mubr.f32.gmra.mrb[12].mxu0 %v1501_v11  ;;  %6444 = vmatpush1.bf16.msra.mxu1 %v6443_v28  ;;  %v4425_v11 = vld [vmem:[#allocation9 + $0xb0] sm:$0xff]  ;;  %v1509_v28 = vmul.f32 %v9589_v4, %v1477_v37 }
 0x247   : > { %2932 = vmatprep.mubr.f32.mxu0 %v8229_v48  ;;  %v4424_v48 = vld [vmem:[#allocation9 + $0xa8] sm:$0xff]  ;;  %6445 = vmatprep.subr.bf16.mxu1 %v9575_v61 }
 0x248   : > { %v6446_v25 = vpack.c.bf16 %v4424_v48, %v4423_v2  ;;  %v1479_v2 = vld [vmem:[#allocation2 + $0xa7] sm:$0xff]  ;;  %v9590_v48 = vld [vmem:[#allocation51_spill] sm:$0xff] }
 0x24a   : > { %2933 = vmatmul.mubr.f32.gmra.mrb[14].mxu0 %v1470_v26  ;;  %6447 = vmatpush1.bf16.msra.mxu1 %v6446_v25  ;;  %v9588_v26 = vld [vmem:[#allocation49_spill] sm:$0xff]  ;;  %v9591_v25 = vld [vmem:[#allocation52_spill] sm:$0xff] }
 0x24b   : > { %2937 = vmatprep.mubr.f32.mxu0 %v8235_v52  ;;  %v4426_v52 = vld [vmem:[#allocation9 + $0xb8] sm:$0xff]  ;;  %6448 = vmatprep.subr.bf16.mxu1 %v9575_v61  ;;  %v1507_v10 = vmul.f32 %v9588_v26, %v1475_v63  ;;  %v4531_v63 = vld [vmem:[#allocation9 + $0x400] sm:$0xff] }
 0x24c   : > { %v6449_v56 = vpack.c.bf16 %v4426_v52, %v4425_v11  ;;  %v4431_v11 = vld [vmem:[#allocation9 + $0xe0] sm:$0xff]  ;;  %v4432_v52 = vld [vmem:[#allocation9 + $0xe8] sm:$0xff] }
 0x24e   : > { %2938 = vmatmul.mubr.f32.gmra.mrb[16].mxu0 %v1503_v42  ;;  %6450 = vmatpush1.bf16.msra.mxu1 %v6449_v56  ;;  %v9592_v56 = vld [vmem:[#allocation53_spill] sm:$0xff] }
 0x24f   : > { %2942 = vmatprep.mubr.f32.mxu0 %v8243_v54  ;;  %v4428_v54 = vld [vmem:[#allocation9 + $0xc8] sm:$0xff]  ;;  %6451 = vmatprep.subr.bf16.mxu1 %v9575_v61 }
 0x250   : > { %v6452_v18 = vpack.c.bf16 %v4428_v54, %v4427_v40  ;;  %v6458_v40 = vpack.c.bf16 %v4432_v52, %v4431_v11  ;;  %v4434_v54 = vld [vmem:[#allocation9 + $0xf8] sm:$0xff]  ;;  %v9597_v11 = vld [vmem:[#allocation55_spill] sm:$0xff] }
 0x252   : > { %2943 = vmatmul.mubr.f32.gmra.mrb[18].mxu0 %v1472_v60  ;;  %6453 = vmatpush1.bf16.msra.mxu1 %v6452_v18  ;;  %v1511_v60 = vmul.f32 %v9590_v48, %v1479_v2  ;;  %v4532_v18 = vld [vmem:[#allocation9 + $0x408] sm:$0xff]  ;;  %v8428_v2 = vld [vmem:[#allocation2 + $0x8] sm:$0xff] }
 0x253   : > { %2947 = vmatprep.mubr.f32.mxu0 %v8249_v31  ;;  %v4430_v31 = vld [vmem:[#allocation9 + $0xd8] sm:$0xff]  ;;  %6454 = vmatprep.subr.bf16.mxu1 %v9575_v61 }
 0x254   : > { %v6455_v42 = vpack.c.bf16 %v4430_v31, %v4429_v55  ;;  %v3347_v55 = vld [vmem:[#allocation2 + $0x7] sm:$0xff] }
 0x256   : > { %2948 = vmatmul.mubr.f32.gmra.mrb[20].mxu0 %v1505_v12  ;;  %6456 = vmatpush1.bf16.msra.mxu1 %v6455_v42  ;;  %v1513_v12 = vmul.f32 %v9591_v25, %v1481_v34  ;;  %v9594_v42 = vld [vmem:[#allocation54_spill] sm:$0xff]  ;;  %v1487_v34 = vld [vmem:[#allocation2 + $0xe7] sm:$0xff] }
 0x257   : > { %2952 = vmatprep.mubr.f32.mxu0 %v8257_v7  ;;  %v1476_v7 = vld [vmem:[#allocation2 + $0x8f] sm:$0xff]  ;;  %6457 = vmatprep.subr.bf16.mxu1 %v9575_v61  ;;  %v1519_v52 = vmul.f32 %v9597_v11, %v1487_v34  ;;  %v1490_v34 = vld [vmem:[#allocation2 + $0xff] sm:$0xff] }
 0x25a   : > { %2953 = vmatmul.mubr.f32.gmra.mrb[22].mxu0 %v1474_v38  ;;  %6459 = vmatpush1.bf16.msra.mxu1 %v6458_v40  ;;  %v4538_v40 = vld [vmem:[#allocation9 + $0x438] sm:$0xff] }
 0x25b   : > { %2957 = vmatprep.mubr.f32.mxu0 %v8263_v44  ;;  %v1478_v44 = vld [vmem:[#allocation2 + $0x9f] sm:$0xff]  ;;  %6460 = vmatprep.subr.bf16.mxu1 %v9575_v61 }
 0x25e   : > { %2958 = vmatmul.mubr.f32.gmra.mrb[24].mxu0 %v1507_v10  ;;  %v8414_v10 = vpack.c.bf16 %v4532_v18, %v4531_v63  ;;  %v4435_v63 = vld [vmem:[#allocation9 + $0x100] sm:$0xff]  ;;  %v4436_v18 = vld [vmem:[#allocation9 + $0x108] sm:$0xff] }
 0x25f   : > { %2962 = vmatprep.mubr.f32.mxu0 %v8271_v3  ;;  %v1480_v3 = vld [vmem:[#allocation2 + $0xaf] sm:$0xff] }
 0x260   : > { %9593 = vst [vmem:[#allocation45_spill] sm:$0xff] %v8414_v10  ;;  %6608 = vmatprep.subr.bf16.mxu0 %v8414_v10 }
 0x261   : > { %6610 = vmatpush3.bf16.msra.mxu0 %v8414_v10 }
 0x262   : > { %2963 = vmatmul.mubr.f32.gmra.mrb[26].mxu0 %v1476_v7 }
 0x263   : > { %2967 = vmatprep.mubr.f32.mxu0 %v8277_v20  ;;  %v1482_v20 = vld [vmem:[#allocation2 + $0xbf] sm:$0xff] }
 0x266   : > { %2968 = vmatmul.mubr.f32.gmra.mrb[28].mxu0 %v1509_v28  ;;  %v4534_v28 = vld [vmem:[#allocation9 + $0x418] sm:$0xff] }
 0x267   : > { %2972 = vmatprep.mubr.f32.mxu0 %v8284_v15  ;;  %v1483_v15 = vld [vmem:[#allocation2 + $0xc7] sm:$0xff] }
 0x26a   : > { %2973 = vmatmul.mubr.f32.gmra.mrb[30].mxu0 %v1478_v44 }
 0x26b   : > { %2977 = vmatprep.mubr.f32.mxu0 %v8289_v30  ;;  %v1515_v30 = vmul.f32 %v9592_v56, %v1483_v15 }
 0x26e   : > { %2978 = vmatmul.mubr.f32.gmra.mrb[32].mxu0 %v1511_v60  ;;  %v1486_v60 = vld [vmem:[#allocation2 + $0xdf] sm:$0xff] }
 0x26f   : > { %2982 = vmatprep.mubr.f32.mxu0 %v8296_v59  ;;  %v4433_v59 = vld [vmem:[#allocation9 + $0xf0] sm:$0xff] }
 0x270   : > { %v6461_v38 = vpack.c.bf16 %v4434_v54, %v4433_v59  ;;  %v1488_v54 = vld [vmem:[#allocation2 + $0xef] sm:$0xff] }
 0x272   : > { %2983 = vmatmul.mubr.f32.gmra.mrb[34].mxu0 %v1480_v3  ;;  %6462 = vmatpush1.bf16.msra.mxu1 %v6461_v38  ;;  %v3348_v3 = vld [vmem:[#allocation2 + $0xf] sm:$0xff] }
 0x273   : > { %2987 = vmatprep.mubr.f32.mxu0 %v8301_v8  ;;  %v1484_v8 = vld [vmem:[#allocation2 + $0xcf] sm:$0xff]  ;;  %6463 = vmatprep.subr.bf16.mxu1 %v9575_v61 }
 0x274   : > { %v4539_v38 = vld [vmem:[#allocation9 + $0x440] sm:$0xff] }
 0x276   : > { %2988 = vmatmul.mubr.f32.gmra.mrb[36].mxu0 %v1513_v12  ;;  %v4536_v12 = vld [vmem:[#allocation9 + $0x428] sm:$0xff] }
 0x277   : > { %2992 = vmatprep.mubr.f32.mxu0 %v8308_v14  ;;  %v1485_v14 = vld [vmem:[#allocation2 + $0xd7] sm:$0xff] }
 0x278   : > { %v1517_v7 = vmul.f32 %v9594_v42, %v1485_v14  ;;  %v4540_v14 = vld [vmem:[#allocation9 + $0x448] sm:$0xff] }
 0x27a   : > { %2993 = vmatmul.mubr.f32.gmra.mrb[38].mxu0 %v1482_v20 }
 0x27b   : > { %2997 = vmatprep.mubr.f32.mxu0 %v8313_v49  ;;  %v3379_v49 = vmul.f32 %v7725_v36, %v3347_v55  ;;  %v6464_v55 = vpack.c.bf16 %v4436_v18, %v4435_v63  ;;  %v4546_v18 = vld [vmem:[#allocation9 + $0x478] sm:$0xff]  ;;  %v4460_v36 = vld [vmem:[#allocation9 + $0x1c8] sm:$0xff] }
 0x27d   : > { %v8416_v31 = vpop.f32.mrb[0].mxu1  ;;  %4619 = vmatmul.mubr.f32.vlgmr.msra.gmra.mrb[32].mxu1 %v3379_v49 }
 0x27e   : > { %2998 = vmatmul.mubr.f32.gmra.mrb[40].mxu0 %v1515_v30  ;;  %v8422_v37 = vpop.f32.mrb[1].mxu1  ;;  %4623 = vmatprep.mubr.f32.mxu1 %v8428_v2 }
 0x27f   : > { %3002 = vmatprep.mubr.f32.mxu0 %v8320_v45  ;;  %v4533_v45 = vld [vmem:[#allocation9 + $0x410] sm:$0xff]  ;;  %6465 = vmatpush1.bf16.msra.mxu1 %v6464_v55 }
 0x280   : > { %v8426_v44 = vpack.c.bf16 %v4534_v28, %v4533_v45  ;;  %6466 = vmatprep.subr.bf16.mxu1 %v9575_v61 }
 0x281   : > { %4624 = vmatmul.mubr.f32.gmra.mrb[34].mxu1 %v3348_v3  ;;  %v8436_v15 = vpop.f32.mrb[2].mxu1 }
 0x282   : > { %3003 = vmatmul.mubr.f32.gmra.mrb[42].mxu0 %v1484_v8  ;;  %9595 = vst [vmem:[#allocation46_spill] sm:$0xff] %v8426_v44  ;;  %6612 = vmatprep.subr.bf16.mxu0 %v8426_v44  ;;  %v8440_v30 = vpop.f32.mrb[3].mxu1  ;;  %v1489_v8 = vld [vmem:[#allocation2 + $0xf7] sm:$0xff] }
 0x283   : > { %3007 = vmatprep.mubr.f32.mxu0 %v8325_v62  ;;  %6614 = vmatpush3.bf16.msra.mxu0 %v8426_v44  ;;  %v4535_v62 = vld [vmem:[#allocation9 + $0x420] sm:$0xff]  ;;  %v4454_v44 = vld [vmem:[#allocation9 + $0x198] sm:$0xff] }
 0x284   : > { %v8434_v20 = vpack.c.bf16 %v4536_v12, %v4535_v62  ;;  %v4543_v62 = vld [vmem:[#allocation9 + $0x460] sm:$0xff]  ;;  %v4544_v12 = vld [vmem:[#allocation9 + $0x468] sm:$0xff] }
 0x286   : > { %3008 = vmatmul.mubr.f32.gmra.mrb[44].mxu0 %v1517_v7  ;;  %9596 = vst [vmem:[#allocation67_spill] sm:$0xff] %v8434_v20  ;;  %6616 = vmatprep.subr.bf16.mxu0 %v8434_v20  ;;  %v9600_v7 = vld [vmem:[#allocation56_spill] sm:$0xff] }
 0x287   : > { %3012 = vmatprep.mubr.f32.mxu0 %v8332_v51  ;;  %6618 = vmatpush3.bf16.msra.mxu0 %v8434_v20  ;;  %v4537_v51 = vld [vmem:[#allocation9 + $0x430] sm:$0xff]  ;;  %v1521_v45 = vmul.f32 %v9600_v7, %v1489_v8 }
 0x288   : > { %v8444_v59 = vpack.c.bf16 %v4538_v40, %v4537_v51  ;;  %v4438_v51 = vld [vmem:[#allocation9 + $0x118] sm:$0xff] }
 0x289   : > { %v7180_v8 = vld [vmem:[#allocation2 + $0x107] sm:$0xff] }
 0x28a   : > { %3013 = vmatmul.mubr.f32.gmra.mrb[46].mxu0 %v1486_v60  ;;  %9598 = vst [vmem:[#allocation68_spill] sm:$0xff] %v8444_v59  ;;  %6620 = vmatprep.subr.bf16.mxu0 %v8444_v59  ;;  %v4542_v60 = vld [vmem:[#allocation9 + $0x458] sm:$0xff] }
 0x28b   : > { %3017 = vmatprep.mubr.f32.mxu0 %v8337_v43  ;;  %6622 = vmatpush3.bf16.msra.mxu0 %v8444_v59  ;;  %v8449_v43 = vpack.c.bf16 %v4540_v14, %v4539_v38  ;;  %v9603_v38 = vld [vmem:[#allocation57_spill] sm:$0xff]  ;;  %v4452_v59 = vld [vmem:[#allocation9 + $0x188] sm:$0xff] }
 0x28c   : > { %v8451_v49 = vpop.f32.mrb[4].mxu1  ;;  %v1523_v14 = vmul.f32 %v7180_v8, %v9603_v38  ;;  %v1494_v8 = vld [vmem:[#allocation2 + $0x11f] sm:$0xff] }
 0x28d   : > { %9599 = vst [vmem:[#allocation69_spill] sm:$0xff] %v8449_v43  ;;  %6624 = vmatprep.subr.bf16.mxu0 %v8449_v43  ;;  %v8455_v28 = vpop.f32.mrb[5].mxu1 }
 0x28e   : > { %3018 = vmatmul.mubr.f32.gmra.mrb[48].mxu0 %v1519_v52  ;;  %v4437_v52 = vld [vmem:[#allocation9 + $0x110] sm:$0xff] }
 0x28f   : > { %3022 = vmatprep.mubr.f32.mxu0 %v8344_v19  ;;  %v4541_v19 = vld [vmem:[#allocation9 + $0x450] sm:$0xff]  ;;  %6626 = vmatpush3.bf16.msra.mxu0 %v8449_v43  ;;  %v6467_v40 = vpack.c.bf16 %v4438_v51, %v4437_v52  ;;  %v9605_v52 = vld [vmem:[#allocation58_spill] sm:$0xff] }
 0x290   : > { %v8460_v3 = vpack.c.bf16 %v4542_v60, %v4541_v19  ;;  %v4439_v19 = vld [vmem:[#allocation9 + $0x120] sm:$0xff]  ;;  %v4440_v60 = vld [vmem:[#allocation9 + $0x128] sm:$0xff] }
 0x291   : > { %6468 = vmatpush1.bf16.msra.mxu1 %v6467_v40 }
 0x292   : > { %3023 = vmatmul.mubr.f32.gmra.mrb[50].mxu0 %v1488_v54  ;;  %9601 = vst [vmem:[#allocation70_spill] sm:$0xff] %v8460_v3  ;;  %6628 = vmatprep.subr.bf16.mxu0 %v8460_v3 }
 0x293   : > { %3027 = vmatprep.mubr.f32.mxu0 %v8348_v46  ;;  %6630 = vmatpush3.bf16.msra.mxu0 %v8460_v3  ;;  %v8465_v46 = vpack.c.bf16 %v4544_v12, %v4543_v62  ;;  %v7181_v12 = vld [vmem:[#allocation2 + $0x10f] sm:$0xff] }
 0x294   : > { %v8467_v54 = vpop.f32.mrb[6].mxu1  ;;  %6469 = vmatprep.subr.bf16.mxu1 %v9575_v61  ;;  %v4450_v3 = vld [vmem:[#allocation9 + $0x178] sm:$0xff] }
 0x295   : > { %9602 = vst [vmem:[#allocation71_spill] sm:$0xff] %v8465_v46  ;;  %6632 = vmatprep.subr.bf16.mxu0 %v8465_v46  ;;  %v8471_v63 = vpop.f32.mrb[7].mxu1 }
 0x296   : > { %3028 = vmatmul.mubr.f32.gmra.mrb[52].mxu0 %v1521_v45  ;;  %v1493_v45 = vld [vmem:[#allocation2 + $0x117] sm:$0xff] }
 0x297   : > { %3032 = vmatprep.mubr.f32.mxu0 %v8354_v1  ;;  %v4545_v1 = vld [vmem:[#allocation9 + $0x470] sm:$0xff]  ;;  %6634 = vmatpush3.bf16.msra.mxu0 %v8465_v46  ;;  %v1525_v51 = vmul.f32 %v9605_v52, %v1493_v45  ;;  %v4443_v45 = vld [vmem:[#allocation9 + $0x140] sm:$0xff] }
 0x298   : > { %v8476_v55 = vpack.c.bf16 %v4546_v18, %v4545_v1  ;;  %v8481_v62 = vpop.f32.mrb[8].mxu1  ;;  %v4442_v1 = vld [vmem:[#allocation9 + $0x138] sm:$0xff] }
 0x299   : > { %v8484_v40 = vpop.f32.mrb[9].mxu1 }
 0x29a   : > { %3033 = vmatmul.mubr.f32.gmra.mrb[54].mxu0 %v1490_v34  ;;  %9604 = vst [vmem:[#allocation72_spill] sm:$0xff] %v8476_v55  ;;  %6636 = vmatprep.subr.bf16.mxu0 %v8476_v55  ;;  %v6470_v34 = vpack.c.bf16 %v4440_v60, %v4439_v19 }
 0x29b   : > { %3037 = vmatprep.mubr.f32.mxu0 %v8359_v13  ;;  %6638 = vmatpush3.bf16.msra.mxu0 %v8476_v55  ;;  %v4448_v55 = vld [vmem:[#allocation9 + $0x168] sm:$0xff] }
 0x29c   : > { %6471 = vmatpush1.bf16.msra.mxu1 %v6470_v34  ;;  %v8489_v19 = vpop.f32.mrb[10].mxu1 }
 0x29d   : > { %6472 = vmatprep.subr.bf16.mxu1 %v9575_v61  ;;  %v8491_v60 = vpop.f32.mrb[11].mxu1 }
 0x29e   : > { %3038 = vmatmul.mubr.f32.gmra.mrb[56].mxu0 %v1523_v14  ;;  %v4441_v14 = vld [vmem:[#allocation9 + $0x130] sm:$0xff] }
 0x29f   : > { %3042 = vmatprep.mubr.f32.mxu0 %v8363_v0  ;;  %v6473_v18 = vpack.c.bf16 %v4442_v1, %v4441_v14  ;;  %v4446_v14 = vld [vmem:[#allocation9 + $0x158] sm:$0xff] }
 0x2a1   : > { %6474 = vmatpush1.bf16.msra.mxu1 %v6473_v18  ;;  %v4447_v18 = vld [vmem:[#allocation9 + $0x160] sm:$0xff] }
 0x2a2   : > { %3043 = vmatmul.mubr.f32.gmra.mrb[58].mxu0 %v7181_v12  ;;  %6475 = vmatprep.subr.bf16.mxu1 %v9575_v61  ;;  %v4444_v12 = vld [vmem:[#allocation9 + $0x148] sm:$0xff] }
 0x2a3   : > { %3047 = vmatprep.mubr.f32.mxu0 %v8428_v2  ;;  %v6476_v34 = vpack.c.bf16 %v4444_v12, %v4443_v45  ;;  %v6482_v45 = vpack.c.bf16 %v4448_v55, %v4447_v18 }
 0x2a5   : > { %6477 = vmatpush1.bf16.msra.mxu1 %v6476_v34  ;;  %v4449_v34 = vld [vmem:[#allocation9 + $0x170] sm:$0xff] }
 0x2a6   : > { %3048 = vmatmul.mubr.f32.gmra.mrb[60].mxu0 %v1525_v51  ;;  %6478 = vmatprep.subr.bf16.mxu1 %v9575_v61 }
 0x2a7   : > { %3052 = vmatprep.mubr.f32.mxu0 %v8428_v2  ;;  %v4445_v2 = vld [vmem:[#allocation9 + $0x150] sm:$0xff] }
 0x2a8   : > { %v8494_v13 = vpop.f32.mrb[12].mxu1  ;;  %v6479_v1 = vpack.c.bf16 %v4446_v14, %v4445_v2  ;;  %v6485_v2 = vpack.c.bf16 %v4450_v3, %v4449_v34 }
 0x2a9   : > { %v8496_v51 = vpop.f32.mrb[13].mxu1 }
 0x2aa   : > { %3053 = vmatmul.mubr.f32.gmra.mrb[62].mxu0 %v1494_v8  ;;  %6480 = vmatpush1.bf16.msra.mxu1 %v6479_v1  ;;  %v4451_v1 = vld [vmem:[#allocation9 + $0x180] sm:$0xff] }
 0x2ab   : > { %6481 = vmatprep.subr.bf16.mxu1 %v9575_v61  ;;  %v6488_v55 = vpack.c.bf16 %v4452_v59, %v4451_v1 }
 0x2ae   : > { %6483 = vmatpush1.bf16.msra.mxu1 %v6482_v45  ;;  %v4453_v45 = vld [vmem:[#allocation9 + $0x190] sm:$0xff] }
 0x2af   : > { %6484 = vmatprep.subr.bf16.mxu1 %v9575_v61  ;;  %v6491_v3 = vpack.c.bf16 %v4454_v44, %v4453_v45 }
 0x2b0   : > { %v8499_v0 = vpop.f32.mrb[14].mxu1 }
 0x2b1   : > { %v8501_v8 = vpop.f32.mrb[15].mxu1 }
 0x2b2   : > { %6486 = vmatpush1.bf16.msra.mxu1 %v6485_v2  ;;  %v4455_v2 = vld [vmem:[#allocation9 + $0x1a0] sm:$0xff] }
 0x2b3   : > { %6487 = vmatprep.subr.bf16.mxu1 %v9575_v61  ;;  %v6494_v59 = vpack.c.bf16 %v4456_v47, %v4455_v2 }
 0x2b4   : > { %v8504_v12 = vpop.f32.mrb[16].mxu1 }
 0x2b5   : > { %v8506_v46 = vpop.f32.mrb[17].mxu1 }
 0x2b6   : > { %6489 = vmatpush1.bf16.msra.mxu1 %v6488_v55  ;;  %v4457_v55 = vld [vmem:[#allocation9 + $0x1b0] sm:$0xff] }
 0x2b7   : > { %6490 = vmatprep.subr.bf16.mxu1 %v9575_v61  ;;  %v6497_v44 = vpack.c.bf16 %v4458_v32, %v4457_v55 }
 0x2b8   : > { %v8509_v14 = vpop.f32.mrb[18].mxu1 }
 0x2b9   : > { %v8511_v43 = vpop.f32.mrb[19].mxu1 }
 0x2ba   : > { %6492 = vmatpush1.bf16.msra.mxu1 %v6491_v3  ;;  %v4459_v3 = vld [vmem:[#allocation9 + $0x1c0] sm:$0xff] }
 0x2bb   : > { %6493 = vmatprep.subr.bf16.mxu1 %v9575_v61  ;;  %v6500_v47 = vpack.c.bf16 %v4460_v36, %v4459_v3  ;;  %v8547_v36 = vld [vmem:[%s9378_s2] ss:$0 sm:$0xff]  ;;  %v4464_v3 = vld [vmem:[#allocation9 + $0x1e8] sm:$0xff] }
 0x2bc   : > { %v8514_v18 = vpop.f32.mrb[20].mxu1 }
 0x2bd   : > { %v8516_v20 = vpop.f32.mrb[21].mxu1 }
 0x2be   : > { %6495 = vmatpush1.bf16.msra.mxu1 %v6494_v59  ;;  %v4461_v59 = vld [vmem:[#allocation9 + $0x1d0] sm:$0xff] }
 0x2bf   : > { %6496 = vmatprep.subr.bf16.mxu1 %v9575_v61  ;;  %v6503_v32 = vpack.c.bf16 %v4462_v33, %v4461_v59  ;;  %v4465_v59 = vld [vmem:[#allocation9 + $0x1f0] sm:$0xff] }
 0x2c0   : > { %v8519_v34 = vpop.f32.mrb[22].mxu1 }
 0x2c1   : > { %v8521_v10 = vpop.f32.mrb[23].mxu1 }
 0x2c2   : > { %6498 = vmatpush1.bf16.msra.mxu1 %v6497_v44  ;;  %v4463_v44 = vld [vmem:[#allocation9 + $0x1e0] sm:$0xff] }
 0x2c3   : > { %6499 = vmatprep.subr.bf16.mxu1 %v9575_v61 }
 0x2c4   : > { %v8524_v1 = vpop.f32.mrb[24].mxu1 }
 0x2c5   : > { %v8526_v57 = vpop.f32.mrb[25].mxu1 }
 0x2c6   : > { %6501 = vmatpush1.bf16.msra.mxu1 %v6500_v47 }
 0x2c7   : > { %6502 = vmatprep.subr.bf16.mxu1 %v9575_v61 }
 0x2c8   : > { %v8529_v45 = vpop.f32.mrb[26].mxu1 }
 0x2c9   : > { %9606 = vst [vmem:[#allocation73_spill] sm:$0xff] %v8529_v45  ;;  %v8531_v41 = vpop.f32.mrb[27].mxu1 }
 0x2ca   : > { %9607 = vst [vmem:[#allocation74_spill] sm:$0xff] %v8531_v41  ;;  %6504 = vmatpush1.bf16.msra.mxu1 %v6503_v32  ;;  %v4466_v32 = vld [vmem:[#allocation9 + $0x1f8] sm:$0xff] }
 0x2cb   : > { %6505 = vmatprep.subr.bf16.mxu1 %v9575_v61 }
 0x2cc   : > { %v8534_v2 = vpop.f32.mrb[28].mxu1 }
 0x2cd   : > { %9608 = vst [vmem:[#allocation75_spill] sm:$0xff] %v8534_v2  ;;  %v8536_v52 = vpop.f32.mrb[29].mxu1  ;;  %v6506_v2 = vpack.c.bf16 %v4464_v3, %v4463_v44 }
 0x2ce   : > { %9609 = vst [vmem:[#allocation76_spill] sm:$0xff] %v8536_v52 }
 0x2cf   : > { %6507 = vmatpush1.bf16.msra.mxu1 %v6506_v2 }
 0x2d0   : > { %6508 = vmatprep.subr.bf16.mxu1 %v9575_v61 }
 0x2f1   : > { %v8539_v55 = vpop.f32.mrb[30].mxu1 }
 0x2f2   : > { %9610 = vst [vmem:[#allocation77_spill] sm:$0xff] %v8539_v55  ;;  %v8541_v38 = vpop.f32.mrb[31].mxu1 }
 0x2f3   : > { %9611 = vst [vmem:[#allocation78_spill] sm:$0xff] %v8541_v38  ;;  %v6509_v38 = vpack.c.bf16 %v4466_v32, %v4465_v59 }
 0x2f5   : > { %6510 = vmatpush1.bf16.msra.mxu1 %v6509_v38 }
 0x2f6   : > { %6511 = vmatprep.subr.bf16.mxu1 %v9575_v61 }
 0x301   : > { %v2899_v47 = vpop.f32.mrb[0].mxu0 }
 0x302   : > { %v6655_v52 = vadd.f32 %v8547_v36, %v2899_v47  ;;  %v2901_v39 = vpop.f32.mrb[1].mxu0 }
 0x304   : > { %v3125_v33 = vadd.f32 %v6655_v52, %v8422_v37 }
 0x305   : > { %v2904_v55 = vpop.f32.mrb[2].mxu0 }
 0x306   : > { %v3283_v7 = vmax.f32 %v3125_v33, 0.0  ;;  %v6656_v45 = vadd.f32 %v8547_v36, %v2904_v55  ;;  %v2906_v41 = vpop.f32.mrb[3].mxu0 }
 0x308   : > { %3315 = vst [vmem:[#allocation2 + $0x18] sm:$0xff] %v3283_v7  ;;  %v3130_v44 = vadd.f32 %v6656_v45, %v8416_v31  ;;  %4628 = vmatprep.mubr.f32.mxu1 %v3283_v7 }
 0x309   : > { %v2909_v39 = vpop.f32.mrb[4].mxu0 }
 0x30a   : > { %v3284_v2 = vmax.f32 %v3130_v44, 0.0  ;;  %v6657_v37 = vadd.f32 %v8547_v36, %v2909_v39  ;;  %v2911_v52 = vpop.f32.mrb[5].mxu0 }
 0x30c   : > { %3316 = vst [vmem:[#allocation2 + $0x20] sm:$0xff] %v3284_v2  ;;  %v3135_v3 = vadd.f32 %v6657_v37, %v8440_v30 }
 0x30d   : > { %v2914_v47 = vpop.f32.mrb[6].mxu0 }
 0x30e   : > { %v3285_v33 = vmax.f32 %v3135_v3, 0.0  ;;  %v6658_v55 = vadd.f32 %v8547_v36, %v2914_v47  ;;  %v2916_v41 = vpop.f32.mrb[7].mxu0 }
 0x30f   : > { %v8558_v38 = vld [vmem:[#allocation2 + $0x17] sm:$0xff] }
 0x310   : > { %3317 = vst [vmem:[#allocation2 + $0x28] sm:$0xff] %v3285_v33  ;;  %v3140_v31 = vadd.f32 %v6658_v55, %v8436_v15  ;;  %v3381_v7 = vmul.f32 %v7733_v58, %v8558_v38 }
 0x311   : > { %v2919_v45 = vpop.f32.mrb[8].mxu0 }
 0x312   : > { %v3286_v59 = vmax.f32 %v3140_v31, 0.0  ;;  %v6659_v32 = vadd.f32 %v8547_v36, %v2919_v45  ;;  %v2921_v44 = vpop.f32.mrb[9].mxu0  ;;  %4629 = vmatmul.mubr.f32.gmra.mrb[36].mxu1 %v3381_v7 }
 0x313   : > { %4633 = vmatprep.mubr.f32.mxu1 %v3284_v2  ;;  %v8565_v37 = vld [vmem:[#allocation2 + $0x1f] sm:$0xff] }
 0x314   : > { %3318 = vst [vmem:[#allocation2 + $0x30] sm:$0xff] %v3286_v59  ;;  %v3145_v30 = vadd.f32 %v6659_v32, %v8455_v28 }
 0x315   : > { %v2924_v39 = vpop.f32.mrb[10].mxu0 }
 0x316   : > { %v3287_v52 = vmax.f32 %v3145_v30, 0.0  ;;  %v6660_v3 = vadd.f32 %v8547_v36, %v2924_v39  ;;  %v2926_v15 = vpop.f32.mrb[11].mxu0  ;;  %4634 = vmatmul.mubr.f32.gmra.mrb[38].mxu1 %v8565_v37 }
 0x317   : > { %4638 = vmatprep.mubr.f32.mxu1 %v3285_v33  ;;  %v8569_v47 = vld [vmem:[#allocation2 + $0x27] sm:$0xff] }
 0x318   : > { %3319 = vst [vmem:[#allocation2 + $0x38] sm:$0xff] %v3287_v52  ;;  %v3150_v55 = vadd.f32 %v6660_v3, %v8451_v49  ;;  %v3383_v2 = vmul.f32 %v9584_v27, %v8569_v47 }
 0x319   : > { %v2929_v41 = vpop.f32.mrb[12].mxu0 }
 0x31a   : > { %v3288_v28 = vmax.f32 %v3150_v55, 0.0  ;;  %v6661_v31 = vadd.f32 %v8547_v36, %v2929_v41  ;;  %v2931_v7 = vpop.f32.mrb[13].mxu0  ;;  %4639 = vmatmul.mubr.f32.gmra.mrb[40].mxu1 %v3383_v2 }
 0x31b   : > { %4643 = vmatprep.mubr.f32.mxu1 %v3286_v59  ;;  %v8575_v45 = vld [vmem:[#allocation2 + $0x29] sm:$0xff] }
 0x31c   : > { %3320 = vst [vmem:[#allocation2 + $0x40] sm:$0xff] %v3288_v28  ;;  %v3155_v33 = vadd.f32 %v6661_v31, %v8471_v63  ;;  %6143 = vmatprep.mubr.f32.mxu0 %v8575_v45  ;;  %v8579_v44 = vld [vmem:[#allocation2 + $0x2f] sm:$0xff] }
 0x31d   : > { %v2934_v32 = vpop.f32.mrb[14].mxu0 }
 0x31e   : > { %v3289_v49 = vmax.f32 %v3155_v33, 0.0  ;;  %v6662_v30 = vadd.f32 %v8547_v36, %v2934_v32  ;;  %v2936_v39 = vpop.f32.mrb[15].mxu0  ;;  %4644 = vmatmul.mubr.f32.gmra.mrb[42].mxu1 %v8579_v44 }
 0x31f   : > { %4648 = vmatprep.mubr.f32.mxu1 %v3287_v52  ;;  %v8583_v3 = vld [vmem:[#allocation2 + $0x37] sm:$0xff] }
 0x320   : > { %v8585_v59 = vld [vmem:[#allocation2 + $0x31] sm:$0xff]  ;;  %3321 = vst [vmem:[#allocation2 + $0x48] sm:$0xff] %v3289_v49  ;;  %v3160_v15 = vadd.f32 %v6662_v30, %v8467_v54  ;;  %v3385_v63 = vmul.f32 %v9585_v5, %v8583_v3 }
 0x321   : > { %v4052_v55 = vmul.f32 %v7948_v35, %v8585_v59  ;;  %v2939_v2 = vpop.f32.mrb[16].mxu0 }
 0x322   : > { %v3290_v41 = vmax.f32 %v3160_v15, 0.0  ;;  %v6663_v31 = vadd.f32 %v8547_v36, %v2939_v2  ;;  %v2941_v7 = vpop.f32.mrb[17].mxu0  ;;  %4649 = vmatmul.mubr.f32.gmra.mrb[44].mxu1 %v3385_v63 }
 0x323   : > { %6144 = vmatmul.mubr.f32.vlgmr.msra.gmra.mrb[64].mxu0 %v4052_v55  ;;  %4653 = vmatprep.mubr.f32.mxu1 %v3288_v28  ;;  %v8593_v52 = vld [vmem:[#allocation2 + $0x39] sm:$0xff] }
 0x324   : > { %3322 = vst [vmem:[#allocation2 + $0x50] sm:$0xff] %v3290_v41  ;;  %v3165_v33 = vadd.f32 %v6663_v31, %v8484_v40  ;;  %6146 = vmatprep.mubr.f32.mxu0 %v8593_v52  ;;  %v8597_v32 = vld [vmem:[#allocation2 + $0x3f] sm:$0xff] }
 0x325   : > { %v2944_v54 = vpop.f32.mrb[18].mxu0 }
 0x326   : > { %v3291_v30 = vmax.f32 %v3165_v33, 0.0  ;;  %v6664_v39 = vadd.f32 %v8547_v36, %v2944_v54  ;;  %v2946_v15 = vpop.f32.mrb[19].mxu0  ;;  %4654 = vmatmul.mubr.f32.gmra.mrb[46].mxu1 %v8597_v32 }
 0x327   : > { %4658 = vmatprep.mubr.f32.mxu1 %v3289_v49  ;;  %v8601_v63 = vld [vmem:[#allocation2 + $0x47] sm:$0xff] }
 0x328   : > { %v8603_v28 = vld [vmem:[#allocation2 + $0x41] sm:$0xff]  ;;  %3323 = vst [vmem:[#allocation2 + $0x58] sm:$0xff] %v3291_v30  ;;  %v3170_v55 = vadd.f32 %v6664_v39, %v8481_v62  ;;  %v3387_v40 = vmul.f32 %v9586_v29, %v8601_v63 }
 0x329   : > { %9612 = vst [vmem:[#allocation79_spill] sm:$0xff] %v8603_v28  ;;  %v4054_v2 = vmul.f32 %v7959_v22, %v8603_v28  ;;  %v2949_v31 = vpop.f32.mrb[20].mxu0 }
 0x32a   : > { %v3292_v7 = vmax.f32 %v3170_v55, 0.0  ;;  %v6665_v33 = vadd.f32 %v8547_v36, %v2949_v31  ;;  %v2951_v54 = vpop.f32.mrb[21].mxu0  ;;  %4659 = vmatmul.mubr.f32.gmra.mrb[48].mxu1 %v3387_v40 }
 0x32b   : > { %6147 = vmatmul.mubr.f32.gmra.mrb[66].mxu0 %v4054_v2  ;;  %4663 = vmatprep.mubr.f32.mxu1 %v3290_v41  ;;  %v8611_v49 = vld [vmem:[#allocation2 + $0x49] sm:$0xff] }
 0x32c   : > { %3324 = vst [vmem:[#allocation2 + $0x60] sm:$0xff] %v3292_v7  ;;  %v3175_v15 = vadd.f32 %v6665_v33, %v8491_v60  ;;  %6149 = vmatprep.mubr.f32.mxu0 %v8611_v49  ;;  %v8615_v39 = vld [vmem:[#allocation2 + $0x4f] sm:$0xff] }
 0x32d   : > { %v2954_v62 = vpop.f32.mrb[22].mxu0 }
 0x32e   : > { %v3293_v29 = vmax.f32 %v3175_v15, 0.0  ;;  %v6666_v28 = vadd.f32 %v8547_v36, %v2954_v62  ;;  %v2956_v55 = vpop.f32.mrb[23].mxu0  ;;  %4664 = vmatmul.mubr.f32.gmra.mrb[50].mxu1 %v8615_v39 }
 0x32f   : > { %4668 = vmatprep.mubr.f32.mxu1 %v3291_v30  ;;  %v8619_v40 = vld [vmem:[#allocation2 + $0x57] sm:$0xff] }
 0x330   : > { %v8621_v41 = vld [vmem:[#allocation2 + $0x51] sm:$0xff]  ;;  %3325 = vst [vmem:[#allocation2 + $0x68] sm:$0xff] %v3293_v29  ;;  %v3180_v2 = vadd.f32 %v6666_v28, %v8489_v19  ;;  %v3389_v60 = vmul.f32 %v9587_v9, %v8619_v40 }
 0x331   : > { %9613 = vst [vmem:[#allocation80_spill] sm:$0xff] %v8621_v41  ;;  %v4056_v31 = vmul.f32 %v7975_v6, %v8621_v41  ;;  %v2959_v33 = vpop.f32.mrb[24].mxu0 }
 0x332   : > { %v3294_v54 = vmax.f32 %v3180_v2, 0.0  ;;  %v6667_v15 = vadd.f32 %v8547_v36, %v2959_v33  ;;  %v2961_v62 = vpop.f32.mrb[25].mxu0  ;;  %4669 = vmatmul.mubr.f32.gmra.mrb[52].mxu1 %v3389_v60 }
 0x333   : > { %6150 = vmatmul.mubr.f32.gmra.mrb[68].mxu0 %v4056_v31  ;;  %4673 = vmatprep.mubr.f32.mxu1 %v3292_v7  ;;  %v8629_v30 = vld [vmem:[#allocation2 + $0x59] sm:$0xff] }
 0x334   : > { %3326 = vst [vmem:[#allocation2 + $0x70] sm:$0xff] %v3294_v54  ;;  %v3185_v55 = vadd.f32 %v6667_v15, %v8496_v51  ;;  %6152 = vmatprep.mubr.f32.mxu0 %v8629_v30  ;;  %v8633_v28 = vld [vmem:[#allocation2 + $0x5f] sm:$0xff] }
 0x335   : > { %v2964_v19 = vpop.f32.mrb[26].mxu0 }
 0x336   : > { %v3295_v9 = vmax.f32 %v3185_v55, 0.0  ;;  %v6668_v41 = vadd.f32 %v8547_v36, %v2964_v19  ;;  %v2966_v2 = vpop.f32.mrb[27].mxu0  ;;  %4674 = vmatmul.mubr.f32.gmra.mrb[54].mxu1 %v8633_v28 }
 0x337   : > { %4678 = vmatprep.mubr.f32.mxu1 %v3293_v29  ;;  %v8637_v60 = vld [vmem:[#allocation2 + $0x67] sm:$0xff] }
 0x338   : > { %v8639_v7 = vld [vmem:[#allocation2 + $0x61] sm:$0xff]  ;;  %3327 = vst [vmem:[#allocation2 + $0x78] sm:$0xff] %v3295_v9  ;;  %v3190_v31 = vadd.f32 %v6668_v41, %v8494_v13  ;;  %v3391_v51 = vmul.f32 %v9588_v26, %v8637_v60 }
 0x339   : > { %9614 = vst [vmem:[#allocation81_spill] sm:$0xff] %v8639_v7  ;;  %v4058_v33 = vmul.f32 %v7991_v17, %v8639_v7  ;;  %v2969_v15 = vpop.f32.mrb[28].mxu0 }
 0x33a   : > { %v3296_v62 = vmax.f32 %v3190_v31, 0.0  ;;  %v6669_v55 = vadd.f32 %v8547_v36, %v2969_v15  ;;  %v2971_v19 = vpop.f32.mrb[29].mxu0  ;;  %4679 = vmatmul.mubr.f32.gmra.mrb[56].mxu1 %v3391_v51 }
 0x33b   : > { %6153 = vmatmul.mubr.f32.gmra.mrb[70].mxu0 %v4058_v33  ;;  %4683 = vmatprep.mubr.f32.mxu1 %v3294_v54  ;;  %v8647_v29 = vld [vmem:[#allocation2 + $0x69] sm:$0xff] }
 0x33c   : > { %3328 = vst [vmem:[#allocation2 + $0x80] sm:$0xff] %v3296_v62  ;;  %v3195_v2 = vadd.f32 %v6669_v55, %v8501_v8  ;;  %6155 = vmatprep.mubr.f32.mxu0 %v8647_v29  ;;  %v8651_v41 = vld [vmem:[#allocation2 + $0x6f] sm:$0xff] }
 0x33d   : > { %v2974_v13 = vpop.f32.mrb[30].mxu0 }
 0x33e   : > { %v3297_v26 = vmax.f32 %v3195_v2, 0.0  ;;  %v6670_v7 = vadd.f32 %v8547_v36, %v2974_v13  ;;  %v2976_v31 = vpop.f32.mrb[31].mxu0  ;;  %4684 = vmatmul.mubr.f32.gmra.mrb[58].mxu1 %v8651_v41 }
 0x33f   : > { %4688 = vmatprep.mubr.f32.mxu1 %v3295_v9  ;;  %v8655_v51 = vld [vmem:[#allocation2 + $0x77] sm:$0xff] }
 0x340   : > { %v8657_v54 = vld [vmem:[#allocation2 + $0x71] sm:$0xff]  ;;  %3329 = vst [vmem:[#allocation2 + $0x88] sm:$0xff] %v3297_v26  ;;  %v3200_v33 = vadd.f32 %v6670_v7, %v8499_v0  ;;  %v3393_v8 = vmul.f32 %v9589_v4, %v8655_v51 }
 0x341   : > { %9615 = vst [vmem:[#allocation82_spill] sm:$0xff] %v8657_v54  ;;  %v4060_v15 = vmul.f32 %v8007_v16, %v8657_v54  ;;  %v2979_v55 = vpop.f32.mrb[32].mxu0 }
 0x342   : > { %v3298_v19 = vmax.f32 %v3200_v33, 0.0  ;;  %v6671_v2 = vadd.f32 %v8547_v36, %v2979_v55  ;;  %v2981_v13 = vpop.f32.mrb[33].mxu0  ;;  %4689 = vmatmul.mubr.f32.gmra.mrb[60].mxu1 %v3393_v8 }
 0x343   : > { %6156 = vmatmul.mubr.f32.gmra.mrb[72].mxu0 %v4060_v15  ;;  %4693 = vmatprep.mubr.f32.mxu1 %v3296_v62  ;;  %v8665_v9 = vld [vmem:[#allocation2 + $0x79] sm:$0xff] }
 0x344   : > { %3330 = vst [vmem:[#allocation2 + $0x90] sm:$0xff] %v3298_v19  ;;  %v3205_v31 = vadd.f32 %v6671_v2, %v8506_v46  ;;  %6158 = vmatprep.mubr.f32.mxu0 %v8665_v9  ;;  %v8669_v7 = vld [vmem:[#allocation2 + $0x7f] sm:$0xff] }
 0x345   : > { %v2984_v0 = vpop.f32.mrb[34].mxu0 }
 0x346   : > { %v3299_v4 = vmax.f32 %v3205_v31, 0.0  ;;  %v6672_v54 = vadd.f32 %v8547_v36, %v2984_v0  ;;  %v2986_v33 = vpop.f32.mrb[35].mxu0  ;;  %4694 = vmatmul.mubr.f32.gmra.mrb[62].mxu1 %v8669_v7 }
 0x347   : > { %4698 = vmatprep.mubr.f32.mxu1 %v3297_v26  ;;  %v8673_v8 = vld [vmem:[#allocation2 + $0x87] sm:$0xff] }
 0x348   : > { %v8675_v62 = vld [vmem:[#allocation2 + $0x81] sm:$0xff]  ;;  %3331 = vst [vmem:[#allocation2 + $0x98] sm:$0xff] %v3299_v4  ;;  %v3210_v15 = vadd.f32 %v6672_v54, %v8504_v12  ;;  %v3395_v46 = vmul.f32 %v9590_v48, %v8673_v8 }
 0x349   : > { %9616 = vst [vmem:[#allocation83_spill] sm:$0xff] %v8675_v62  ;;  %v4062_v55 = vmul.f32 %v8025_v23, %v8675_v62  ;;  %v2989_v2 = vpop.f32.mrb[36].mxu0 }
 0x34a   : > { %v3300_v13 = vmax.f32 %v3210_v15, 0.0  ;;  %v6673_v31 = vadd.f32 %v8547_v36, %v2989_v2  ;;  %v2991_v0 = vpop.f32.mrb[37].mxu0  ;;  %4699 = vmatmul.mubr.f32.gmra.mrb[64].mxu1 %v3395_v46 }
 0x34b   : > { %6159 = vmatmul.mubr.f32.gmra.mrb[74].mxu0 %v4062_v55  ;;  %4703 = vmatprep.mubr.f32.mxu1 %v3298_v19  ;;  %v8683_v26 = vld [vmem:[#allocation2 + $0x89] sm:$0xff] }
 0x34c   : > { %3332 = vst [vmem:[#allocation2 + $0xa0] sm:$0xff] %v3300_v13  ;;  %v3215_v33 = vadd.f32 %v6673_v31, %v8511_v43  ;;  %6161 = vmatprep.mubr.f32.mxu0 %v8683_v26  ;;  %v8687_v54 = vld [vmem:[#allocation2 + $0x8f] sm:$0xff] }
 0x34d   : > { %v2994_v12 = vpop.f32.mrb[38].mxu0 }
 0x34e   : > { %v3301_v48 = vmax.f32 %v3215_v33, 0.0  ;;  %v6674_v62 = vadd.f32 %v8547_v36, %v2994_v12  ;;  %v2996_v15 = vpop.f32.mrb[39].mxu0  ;;  %4704 = vmatmul.mubr.f32.gmra.mrb[66].mxu1 %v8687_v54 }
 0x34f   : > { %4708 = vmatprep.mubr.f32.mxu1 %v3299_v4  ;;  %v8691_v46 = vld [vmem:[#allocation2 + $0x97] sm:$0xff] }
 0x350   : > { %v8693_v19 = vld [vmem:[#allocation2 + $0x91] sm:$0xff]  ;;  %3333 = vst [vmem:[#allocation2 + $0xa8] sm:$0xff] %v3301_v48  ;;  %v3220_v55 = vadd.f32 %v6674_v62, %v8509_v14  ;;  %v3397_v43 = vmul.f32 %v9591_v25, %v8691_v46 }
 0x351   : > { %9617 = vst [vmem:[#allocation84_spill] sm:$0xff] %v8693_v19  ;;  %v4064_v2 = vmul.f32 %v8041_v50, %v8693_v19  ;;  %v2999_v31 = vpop.f32.mrb[40].mxu0 }
 0x352   : > { %v3302_v0 = vmax.f32 %v3220_v55, 0.0  ;;  %v6675_v33 = vadd.f32 %v8547_v36, %v2999_v31  ;;  %v3001_v12 = vpop.f32.mrb[41].mxu0  ;;  %4709 = vmatmul.mubr.f32.gmra.mrb[68].mxu1 %v3397_v43 }
 0x353   : > { %6162 = vmatmul.mubr.f32.gmra.mrb[76].mxu0 %v4064_v2  ;;  %4713 = vmatprep.mubr.f32.mxu1 %v3300_v13  ;;  %v8701_v4 = vld [vmem:[#allocation2 + $0x99] sm:$0xff] }
 0x354   : > { %3334 = vst [vmem:[#allocation2 + $0xb0] sm:$0xff] %v3302_v0  ;;  %v3225_v15 = vadd.f32 %v6675_v33, %v8516_v20  ;;  %6164 = vmatprep.mubr.f32.mxu0 %v8701_v4  ;;  %v8705_v62 = vld [vmem:[#allocation2 + $0x9f] sm:$0xff] }
 0x355   : > { %v3004_v14 = vpop.f32.mrb[42].mxu0 }
 0x356   : > { %v3303_v25 = vmax.f32 %v3225_v15, 0.0  ;;  %v6676_v19 = vadd.f32 %v8547_v36, %v3004_v14  ;;  %v3006_v55 = vpop.f32.mrb[43].mxu0  ;;  %4714 = vmatmul.mubr.f32.gmra.mrb[70].mxu1 %v8705_v62 }
 0x357   : > { %4718 = vmatprep.mubr.f32.mxu1 %v3301_v48  ;;  %v8709_v43 = vld [vmem:[#allocation2 + $0xa7] sm:$0xff] }
 0x358   : > { %v8711_v13 = vld [vmem:[#allocation2 + $0xa1] sm:$0xff]  ;;  %3335 = vst [vmem:[#allocation2 + $0xb8] sm:$0xff] %v3303_v25  ;;  %v3230_v2 = vadd.f32 %v6676_v19, %v8514_v18  ;;  %v3399_v20 = vmul.f32 %v9592_v56, %v8709_v43 }
 0x359   : > { %9618 = vst [vmem:[#allocation85_spill] sm:$0xff] %v8711_v13  ;;  %v4066_v31 = vmul.f32 %v8057_v24, %v8711_v13  ;;  %v3009_v33 = vpop.f32.mrb[44].mxu0 }
 0x35a   : > { %v3304_v12 = vmax.f32 %v3230_v2, 0.0  ;;  %v6677_v15 = vadd.f32 %v8547_v36, %v3009_v33  ;;  %v3011_v14 = vpop.f32.mrb[45].mxu0  ;;  %4719 = vmatmul.mubr.f32.gmra.mrb[72].mxu1 %v3399_v20 }
 0x35b   : > { %6165 = vmatmul.mubr.f32.gmra.mrb[78].mxu0 %v4066_v31  ;;  %4723 = vmatprep.mubr.f32.mxu1 %v3302_v0  ;;  %v8719_v48 = vld [vmem:[#allocation2 + $0xa9] sm:$0xff] }
 0x35c   : > { %3336 = vst [vmem:[#allocation2 + $0xc0] sm:$0xff] %v3304_v12  ;;  %v3235_v55 = vadd.f32 %v6677_v15, %v8521_v10  ;;  %6167 = vmatprep.mubr.f32.mxu0 %v8719_v48  ;;  %v8723_v19 = vld [vmem:[#allocation2 + $0xaf] sm:$0xff] }
 0x35d   : > { %v3014_v18 = vpop.f32.mrb[46].mxu0 }
 0x35e   : > { %v3305_v56 = vmax.f32 %v3235_v55, 0.0  ;;  %v6678_v13 = vadd.f32 %v8547_v36, %v3014_v18  ;;  %v3016_v2 = vpop.f32.mrb[47].mxu0  ;;  %4724 = vmatmul.mubr.f32.gmra.mrb[74].mxu1 %v8723_v19 }
 0x35f   : > { %4728 = vmatprep.mubr.f32.mxu1 %v3303_v25  ;;  %v8727_v20 = vld [vmem:[#allocation2 + $0xb7] sm:$0xff] }
 0x360   : > { %v8729_v0 = vld [vmem:[#allocation2 + $0xb1] sm:$0xff]  ;;  %3337 = vst [vmem:[#allocation2 + $0xc8] sm:$0xff] %v3305_v56  ;;  %v3240_v31 = vadd.f32 %v6678_v13, %v8519_v34  ;;  %v3401_v10 = vmul.f32 %v9594_v42, %v8727_v20 }
 0x361   : > { %9619 = vst [vmem:[#allocation86_spill] sm:$0xff] %v8729_v0  ;;  %v4068_v33 = vmul.f32 %v8073_v21, %v8729_v0  ;;  %v3019_v15 = vpop.f32.mrb[48].mxu0 }
 0x362   : > { %v3306_v14 = vmax.f32 %v3240_v31, 0.0  ;;  %v6679_v55 = vadd.f32 %v8547_v36, %v3019_v15  ;;  %v3021_v18 = vpop.f32.mrb[49].mxu0  ;;  %4729 = vmatmul.mubr.f32.gmra.mrb[76].mxu1 %v3401_v10 }
 0x363   : > { %6168 = vmatmul.mubr.f32.gmra.mrb[80].mxu0 %v4068_v33  ;;  %4733 = vmatprep.mubr.f32.mxu1 %v3304_v12  ;;  %v8737_v25 = vld [vmem:[#allocation2 + $0xb9] sm:$0xff] }
 0x364   : > { %9620 = vst [vmem:[#allocation87_spill] sm:$0xff] %v8737_v25  ;;  %3338 = vst [vmem:[#allocation2 + $0xd0] sm:$0xff] %v3306_v14  ;;  %v3245_v2 = vadd.f32 %v6679_v55, %v8526_v57  ;;  %6170 = vmatprep.mubr.f32.mxu0 %v8737_v25  ;;  %v8741_v13 = vld [vmem:[#allocation2 + $0xbf] sm:$0xff] }
 0x365   : > { %v3024_v34 = vpop.f32.mrb[50].mxu0  ;;  %9621 = vst [vmem:[#allocation88_spill] sm:$0xff] %v8741_v13 }
 0x366   : > { %v3307_v42 = vmax.f32 %v3245_v2, 0.0  ;;  %v6680_v0 = vadd.f32 %v8547_v36, %v3024_v34  ;;  %v3026_v31 = vpop.f32.mrb[51].mxu0  ;;  %4734 = vmatmul.mubr.f32.gmra.mrb[78].mxu1 %v8741_v13 }
 0x367   : > { %4738 = vmatprep.mubr.f32.mxu1 %v3305_v56  ;;  %v8745_v10 = vld [vmem:[#allocation2 + $0xc7] sm:$0xff]  ;;  %v9625_v31 = vld [vmem:[#allocation74_spill] sm:$0xff] }
 0x368   : > { %9622 = vst [vmem:[#allocation89_spill] sm:$0xff] %v8745_v10  ;;  %v8747_v12 = vld [vmem:[#allocation2 + $0xc1] sm:$0xff]  ;;  %3339 = vst [vmem:[#allocation2 + $0xd8] sm:$0xff] %v3307_v42  ;;  %v3250_v33 = vadd.f32 %v6680_v0, %v8524_v1  ;;  %v3403_v57 = vmul.f32 %v9597_v11, %v8745_v10 }
 0x369   : > { %9623 = vst [vmem:[#allocation90_spill] sm:$0xff] %v8747_v12  ;;  %v4070_v15 = vmul.f32 %v8088_v53, %v8747_v12  ;;  %v3029_v55 = vpop.f32.mrb[52].mxu0 }
 0x36a   : > { %v3308_v18 = vmax.f32 %v3250_v33, 0.0  ;;  %v6681_v2 = vadd.f32 %v8547_v36, %v3029_v55  ;;  %v3031_v34 = vpop.f32.mrb[53].mxu0  ;;  %4739 = vmatmul.mubr.f32.gmra.mrb[80].mxu1 %v3403_v57 }
 0x36b   : > { %6171 = vmatmul.mubr.f32.gmra.mrb[82].mxu0 %v4070_v15  ;;  %4743 = vmatprep.mubr.f32.mxu1 %v3306_v14  ;;  %v8755_v56 = vld [vmem:[#allocation2 + $0xc9] sm:$0xff] }
 0x36c   : > { %9624 = vst [vmem:[#allocation91_spill] sm:$0xff] %v8755_v56  ;;  %3340 = vst [vmem:[#allocation2 + $0xe0] sm:$0xff] %v3308_v18  ;;  %v3255_v25 = vadd.f32 %v6681_v2, %v9625_v31  ;;  %6173 = vmatprep.mubr.f32.mxu0 %v8755_v56  ;;  %v8759_v0 = vld [vmem:[#allocation2 + $0xcf] sm:$0xff]  ;;  %v9630_v2 = vld [vmem:[#allocation56_spill] sm:$0xff] }
 0x36d   : > { %v3034_v1 = vpop.f32.mrb[54].mxu0  ;;  %9626 = vst [vmem:[#allocation74_spill] sm:$0xff] %v8759_v0  ;;  %v9629_v15 = vld [vmem:[#allocation73_spill] sm:$0xff]  ;;  %v9631_v31 = vld [vmem:[#allocation59_spill] sm:$0xff] }
 0x36e   : > { %v3309_v11 = vmax.f32 %v3255_v25, 0.0  ;;  %v6682_v12 = vadd.f32 %v8547_v36, %v3034_v1  ;;  %v3036_v33 = vpop.f32.mrb[55].mxu0  ;;  %4744 = vmatmul.mubr.f32.gmra.mrb[82].mxu1 %v8759_v0  ;;  %v9633_v0 = vld [vmem:[#allocation76_spill] sm:$0xff] }
 0x36f   : > { %4748 = vmatprep.mubr.f32.mxu1 %v3307_v42  ;;  %v8763_v57 = vld [vmem:[#allocation2 + $0xd7] sm:$0xff] }
 0x370   : > { %9627 = vst [vmem:[#allocation92_spill] sm:$0xff] %v8763_v57  ;;  %v8765_v14 = vld [vmem:[#allocation2 + $0xd1] sm:$0xff]  ;;  %3341 = vst [vmem:[#allocation2 + $0xe8] sm:$0xff] %v3309_v11  ;;  %v3260_v55 = vadd.f32 %v6682_v12, %v9629_v15  ;;  %v3405_v34 = vmul.f32 %v9630_v2, %v8763_v57 }
 0x371   : > { %9628 = vst [vmem:[#allocation93_spill] sm:$0xff] %v8765_v14  ;;  %v4072_v56 = vmul.f32 %v9631_v31, %v8765_v14  ;;  %v3039_v25 = vpop.f32.mrb[56].mxu0 }
 0x372   : > { %v3310_v10 = vmax.f32 %v3260_v55, 0.0  ;;  %v6683_v1 = vadd.f32 %v8547_v36, %v3039_v25  ;;  %v3041_v33 = vpop.f32.mrb[57].mxu0  ;;  %4749 = vmatmul.mubr.f32.gmra.mrb[84].mxu1 %v3405_v34 }
 0x373   : > { %6174 = vmatmul.mubr.f32.gmra.mrb[84].mxu0 %v4072_v56  ;;  %4753 = vmatprep.mubr.f32.mxu1 %v3308_v18  ;;  %v8773_v42 = vld [vmem:[#allocation2 + $0xd9] sm:$0xff] }
 0x374   : > { %9632 = vst [vmem:[#allocation73_spill] sm:$0xff] %v8773_v42  ;;  %3342 = vst [vmem:[#allocation2 + $0xf0] sm:$0xff] %v3310_v10  ;;  %v3265_v13 = vadd.f32 %v6683_v1, %v9633_v0  ;;  %6176 = vmatprep.mubr.f32.mxu0 %v8773_v42  ;;  %v8777_v15 = vld [vmem:[#allocation2 + $0xdf] sm:$0xff]  ;;  %v9637_v0 = vld [vmem:[#allocation57_spill] sm:$0xff] }
 0x375   : > { %v3044_v12 = vpop.f32.mrb[58].mxu0  ;;  %9634 = vst [vmem:[#allocation76_spill] sm:$0xff] %v8777_v15  ;;  %v9636_v56 = vld [vmem:[#allocation75_spill] sm:$0xff]  ;;  %v9638_v33 = vld [vmem:[#allocation60_spill] sm:$0xff] }
 0x376   : > { %v3311_v2 = vmax.f32 %v3265_v13, 0.0  ;;  %v6684_v14 = vadd.f32 %v8547_v36, %v3044_v12  ;;  %v3046_v55 = vpop.f32.mrb[59].mxu0  ;;  %4754 = vmatmul.mubr.f32.gmra.mrb[86].mxu1 %v8777_v15 }
 0x377   : > { %4758 = vmatprep.mubr.f32.mxu1 %v3309_v11  ;;  %v8781_v34 = vld [vmem:[#allocation2 + $0xe7] sm:$0xff]  ;;  %v9639_v11 = vld [vmem:[#allocation78_spill] sm:$0xff] }
 0x378   : > { %v8783_v18 = vld [vmem:[#allocation2 + $0xe1] sm:$0xff]  ;;  %3343 = vst [vmem:[#allocation2 + $0xf8] sm:$0xff] %v3311_v2  ;;  %v3270_v25 = vadd.f32 %v6684_v14, %v9636_v56  ;;  %v3407_v1 = vmul.f32 %v9637_v0, %v8781_v34 }
 0x379   : > { %9635 = vst [vmem:[#allocation94_spill] sm:$0xff] %v8783_v18  ;;  %v4074_v42 = vmul.f32 %v9638_v33, %v8783_v18  ;;  %v3049_v13 = vpop.f32.mrb[60].mxu0 }
 0x37a   : > { %v3312_v57 = vmax.f32 %v3270_v25, 0.0  ;;  %v6685_v12 = vadd.f32 %v8547_v36, %v3049_v13  ;;  %v3051_v55 = vpop.f32.mrb[61].mxu0  ;;  %4759 = vmatmul.mubr.f32.gmra.mrb[88].mxu1 %v3407_v1  ;;  %v9643_v1 = vld [vmem:[#allocation58_spill] sm:$0xff] }
 0x37b   : > { %6177 = vmatmul.mubr.f32.gmra.mrb[86].mxu0 %v4074_v42  ;;  %4763 = vmatprep.mubr.f32.mxu1 %v3310_v10  ;;  %v8794_v14 = vld [vmem:[#allocation2 + $0xef] sm:$0xff] }
 0x37c   : > { %3344 = vst [vmem:[#allocation2 + $0x100] sm:$0xff] %v3312_v57  ;;  %v8792_v15 = vadd.f32 %v6685_v12, %v9639_v11  ;;  %v9641_v10 = vld [vmem:[#allocation77_spill] sm:$0xff] }
 0x37d   : > { %v3054_v31 = vpop.f32.mrb[62].mxu0 }
 0x37e   : > { %9640 = vst [vmem:[#allocation75_spill] sm:$0xff] %v8792_v15  ;;  %v9512_v56 = vmax.f32 %v8792_v15, 0.0  ;;  %v6686_v0 = vadd.f32 %v8547_v36, %v3054_v31  ;;  %v3056_v18 = vpop.f32.mrb[63].mxu0  ;;  %4764 = vmatmul.mubr.f32.gmra.mrb[90].mxu1 %v8794_v14  ;;  %v4467_v36 = vld [vmem:[#allocation9 + $0x200] sm:$0xff] }
 0x37f   : > { %4768 = vmatprep.mubr.f32.mxu1 %v3311_v2  ;;  %v8799_v25 = vld [vmem:[#allocation2 + $0xf7] sm:$0xff]  ;;  %v9644_v18 = vld [vmem:[#allocation44_spill] sm:$0xff] }
 0x380   : > { %3345 = vst [vmem:[#allocation2 + $0x108] sm:$0xff] %v9512_v56  ;;  %v8804_v42 = vadd.f32 %v6686_v0, %v9641_v10  ;;  %v3409_v13 = vmul.f32 %v9643_v1, %v8799_v25  ;;  %v4468_v2 = vld [vmem:[#allocation9 + $0x208] sm:$0xff]  ;;  %v3635_v55 = vmul.f32 %v9644_v18, %v8558_v38  ;;  %v3507_v0 = vld [vmem:[#allocation2 + $0x9] sm:$0xff]  ;;  %v4469_v10 = vld [vmem:[#allocation9 + $0x210] sm:$0xff]  ;;  %v3637_v38 = vmul.f32 %v7733_v58, %v8569_v47 }
 0x381   : > { %v6512_v11 = vpack.c.bf16 %v4468_v2, %v4467_v36  ;;  %v4470_v56 = vld [vmem:[#allocation9 + $0x218] sm:$0xff]  ;;  %v3508_v15 = vld [vmem:[#allocation2 + $0x11] sm:$0xff]  ;;  %v4473_v2 = vld [vmem:[#allocation9 + $0x230] sm:$0xff] }
 0x382   : > { %9642 = vst [vmem:[#allocation60_spill] sm:$0xff] %v8804_v42  ;;  %v9514_v12 = vmax.f32 %v8804_v42, 0.0  ;;  %4769 = vmatmul.mubr.f32.gmra.mrb[92].mxu1 %v3409_v13  ;;  %v3540_v13 = vmul.f32 %v7948_v35, %v3508_v15  ;;  %v4472_v42 = vld [vmem:[#allocation9 + $0x228] sm:$0xff] }
 0x383   : > { %4773 = vmatprep.mubr.f32.mxu1 %v3312_v57  ;;  %v8811_v31 = vld [vmem:[#allocation2 + $0xff] sm:$0xff]  ;;  %v6515_v57 = vpack.c.bf16 %v4470_v56, %v4469_v10 }
 0x384   : > { %3346 = vst [vmem:[#allocation2 + $0x110] sm:$0xff] %v9514_v12  ;;  %v4471_v12 = vld [vmem:[#allocation9 + $0x220] sm:$0xff]  ;;  %v8824_v56 = vld [vmem:[#allocation2 + $0x21] sm:$0xff] }
 0x385   : > { %v6518_v36 = vpack.c.bf16 %v4472_v42, %v4471_v12  ;;  %v3542_v47 = vmul.f32 %v7959_v22, %v8824_v56  ;;  %v4475_v42 = vld [vmem:[#allocation9 + $0x240] sm:$0xff]  ;;  %v4476_v12 = vld [vmem:[#allocation9 + $0x248] sm:$0xff]  ;;  %v4477_v10 = vld [vmem:[#allocation9 + $0x250] sm:$0xff] }
 0x386   : > { %4774 = vmatmul.mubr.f32.gmra.mrb[94].mxu1 %v8811_v31 }
 0x387   : > { %4843 = vmatprep.mubr.f32.mxu1 %v3635_v55  ;;  %v4474_v55 = vld [vmem:[#allocation9 + $0x238] sm:$0xff] }
 0x388   : > { %v6521_v15 = vpack.c.bf16 %v4474_v55, %v4473_v2  ;;  %v9645_v55 = vld [vmem:[#allocation79_spill] sm:$0xff] }
 0x38a   : > { %4844 = vmatmul.mubr.f32.vlgmr.msra.gmra.mrb[32].mxu1 %v3507_v0  ;;  %v3639_v0 = vmul.f32 %v9584_v27, %v8583_v3  ;;  %v4479_v3 = vld [vmem:[#allocation9 + $0x260] sm:$0xff] }
 0x38b   : > { %4848 = vmatprep.mubr.f32.mxu1 %v8565_v37  ;;  %6513 = vmatpush1.bf16.msra.mxu1 %v6512_v11  ;;  %v8822_v37 = vld [vmem:[#allocation2 + $0x19] sm:$0xff]  ;;  %v6524_v11 = vpack.c.bf16 %v4476_v12, %v4475_v42 }
 0x38c   : > { %6514 = vmatprep.subr.bf16.mxu1 %v9575_v61  ;;  %v9646_v42 = vld [vmem:[#allocation47_spill] sm:$0xff] }
 0x38d   : > { %v3643_v12 = vmul.f32 %v9646_v42, %v8619_v40  ;;  %v4487_v40 = vld [vmem:[#allocation9 + $0x2a0] sm:$0xff] }
 0x38e   : > { %4849 = vmatmul.mubr.f32.gmra.mrb[34].mxu1 %v3540_v13  ;;  %v3544_v13 = vmul.f32 %v7975_v6, %v8585_v59 }
 0x38f   : > { %4853 = vmatprep.mubr.f32.mxu1 %v3637_v38  ;;  %6516 = vmatpush1.bf16.msra.mxu1 %v6515_v57  ;;  %v4480_v38 = vld [vmem:[#allocation9 + $0x268] sm:$0xff] }
 0x390   : > { %6517 = vmatprep.subr.bf16.mxu1 %v9575_v61  ;;  %v6530_v2 = vpack.c.bf16 %v4480_v38, %v4479_v3 }
 0x392   : > { %4854 = vmatmul.mubr.f32.gmra.mrb[36].mxu1 %v8822_v37 }
 0x393   : > { %4858 = vmatprep.mubr.f32.mxu1 %v8579_v44  ;;  %6519 = vmatpush1.bf16.msra.mxu1 %v6518_v36  ;;  %v4478_v44 = vld [vmem:[#allocation9 + $0x258] sm:$0xff]  ;;  %v3641_v36 = vmul.f32 %v9585_v5, %v8601_v63  ;;  %v4483_v63 = vld [vmem:[#allocation9 + $0x280] sm:$0xff] }
 0x394   : > { %6520 = vmatprep.subr.bf16.mxu1 %v9575_v61  ;;  %v6527_v57 = vpack.c.bf16 %v4478_v44, %v4477_v10  ;;  %v9647_v10 = vld [vmem:[#allocation80_spill] sm:$0xff] }
 0x395   : > { %v3548_v44 = vmul.f32 %v8007_v16, %v9647_v10 }
 0x396   : > { %4859 = vmatmul.mubr.f32.gmra.mrb[38].mxu1 %v3542_v47  ;;  %v4484_v47 = vld [vmem:[#allocation9 + $0x288] sm:$0xff] }
 0x397   : > { %4863 = vmatprep.mubr.f32.mxu1 %v3639_v0  ;;  %6522 = vmatpush1.bf16.msra.mxu1 %v6521_v15  ;;  %v3546_v15 = vmul.f32 %v7991_v17, %v9645_v55  ;;  %v6536_v0 = vpack.c.bf16 %v4484_v47, %v4483_v63  ;;  %v9651_v47 = vld [vmem:[#allocation82_spill] sm:$0xff] }
 0x398   : > { %6523 = vmatprep.subr.bf16.mxu1 %v9575_v61 }
 0x39a   : > { %4864 = vmatmul.mubr.f32.gmra.mrb[40].mxu1 %v8575_v45  ;;  %v4481_v45 = vld [vmem:[#allocation9 + $0x270] sm:$0xff] }
 0x39b   : > { %4868 = vmatprep.mubr.f32.mxu1 %v8597_v32  ;;  %6525 = vmatpush1.bf16.msra.mxu1 %v6524_v11  ;;  %v4482_v32 = vld [vmem:[#allocation9 + $0x278] sm:$0xff] }
 0x39c   : > { %6526 = vmatprep.subr.bf16.mxu1 %v9575_v61  ;;  %v6533_v59 = vpack.c.bf16 %v4482_v32, %v4481_v45  ;;  %v4492_v32 = vld [vmem:[#allocation9 + $0x2c8] sm:$0xff] }
 0x39e   : > { %4869 = vmatmul.mubr.f32.gmra.mrb[42].mxu1 %v3544_v13  ;;  %v9648_v13 = vld [vmem:[#allocation48_spill] sm:$0xff] }
 0x39f   : > { %4873 = vmatprep.mubr.f32.mxu1 %v3641_v36  ;;  %6528 = vmatpush1.bf16.msra.mxu1 %v6527_v57  ;;  %v4488_v57 = vld [vmem:[#allocation9 + $0x2a8] sm:$0xff]  ;;  %v3645_v3 = vmul.f32 %v9648_v13, %v8637_v60  ;;  %v4491_v60 = vld [vmem:[#allocation9 + $0x2c0] sm:$0xff] }
 0x3a0   : > { %6529 = vmatprep.subr.bf16.mxu1 %v9575_v61  ;;  %v6542_v38 = vpack.c.bf16 %v4488_v57, %v4487_v40 }
 0x3a2   : > { %4874 = vmatmul.mubr.f32.gmra.mrb[44].mxu1 %v8593_v52  ;;  %v4485_v52 = vld [vmem:[#allocation9 + $0x290] sm:$0xff] }
 0x3a3   : > { %4878 = vmatprep.mubr.f32.mxu1 %v8615_v39  ;;  %6531 = vmatpush1.bf16.msra.mxu1 %v6530_v2  ;;  %v4486_v39 = vld [vmem:[#allocation9 + $0x298] sm:$0xff] }
 0x3a4   : > { %6532 = vmatprep.subr.bf16.mxu1 %v9575_v61  ;;  %v6539_v11 = vpack.c.bf16 %v4486_v39, %v4485_v52  ;;  %v9649_v2 = vld [vmem:[#allocation81_spill] sm:$0xff]  ;;  %v9652_v52 = vld [vmem:[#allocation50_spill] sm:$0xff] }
 0x3a5   : > { %v3550_v45 = vmul.f32 %v8025_v23, %v9649_v2  ;;  %v3649_v39 = vmul.f32 %v9652_v52, %v8673_v8  ;;  %v9654_v8 = vld [vmem:[#allocation51_spill] sm:$0xff] }
 0x3a6   : > { %4879 = vmatmul.mubr.f32.gmra.mrb[46].mxu1 %v3546_v15  ;;  %v6548_v15 = vpack.c.bf16 %v4492_v32, %v4491_v60  ;;  %v3651_v57 = vmul.f32 %v9654_v8, %v8691_v46  ;;  %v9657_v46 = vld [vmem:[#allocation85_spill] sm:$0xff]  ;;  %v9663_v60 = vld [vmem:[#allocation54_spill] sm:$0xff] }
 0x3a7   : > { %4883 = vmatprep.mubr.f32.mxu1 %v3643_v12  ;;  %6534 = vmatpush1.bf16.msra.mxu1 %v6533_v59  ;;  %v9650_v59 = vld [vmem:[#allocation49_spill] sm:$0xff]  ;;  %v3552_v12 = vmul.f32 %v8041_v50, %v9651_v47  ;;  %v9665_v32 = vld [vmem:[#allocation74_spill] sm:$0xff] }
 0x3a8   : > { %6535 = vmatprep.subr.bf16.mxu1 %v9575_v61  ;;  %v3647_v55 = vmul.f32 %v9650_v59, %v8655_v51  ;;  %v4495_v51 = vld [vmem:[#allocation9 + $0x2e0] sm:$0xff]  ;;  %v9671_v47 = vld [vmem:[#allocation93_spill] sm:$0xff] }
 0x3aa   : > { %4884 = vmatmul.mubr.f32.gmra.mrb[48].mxu1 %v8611_v49  ;;  %v4489_v49 = vld [vmem:[#allocation9 + $0x2b0] sm:$0xff] }
 0x3ab   : > { %4888 = vmatprep.mubr.f32.mxu1 %v8633_v28  ;;  %6537 = vmatpush1.bf16.msra.mxu1 %v6536_v0  ;;  %v4490_v28 = vld [vmem:[#allocation9 + $0x2b8] sm:$0xff]  ;;  %v4496_v0 = vld [vmem:[#allocation9 + $0x2e8] sm:$0xff] }
 0x3ac   : > { %6538 = vmatprep.subr.bf16.mxu1 %v9575_v61  ;;  %v6545_v36 = vpack.c.bf16 %v4490_v28, %v4489_v49  ;;  %v3558_v49 = vmul.f32 %v8088_v53, %v9657_v46  ;;  %v9658_v28 = vld [vmem:[#allocation53_spill] sm:$0xff] }
 0x3ae   : > { %4889 = vmatmul.mubr.f32.gmra.mrb[50].mxu1 %v3548_v44  ;;  %v9653_v44 = vld [vmem:[#allocation83_spill] sm:$0xff] }
 0x3af   : > { %4893 = vmatprep.mubr.f32.mxu1 %v3645_v3  ;;  %6540 = vmatpush1.bf16.msra.mxu1 %v6539_v11  ;;  %v6554_v11 = vpack.c.bf16 %v4496_v0, %v4495_v51  ;;  %v3554_v40 = vmul.f32 %v8057_v24, %v9653_v44  ;;  %v9656_v3 = vld [vmem:[#allocation52_spill] sm:$0xff] }
 0x3b0   : > { %6541 = vmatprep.subr.bf16.mxu1 %v9575_v61  ;;  %v9673_v0 = vld [vmem:[#allocation56_spill] sm:$0xff] }
 0x3b2   : > { %4894 = vmatmul.mubr.f32.gmra.mrb[52].mxu1 %v8629_v30  ;;  %v4493_v30 = vld [vmem:[#allocation9 + $0x2d0] sm:$0xff] }
 0x3b3   : > { %4898 = vmatprep.mubr.f32.mxu1 %v8651_v41  ;;  %6543 = vmatpush1.bf16.msra.mxu1 %v6542_v38  ;;  %v4494_v41 = vld [vmem:[#allocation9 + $0x2d8] sm:$0xff]  ;;  %v3653_v38 = vmul.f32 %v9656_v3, %v8709_v43  ;;  %v9661_v43 = vld [vmem:[#allocation59_spill] sm:$0xff] }
 0x3b4   : > { %6544 = vmatprep.subr.bf16.mxu1 %v9575_v61  ;;  %v6551_v63 = vpack.c.bf16 %v4494_v41, %v4493_v30  ;;  %v9668_v30 = vld [vmem:[#allocation55_spill] sm:$0xff] }
 0x3b5   : > { %v9669_v41 = vld [vmem:[#allocation91_spill] sm:$0xff] }
 0x3b6   : > { %4899 = vmatmul.mubr.f32.gmra.mrb[54].mxu1 %v3550_v45  ;;  %v9662_v45 = vld [vmem:[#allocation89_spill] sm:$0xff] }
 0x3b7   : > { %4903 = vmatprep.mubr.f32.mxu1 %v3647_v55  ;;  %6546 = vmatpush1.bf16.msra.mxu1 %v6545_v36  ;;  %v9660_v36 = vld [vmem:[#allocation86_spill] sm:$0xff] }
 0x3b8   : > { %6547 = vmatprep.subr.bf16.mxu1 %v9575_v61  ;;  %v3560_v2 = vmul.f32 %v9661_v43, %v9660_v36  ;;  %v9666_v55 = vld [vmem:[#allocation90_spill] sm:$0xff]  ;;  %v8940_v36 = vld [vmem:[#allocation2 + $0x101] sm:$0xff] }
 0x3ba   : > { %4904 = vmatmul.mubr.f32.gmra.mrb[56].mxu1 %v8647_v29  ;;  %v4497_v29 = vld [vmem:[#allocation9 + $0x2f0] sm:$0xff] }
 0x3bb   : > { %4908 = vmatprep.mubr.f32.mxu1 %v8669_v7  ;;  %6549 = vmatpush1.bf16.msra.mxu1 %v6548_v15  ;;  %v4498_v7 = vld [vmem:[#allocation9 + $0x2f8] sm:$0xff]  ;;  %v9667_v15 = vld [vmem:[#allocation92_spill] sm:$0xff] }
 0x3bc   : > { %6550 = vmatprep.subr.bf16.mxu1 %v9575_v61  ;;  %v6557_v10 = vpack.c.bf16 %v4498_v7, %v4497_v29  ;;  %v9675_v29 = vld [vmem:[#allocation94_spill] sm:$0xff] }
 0x3bd   : > { %v9676_v7 = vld [vmem:[#allocation62_spill] sm:$0xff] }
 0x3be   : > { %4909 = vmatmul.mubr.f32.gmra.mrb[58].mxu1 %v3552_v12  ;;  %v9672_v12 = vld [vmem:[#allocation61_spill] sm:$0xff] }
 0x3bf   : > { %4913 = vmatprep.mubr.f32.mxu1 %v3649_v39  ;;  %6552 = vmatpush1.bf16.msra.mxu1 %v6551_v63  ;;  %v9670_v63 = vld [vmem:[#allocation76_spill] sm:$0xff]  ;;  %v3564_v51 = vmul.f32 %v9672_v12, %v9671_v47  ;;  %v3661_v39 = vmul.f32 %v9673_v0, %v8781_v34  ;;  %v8924_v34 = vld [vmem:[#allocation2 + $0xf1] sm:$0xff] }
 0x3c0   : > { %6553 = vmatprep.subr.bf16.mxu1 %v9575_v61 }
 0x3c2   : > { %4914 = vmatmul.mubr.f32.gmra.mrb[60].mxu1 %v8665_v9  ;;  %v9655_v9 = vld [vmem:[#allocation84_spill] sm:$0xff] }
 0x3c3   : > { %4918 = vmatprep.mubr.f32.mxu1 %v8687_v54  ;;  %6555 = vmatpush1.bf16.msra.mxu1 %v6554_v11  ;;  %v3556_v54 = vmul.f32 %v8073_v21, %v9655_v9  ;;  %v9674_v11 = vld [vmem:[#allocation73_spill] sm:$0xff] }
 0x3c4   : > { %6556 = vmatprep.subr.bf16.mxu1 %v9575_v61 }
 0x3c6   : > { %4919 = vmatmul.mubr.f32.gmra.mrb[62].mxu1 %v3554_v40  ;;  %v9678_v40 = vld [vmem:[#allocation57_spill] sm:$0xff] }
 0x3c7   : > { %4923 = vmatprep.mubr.f32.mxu1 %v3651_v57  ;;  %6558 = vmatpush1.bf16.msra.mxu1 %v6557_v10  ;;  %v3566_v10 = vmul.f32 %v9676_v7, %v9675_v29  ;;  %v3663_v57 = vmul.f32 %v9678_v40, %v8799_v25 }
 0x3c8   : > { %6559 = vmatprep.subr.bf16.mxu1 %v9575_v61 }
 0x3ca   : > { %4924 = vmatmul.mubr.f32.gmra.mrb[64].mxu1 %v8683_v26  ;;  %v3655_v26 = vmul.f32 %v9658_v28, %v8727_v20  ;;  %v3562_v20 = vmul.f32 %v9638_v33, %v9666_v55 }
 0x3cb   : > { %4928 = vmatprep.mubr.f32.mxu1 %v8705_v62  ;;  %v9659_v62 = vld [vmem:[#allocation88_spill] sm:$0xff] }
 0x3ce   : > { %4929 = vmatmul.mubr.f32.gmra.mrb[66].mxu1 %v3556_v54  ;;  %v8922_v54 = vld [vmem:[#allocation2 + $0xe9] sm:$0xff] }
 0x3cf   : > { %4933 = vmatprep.mubr.f32.mxu1 %v3653_v38  ;;  %v8927_v38 = vld [vmem:[#allocation2 + $0x107] sm:$0xff] }
 0x3d0   : > { %v3665_v25 = vmul.f32 %v9643_v1, %v8927_v38 }
 0x3d2   : > { %4934 = vmatmul.mubr.f32.gmra.mrb[68].mxu1 %v8701_v4  ;;  %v3657_v4 = vmul.f32 %v9663_v60, %v9662_v45 }
 0x3d3   : > { %4938 = vmatprep.mubr.f32.mxu1 %v8723_v19  ;;  %v9664_v19 = vld [vmem:[#allocation87_spill] sm:$0xff] }
 0x3d6   : > { %4939 = vmatmul.mubr.f32.gmra.mrb[70].mxu1 %v3558_v49 }
 0x3d7   : > { %4943 = vmatprep.mubr.f32.mxu1 %v3655_v26 }
 0x3da   : > { %4944 = vmatmul.mubr.f32.gmra.mrb[72].mxu1 %v8719_v48  ;;  %v3659_v48 = vmul.f32 %v9668_v30, %v9667_v15 }
 0x3db   : > { %4948 = vmatprep.mubr.f32.mxu1 %v9659_v62  ;;  %v8938_v62 = vld [vmem:[#allocation2 + $0xf9] sm:$0xff] }
 0x3de   : > { %4949 = vmatmul.mubr.f32.gmra.mrb[74].mxu1 %v3560_v2  ;;  %v8943_v2 = vld [vmem:[#allocation2 + $0x10f] sm:$0xff] }
 0x3df   : > { %4953 = vmatprep.mubr.f32.mxu1 %v3657_v4  ;;  %v4499_v4 = vld [vmem:[#allocation9 + $0x300] sm:$0xff] }
 0x3e2   : > { %4954 = vmatmul.mubr.f32.gmra.mrb[76].mxu1 %v9664_v19  ;;  %v4500_v19 = vld [vmem:[#allocation9 + $0x308] sm:$0xff] }
 0x3e3   : > { %4958 = vmatprep.mubr.f32.mxu1 %v9665_v32  ;;  %v6560_v15 = vpack.c.bf16 %v4500_v19, %v4499_v4  ;;  %v3765_v4 = vld [vmem:[#allocation2 + $0x29] sm:$0xff]  ;;  %v3766_v19 = vld [vmem:[#allocation2 + $0x31] sm:$0xff] }
 0x3e6   : > { %4959 = vmatmul.mubr.f32.gmra.mrb[78].mxu1 %v3562_v20 }
 0x3e7   : > { %4963 = vmatprep.mubr.f32.mxu1 %v3659_v48  ;;  %v4501_v48 = vld [vmem:[#allocation9 + $0x310] sm:$0xff] }
 0x3ea   : > { %4964 = vmatmul.mubr.f32.gmra.mrb[80].mxu1 %v9669_v41 }
 0x3eb   : > { %4968 = vmatprep.mubr.f32.mxu1 %v9670_v63  ;;  %v4502_v63 = vld [vmem:[#allocation9 + $0x318] sm:$0xff] }
 0x3ee   : > { %4969 = vmatmul.mubr.f32.gmra.mrb[82].mxu1 %v3564_v51  ;;  %v3699_v51 = vld [vmem:[#allocation2 + $0x18] sm:$0xff] }
 0x3ef   : > { %4973 = vmatprep.mubr.f32.mxu1 %v3661_v39  ;;  %v3796_v39 = vmul.f32 %v7948_v35, %v8824_v56  ;;  %v4505_v35 = vld [vmem:[#allocation9 + $0x330] sm:$0xff]  ;;  %v4506_v56 = vld [vmem:[#allocation9 + $0x338] sm:$0xff] }
 0x3f2   : > { %4974 = vmatmul.mubr.f32.gmra.mrb[84].mxu1 %v9674_v11 }
 0x3f3   : > { %4978 = vmatprep.mubr.f32.mxu1 %v8794_v14  ;;  %v9680_v14 = vld [vmem:[#allocation63_spill] sm:$0xff] }
 0x3f4   : > { %v3568_v46 = vmul.f32 %v9680_v14, %v8924_v34 }
 0x3f6   : > { %v8916_v44 = vpop.f32.mrb[64].mxu0  ;;  %4979 = vmatmul.mubr.f32.gmra.mrb[86].mxu1 %v3566_v10  ;;  %v6563_v10 = vpack.c.bf16 %v4502_v63, %v4501_v48  ;;  %v3798_v48 = vmul.f32 %v7959_v22, %v3766_v19  ;;  %v6569_v63 = vpack.c.bf16 %v4506_v56, %v4505_v35  ;;  %v4510_v19 = vld [vmem:[#allocation9 + $0x358] sm:$0xff]  ;;  %v8974_v35 = vld [vmem:[#allocation2 + $0x38] sm:$0xff] }
 0x3f7   : > { %9677 = vst [vmem:[#allocation78_spill] sm:$0xff] %v8916_v44  ;;  %v8920_v9 = vpop.f32.mrb[65].mxu0  ;;  %4983 = vmatprep.mubr.f32.mxu1 %v3663_v57  ;;  %v4503_v57 = vld [vmem:[#allocation9 + $0x320] sm:$0xff]  ;;  %v9708_v44 = vld [vmem:[#allocation60_spill] sm:$0xff] }
 0x3f8   : > { %9679 = vst [vmem:[#allocation77_spill] sm:$0xff] %v8920_v9 }
 0x3fa   : > { %4984 = vmatmul.mubr.f32.gmra.mrb[88].mxu1 %v8922_v54 }
 0x3fb   : > { %4988 = vmatprep.mubr.f32.mxu1 %v8811_v31  ;;  %v9683_v31 = vld [vmem:[#allocation64_spill] sm:$0xff] }
 0x3fc   : > { %v3570_v45 = vmul.f32 %v9683_v31, %v8940_v36 }
 0x3fe   : > { %v8932_v49 = vpop.f32.mrb[66].mxu0  ;;  %4989 = vmatmul.mubr.f32.gmra.mrb[90].mxu1 %v3568_v46  ;;  %v4504_v46 = vld [vmem:[#allocation9 + $0x328] sm:$0xff] }
 0x3ff   : > { %9681 = vst [vmem:[#allocation58_spill] sm:$0xff] %v8932_v49  ;;  %v8936_v26 = vpop.f32.mrb[67].mxu0  ;;  %4993 = vmatprep.mubr.f32.mxu1 %v3665_v25  ;;  %v3776_v49 = vld [vmem:[#allocation2 + $0x81] sm:$0xff] }
 0x400   : > { %9682 = vst [vmem:[#allocation44_spill] sm:$0xff] %v8936_v26  ;;  %v3778_v26 = vld [vmem:[#allocation2 + $0x91] sm:$0xff] }
 0x402   : > { %4994 = vmatmul.mubr.f32.gmra.mrb[92].mxu1 %v8938_v62 }
 0x403   : > { %4998 = vmatprep.mubr.f32.mxu1 %v8943_v2 }
 0x406   : > { %v8948_v32 = vpop.f32.mrb[68].mxu0  ;;  %4999 = vmatmul.mubr.f32.gmra.mrb[94].mxu1 %v3570_v45  ;;  %v3700_v45 = vld [vmem:[#allocation2 + $0x20] sm:$0xff] }
 0x407   : > { %9684 = vst [vmem:[#allocation79_spill] sm:$0xff] %v8948_v32  ;;  %v8950_v20 = vpop.f32.mrb[69].mxu0  ;;  %5068 = vmatprep.mubr.f32.mxu1 %v8822_v37  ;;  %v6566_v32 = vpack.c.bf16 %v4504_v46, %v4503_v57  ;;  %v3767_v46 = vld [vmem:[#allocation2 + $0x39] sm:$0xff] }
 0x408   : > { %9685 = vst [vmem:[#allocation47_spill] sm:$0xff] %v8950_v20  ;;  %v3774_v20 = vld [vmem:[#allocation2 + $0x71] sm:$0xff] }
 0x40a   : > { %5069 = vmatmul.mubr.f32.vlgmr.msra.gmra.mrb[32].mxu1 %v3699_v51  ;;  %v4507_v51 = vld [vmem:[#allocation9 + $0x340] sm:$0xff] }
 0x40b   : > { %5073 = vmatprep.mubr.f32.mxu1 %v3796_v39  ;;  %6561 = vmatpush1.bf16.msra.mxu1 %v6560_v15  ;;  %v8961_v15 = vld [vmem:[#allocation2 + $0x28] sm:$0xff]  ;;  %v4508_v39 = vld [vmem:[#allocation9 + $0x348] sm:$0xff] }
 0x40c   : > { %6562 = vmatprep.subr.bf16.mxu1 %v9575_v61  ;;  %v6572_v22 = vpack.c.bf16 %v4508_v39, %v4507_v51  ;;  %v3769_v39 = vld [vmem:[#allocation2 + $0x49] sm:$0xff] }
 0x40e   : > { %v8956_v25 = vpop.f32.mrb[70].mxu0  ;;  %5074 = vmatmul.mubr.f32.gmra.mrb[34].mxu1 %v3700_v45 }
 0x40f   : > { %9686 = vst [vmem:[#allocation80_spill] sm:$0xff] %v8956_v25  ;;  %v8958_v37 = vpop.f32.mrb[71].mxu0  ;;  %5078 = vmatprep.mubr.f32.mxu1 %v3765_v4  ;;  %6564 = vmatpush1.bf16.msra.mxu1 %v6563_v10  ;;  %v8968_v10 = vld [vmem:[#allocation2 + $0x30] sm:$0xff]  ;;  %v3768_v4 = vld [vmem:[#allocation2 + $0x41] sm:$0xff] }
 0x410   : > { %9687 = vst [vmem:[#allocation48_spill] sm:$0xff] %v8958_v37  ;;  %6565 = vmatprep.subr.bf16.mxu1 %v9575_v61  ;;  %v3800_v56 = vmul.f32 %v7975_v6, %v3768_v4  ;;  %v3770_v25 = vld [vmem:[#allocation2 + $0x51] sm:$0xff]  ;;  %v4513_v4 = vld [vmem:[#allocation9 + $0x370] sm:$0xff] }
 0x411   : > { %v3772_v37 = vld [vmem:[#allocation2 + $0x61] sm:$0xff] }
 0x412   : > { %5079 = vmatmul.mubr.f32.gmra.mrb[36].mxu1 %v8961_v15 }
 0x413   : > { %5083 = vmatprep.mubr.f32.mxu1 %v3798_v48  ;;  %6567 = vmatpush1.bf16.msra.mxu1 %v6566_v32  ;;  %v4509_v32 = vld [vmem:[#allocation9 + $0x350] sm:$0xff] }
 0x414   : > { %6568 = vmatprep.subr.bf16.mxu1 %v9575_v61  ;;  %v6575_v48 = vpack.c.bf16 %v4510_v19, %v4509_v32  ;;  %v8987_v32 = vld [vmem:[#allocation2 + $0x48] sm:$0xff]  ;;  %v3802_v19 = vmul.f32 %v7991_v17, %v3770_v25  ;;  %v4517_v25 = vld [vmem:[#allocation9 + $0x390] sm:$0xff] }
 0x416   : > { %v8966_v45 = vpop.f32.mrb[72].mxu0  ;;  %5084 = vmatmul.mubr.f32.gmra.mrb[38].mxu1 %v8968_v10 }
 0x417   : > { %9688 = vst [vmem:[#allocation81_spill] sm:$0xff] %v8966_v45  ;;  %v8971_v57 = vpop.f32.mrb[73].mxu0  ;;  %5088 = vmatprep.mubr.f32.mxu1 %v3767_v46  ;;  %6570 = vmatpush1.bf16.msra.mxu1 %v6569_v63  ;;  %v4511_v45 = vld [vmem:[#allocation9 + $0x360] sm:$0xff]  ;;  %v8981_v63 = vld [vmem:[#allocation2 + $0x40] sm:$0xff] }
 0x418   : > { %9689 = vst [vmem:[#allocation49_spill] sm:$0xff] %v8971_v57  ;;  %6571 = vmatprep.subr.bf16.mxu1 %v9575_v61  ;;  %v4512_v57 = vld [vmem:[#allocation9 + $0x368] sm:$0xff] }
 0x419   : > { %v6578_v6 = vpack.c.bf16 %v4512_v57, %v4511_v45  ;;  %v8994_v45 = vld [vmem:[#allocation2 + $0x50] sm:$0xff] }
 0x41a   : > { %5089 = vmatmul.mubr.f32.gmra.mrb[40].mxu1 %v8974_v35 }
 0x41b   : > { %5093 = vmatprep.mubr.f32.mxu1 %v3800_v56  ;;  %6573 = vmatpush1.bf16.msra.mxu1 %v6572_v22  ;;  %v4514_v22 = vld [vmem:[#allocation9 + $0x378] sm:$0xff] }
 0x41c   : > { %6574 = vmatprep.subr.bf16.mxu1 %v9575_v61  ;;  %v6581_v56 = vpack.c.bf16 %v4514_v22, %v4513_v4  ;;  %v9000_v4 = vld [vmem:[#allocation2 + $0x58] sm:$0xff]  ;;  %v3804_v22 = vmul.f32 %v8007_v16, %v3772_v37  ;;  %v4521_v37 = vld [vmem:[#allocation9 + $0x3b0] sm:$0xff] }
 0x41e   : > { %v8979_v46 = vpop.f32.mrb[74].mxu0  ;;  %5094 = vmatmul.mubr.f32.gmra.mrb[42].mxu1 %v8981_v63 }
 0x41f   : > { %9690 = vst [vmem:[#allocation82_spill] sm:$0xff] %v8979_v46  ;;  %v8984_v51 = vpop.f32.mrb[75].mxu0  ;;  %5098 = vmatprep.mubr.f32.mxu1 %v3769_v39  ;;  %6576 = vmatpush1.bf16.msra.mxu1 %v6575_v48  ;;  %v4515_v46 = vld [vmem:[#allocation9 + $0x380] sm:$0xff]  ;;  %v3771_v48 = vld [vmem:[#allocation2 + $0x59] sm:$0xff] }
 0x420   : > { %9691 = vst [vmem:[#allocation50_spill] sm:$0xff] %v8984_v51  ;;  %6577 = vmatprep.subr.bf16.mxu1 %v9575_v61  ;;  %v4516_v51 = vld [vmem:[#allocation9 + $0x388] sm:$0xff] }
 0x421   : > { %v6584_v17 = vpack.c.bf16 %v4516_v51, %v4515_v46  ;;  %v9007_v46 = vld [vmem:[#allocation2 + $0x60] sm:$0xff] }
 0x422   : > { %5099 = vmatmul.mubr.f32.gmra.mrb[44].mxu1 %v8987_v32 }
 0x423   : > { %5103 = vmatprep.mubr.f32.mxu1 %v3802_v19  ;;  %6579 = vmatpush1.bf16.msra.mxu1 %v6578_v6  ;;  %v4518_v6 = vld [vmem:[#allocation9 + $0x398] sm:$0xff] }
 0x424   : > { %6580 = vmatprep.subr.bf16.mxu1 %v9575_v61  ;;  %v6587_v19 = vpack.c.bf16 %v4518_v6, %v4517_v25  ;;  %v9013_v25 = vld [vmem:[#allocation2 + $0x68] sm:$0xff]  ;;  %v3806_v6 = vmul.f32 %v8025_v23, %v3774_v20  ;;  %v4525_v20 = vld [vmem:[#allocation9 + $0x3d0] sm:$0xff] }
 0x426   : > { %v8992_v39 = vpop.f32.mrb[76].mxu0  ;;  %5104 = vmatmul.mubr.f32.gmra.mrb[46].mxu1 %v8994_v45 }
 0x427   : > { %9692 = vst [vmem:[#allocation83_spill] sm:$0xff] %v8992_v39  ;;  %v8997_v57 = vpop.f32.mrb[77].mxu0  ;;  %5108 = vmatprep.mubr.f32.mxu1 %v3771_v48  ;;  %6582 = vmatpush1.bf16.msra.mxu1 %v6581_v56  ;;  %v4519_v39 = vld [vmem:[#allocation9 + $0x3a0] sm:$0xff] }
 0x428   : > { %9693 = vst [vmem:[#allocation51_spill] sm:$0xff] %v8997_v57  ;;  %6583 = vmatprep.subr.bf16.mxu1 %v9575_v61  ;;  %v4520_v57 = vld [vmem:[#allocation9 + $0x3a8] sm:$0xff]  ;;  %v3773_v56 = vld [vmem:[#allocation2 + $0x69] sm:$0xff] }
 0x429   : > { %v6590_v16 = vpack.c.bf16 %v4520_v57, %v4519_v39  ;;  %v9020_v39 = vld [vmem:[#allocation2 + $0x70] sm:$0xff] }
 0x42a   : > { %5109 = vmatmul.mubr.f32.gmra.mrb[48].mxu1 %v9000_v4 }
 0x42b   : > { %5113 = vmatprep.mubr.f32.mxu1 %v3804_v22  ;;  %6585 = vmatpush1.bf16.msra.mxu1 %v6584_v17  ;;  %v4522_v17 = vld [vmem:[#allocation9 + $0x3b8] sm:$0xff] }
 0x42c   : > { %6586 = vmatprep.subr.bf16.mxu1 %v9575_v61  ;;  %v6593_v22 = vpack.c.bf16 %v4522_v17, %v4521_v37  ;;  %v9026_v37 = vld [vmem:[#allocation2 + $0x78] sm:$0xff]  ;;  %v3808_v17 = vmul.f32 %v8041_v50, %v3776_v49  ;;  %v4529_v49 = vld [vmem:[#allocation9 + $0x3f0] sm:$0xff] }
 0x42e   : > { %v9005_v48 = vpop.f32.mrb[78].mxu0  ;;  %5114 = vmatmul.mubr.f32.gmra.mrb[50].mxu1 %v9007_v46 }
 0x42f   : > { %9694 = vst [vmem:[#allocation84_spill] sm:$0xff] %v9005_v48  ;;  %v9010_v51 = vpop.f32.mrb[79].mxu0  ;;  %5118 = vmatprep.mubr.f32.mxu1 %v3773_v56  ;;  %6588 = vmatpush1.bf16.msra.mxu1 %v6587_v19  ;;  %v4523_v48 = vld [vmem:[#allocation9 + $0x3c0] sm:$0xff]  ;;  %v3775_v19 = vld [vmem:[#allocation2 + $0x79] sm:$0xff] }
 0x430   : > { %9695 = vst [vmem:[#allocation52_spill] sm:$0xff] %v9010_v51  ;;  %6589 = vmatprep.subr.bf16.mxu1 %v9575_v61  ;;  %v4524_v51 = vld [vmem:[#allocation9 + $0x3c8] sm:$0xff] }
 0x431   : > { %v6596_v23 = vpack.c.bf16 %v4524_v51, %v4523_v48  ;;  %v9033_v48 = vld [vmem:[#allocation2 + $0x80] sm:$0xff] }
 0x432   : > { %5119 = vmatmul.mubr.f32.gmra.mrb[52].mxu1 %v9013_v25 }
 0x433   : > { %5123 = vmatprep.mubr.f32.mxu1 %v3806_v6  ;;  %6591 = vmatpush1.bf16.msra.mxu1 %v6590_v16  ;;  %v4526_v16 = vld [vmem:[#allocation9 + $0x3d8] sm:$0xff] }
 0x434   : > { %6592 = vmatprep.subr.bf16.mxu1 %v9575_v61  ;;  %v6599_v6 = vpack.c.bf16 %v4526_v16, %v4525_v20  ;;  %v9039_v20 = vld [vmem:[#allocation2 + $0x88] sm:$0xff]  ;;  %v3810_v16 = vmul.f32 %v8057_v24, %v3778_v26  ;;  %v9052_v26 = vld [vmem:[#allocation2 + $0x98] sm:$0xff] }
 0x435   : > { %v9702_v24 = vld [vmem:[#allocation45_spill] sm:$0xff] }
 0x436   : > { %v9018_v56 = vpop.f32.mrb[80].mxu0  ;;  %5124 = vmatmul.mubr.f32.gmra.mrb[54].mxu1 %v9020_v39 }
 0x437   : > { %9696 = vst [vmem:[#allocation85_spill] sm:$0xff] %v9018_v56  ;;  %v9023_v57 = vpop.f32.mrb[81].mxu0  ;;  %5128 = vmatprep.mubr.f32.mxu1 %v3775_v19  ;;  %6594 = vmatpush1.bf16.msra.mxu1 %v6593_v22  ;;  %v4527_v56 = vld [vmem:[#allocation9 + $0x3e0] sm:$0xff] }
 0x438   : > { %9697 = vst [vmem:[#allocation53_spill] sm:$0xff] %v9023_v57  ;;  %6595 = vmatprep.subr.bf16.mxu1 %v9575_v61  ;;  %v4528_v57 = vld [vmem:[#allocation9 + $0x3e8] sm:$0xff]  ;;  %v3777_v22 = vld [vmem:[#allocation2 + $0x89] sm:$0xff] }
 0x439   : > { %v6602_v50 = vpack.c.bf16 %v4528_v57, %v4527_v56  ;;  %v3779_v57 = vld [vmem:[#allocation2 + $0x99] sm:$0xff] }
 0x43a   : > { %5129 = vmatmul.mubr.f32.gmra.mrb[56].mxu1 %v9026_v37 }
 0x43b   : > { %5133 = vmatprep.mubr.f32.mxu1 %v3808_v17  ;;  %6597 = vmatpush1.bf16.msra.mxu1 %v6596_v23  ;;  %v4530_v23 = vld [vmem:[#allocation9 + $0x3f8] sm:$0xff] }
 0x43c   : > { %6598 = vmatprep.subr.bf16.mxu1 %v9575_v61  ;;  %v6605_v17 = vpack.c.bf16 %v4530_v23, %v4529_v49  ;;  %v9058_v49 = vld [vmem:[#allocation2 + $0xa0] sm:$0xff] }
 0x43e   : > { %v9031_v19 = vpop.f32.mrb[82].mxu0  ;;  %5134 = vmatmul.mubr.f32.gmra.mrb[58].mxu1 %v9033_v48 }
 0x43f   : > { %9698 = vst [vmem:[#allocation88_spill] sm:$0xff] %v9031_v19  ;;  %v9036_v51 = vpop.f32.mrb[83].mxu0  ;;  %5138 = vmatprep.mubr.f32.mxu1 %v3777_v22  ;;  %6600 = vmatpush1.bf16.msra.mxu1 %v6599_v6  ;;  %v9046_v22 = vld [vmem:[#allocation2 + $0x90] sm:$0xff]  ;;  %v3780_v6 = vld [vmem:[#allocation2 + $0xa1] sm:$0xff] }
 0x440   : > { %9699 = vst [vmem:[#allocation86_spill] sm:$0xff] %v9036_v51  ;;  %6601 = vmatprep.subr.bf16.mxu1 %v9575_v61  ;;  %v3859_v51 = vld [vmem:[#allocation2 + $0x27] sm:$0xff] }
 0x441   : > { %v3891_v9 = vmul.f32 %v9644_v18, %v3859_v51  ;;  %v9712_v18 = vld [vmem:[#allocation68_spill] sm:$0xff] }
 0x442   : > { %5139 = vmatmul.mubr.f32.gmra.mrb[60].mxu1 %v9039_v20  ;;  %v3867_v51 = vld [vmem:[#allocation2 + $0x67] sm:$0xff] }
 0x443   : > { %5143 = vmatprep.mubr.f32.mxu1 %v3810_v16  ;;  %6603 = vmatpush1.bf16.msra.mxu1 %v6602_v50  ;;  %v3812_v50 = vmul.f32 %v8073_v21, %v3780_v6  ;;  %v3781_v16 = vld [vmem:[#allocation2 + $0xa9] sm:$0xff]  ;;  %v3783_v6 = vld [vmem:[#allocation2 + $0xb9] sm:$0xff] }
 0x444   : > { %6604 = vmatprep.subr.bf16.mxu1 %v9575_v61  ;;  %v9067_v21 = vld [vmem:[#allocation2 + $0xb0] sm:$0xff] }
 0x446   : > { %v9044_v19 = vpop.f32.mrb[84].mxu0  ;;  %5144 = vmatmul.mubr.f32.gmra.mrb[62].mxu1 %v9046_v22 }
 0x447   : > { %9700 = vst [vmem:[#allocation59_spill] sm:$0xff] %v9044_v19  ;;  %v9049_v56 = vpop.f32.mrb[85].mxu0  ;;  %5148 = vmatprep.mubr.f32.mxu1 %v3779_v57  ;;  %6606 = vmatpush1.bf16.msra.mxu1 %v6605_v17  ;;  %v3782_v57 = vld [vmem:[#allocation2 + $0xb1] sm:$0xff]  ;;  %v9063_v17 = vld [vmem:[#allocation2 + $0xa8] sm:$0xff] }
 0x448   : > { %9701 = vst [vmem:[#allocation89_spill] sm:$0xff] %v9049_v56  ;;  %6639 = vmatprep.subr.bf16.mxu1 %v9702_v24  ;;  %v3814_v19 = vmul.f32 %v8088_v53, %v3782_v57  ;;  %v9079_v53 = vld [vmem:[#allocation2 + $0xc8] sm:$0xff]  ;;  %v9084_v57 = vld [vmem:[#allocation2 + $0xd0] sm:$0xff] }
 0x44a   : > { %5149 = vmatmul.mubr.f32.gmra.mrb[64].mxu1 %v9052_v26 }
 0x44b   : > { %5153 = vmatprep.mubr.f32.mxu1 %v3812_v50  ;;  %v9070_v50 = vld [vmem:[#allocation2 + $0xb8] sm:$0xff] }
 0x44e   : > { %v9056_v61 = vpop.f32.mrb[86].mxu0  ;;  %5154 = vmatmul.mubr.f32.gmra.mrb[66].mxu1 %v9058_v49 }
 0x44f   : > { %9703 = vst [vmem:[#allocation54_spill] sm:$0xff] %v9056_v61  ;;  %v9061_v23 = vpop.f32.mrb[87].mxu0  ;;  %5158 = vmatprep.mubr.f32.mxu1 %v3781_v16  ;;  %v3816_v61 = vmul.f32 %v9661_v43, %v9666_v55  ;;  %v9075_v16 = vld [vmem:[#allocation2 + $0xc0] sm:$0xff]  ;;  %v9088_v43 = vld [vmem:[#allocation2 + $0xd8] sm:$0xff]  ;;  %v3820_v55 = vmul.f32 %v9672_v12, %v9675_v29 }
 0x450   : > { %9704 = vst [vmem:[#allocation87_spill] sm:$0xff] %v9061_v23  ;;  %v9106_v29 = vld [vmem:[#allocation2 + $0xf8] sm:$0xff] }
 0x451   : > { %v9706_v23 = vld [vmem:[#allocation75_spill] sm:$0xff] }
 0x452   : > { %5159 = vmatmul.mubr.f32.gmra.mrb[68].mxu1 %v9063_v17  ;;  %v9707_v56 = vmax.f32 %v9706_v23, 0.0  ;;  %v3870_v23 = vld [vmem:[#allocation2 + $0x7f] sm:$0xff] }
 0x453   : > { %5163 = vmatprep.mubr.f32.mxu1 %v3814_v19  ;;  %v3818_v19 = vmul.f32 %v9638_v33, %v9671_v47  ;;  %v9097_v33 = vld [vmem:[#allocation2 + $0xe8] sm:$0xff]  ;;  %v3822_v47 = vmul.f32 %v9676_v7, %v8924_v34 }
 0x456   : > { %5164 = vmatmul.mubr.f32.gmra.mrb[70].mxu1 %v9067_v21 }
 0x457   : > { %5168 = vmatprep.mubr.f32.mxu1 %v3783_v6  ;;  %v9111_v6 = vld [vmem:[#allocation2 + $0x100] sm:$0xff] }
 0x45a   : > { %5169 = vmatmul.mubr.f32.gmra.mrb[72].mxu1 %v9070_v50 }
 0x45b   : > { %5173 = vmatprep.mubr.f32.mxu1 %v3816_v61  ;;  %v3824_v61 = vmul.f32 %v9680_v14, %v8940_v36  ;;  %v9710_v14 = vld [vmem:[#allocation46_spill] sm:$0xff] }
 0x45e   : > { %5174 = vmatmul.mubr.f32.gmra.mrb[74].mxu1 %v9075_v16 }
 0x45f   : > { %5178 = vmatprep.mubr.f32.mxu1 %v9669_v41  ;;  %v9093_v41 = vld [vmem:[#allocation2 + $0xe0] sm:$0xff] }
 0x462   : > { %5179 = vmatmul.mubr.f32.gmra.mrb[76].mxu1 %v9079_v53 }
 0x463   : > { %5183 = vmatprep.mubr.f32.mxu1 %v3818_v19  ;;  %v9114_v19 = vld [vmem:[#allocation2 + $0x109] sm:$0xff] }
 0x466   : > { %5184 = vmatmul.mubr.f32.gmra.mrb[78].mxu1 %v9084_v57 }
 0x467   : > { %5188 = vmatprep.mubr.f32.mxu1 %v9674_v11  ;;  %v9102_v11 = vld [vmem:[#allocation2 + $0xf0] sm:$0xff] }
 0x46a   : > { %5189 = vmatmul.mubr.f32.gmra.mrb[80].mxu1 %v9088_v43 }
 0x46b   : > { %5193 = vmatprep.mubr.f32.mxu1 %v3820_v55  ;;  %v9116_v55 = vld [vmem:[#allocation2 + $0x111] sm:$0xff] }
 0x46c   : > { %9705 = vst [vmem:[#allocation74_spill] sm:$0xff] %v9116_v55 }
 0x46e   : > { %5194 = vmatmul.mubr.f32.gmra.mrb[82].mxu1 %v9093_v41 }
 0x46f   : > { %5198 = vmatprep.mubr.f32.mxu1 %v8922_v54 }
 0x472   : > { %5199 = vmatmul.mubr.f32.gmra.mrb[84].mxu1 %v9097_v33 }
 0x473   : > { %5203 = vmatprep.mubr.f32.mxu1 %v3822_v47  ;;  %v3826_v47 = vmul.f32 %v9683_v31, %v9116_v55  ;;  %v3860_v31 = vld [vmem:[#allocation2 + $0x2f] sm:$0xff]  ;;  %v3861_v55 = vld [vmem:[#allocation2 + $0x37] sm:$0xff] }
 0x476   : > { %5204 = vmatmul.mubr.f32.gmra.mrb[86].mxu1 %v9102_v11 }
 0x477   : > { %5208 = vmatprep.mubr.f32.mxu1 %v8938_v62 }
 0x47a   : > { %5209 = vmatmul.mubr.f32.gmra.mrb[88].mxu1 %v9106_v29 }
 0x47b   : > { %5213 = vmatprep.mubr.f32.mxu1 %v3824_v61  ;;  %v9709_v61 = vmax.f32 %v9708_v44, 0.0  ;;  %v3893_v44 = vmul.f32 %v7733_v58, %v3861_v55  ;;  %v9714_v58 = vld [vmem:[#allocation70_spill] sm:$0xff]  ;;  %v3871_v55 = vld [vmem:[#allocation2 + $0x87] sm:$0xff] }
 0x47e   : > { %5214 = vmatmul.mubr.f32.gmra.mrb[90].mxu1 %v9111_v6 }
 0x47f   : > { %5218 = vmatprep.mubr.f32.mxu1 %v9114_v19 }
 0x482   : > { %5219 = vmatmul.mubr.f32.gmra.mrb[92].mxu1 %v9707_v56  ;;  %v9711_v56 = vld [vmem:[#allocation67_spill] sm:$0xff] }
 0x483   : > { %5223 = vmatprep.mubr.f32.mxu1 %v3826_v47  ;;  %v7182_v47 = vld [vmem:[#allocation2 + $0x8] sm:$0xff] }
 0x486   : > { %5224 = vmatmul.mubr.f32.gmra.mrb[94].mxu1 %v9709_v61 }
 0x487   : > { %5293 = vmatprep.mubr.f32.mxu1 %v8961_v15  ;;  %v3863_v15 = vld [vmem:[#allocation2 + $0x47] sm:$0xff] }
 0x48a   : > { %5294 = vmatmul.mubr.f32.vlgmr.msra.gmra.mrb[32].mxu1 %v3891_v9  ;;  %v3862_v9 = vld [vmem:[#allocation2 + $0x3f] sm:$0xff] }
 0x48b   : > { %5298 = vmatprep.mubr.f32.mxu1 %v8968_v10  ;;  %6647 = vmatpush3.bf16.msra.mxu1 %v9702_v24  ;;  %v3864_v10 = vld [vmem:[#allocation2 + $0x4f] sm:$0xff]  ;;  %v3869_v24 = vld [vmem:[#allocation2 + $0x77] sm:$0xff] }
 0x48c   : > { %6640 = vmatprep.subr.bf16.mxu1 %v9710_v14 }
 0x48e   : > { %5299 = vmatmul.mubr.f32.gmra.mrb[34].mxu1 %v3860_v31  ;;  %v9713_v31 = vld [vmem:[#allocation69_spill] sm:$0xff] }
 0x48f   : > { %5303 = vmatprep.mubr.f32.mxu1 %v8974_v35  ;;  %6648 = vmatpush3.bf16.msra.mxu1 %v9710_v14  ;;  %v3895_v14 = vmul.f32 %v9584_v27, %v3863_v15  ;;  %v3865_v35 = vld [vmem:[#allocation2 + $0x57] sm:$0xff]  ;;  %v9716_v27 = vld [vmem:[#allocation72_spill] sm:$0xff] }
 0x490   : > { %6641 = vmatprep.subr.bf16.mxu1 %v9711_v56 }
 0x492   : > { %5304 = vmatmul.mubr.f32.gmra.mrb[36].mxu1 %v3893_v44  ;;  %v4049_v44 = vld [vmem:[#allocation2 + $0x119] sm:$0xff] }
 0x493   : > { %5308 = vmatprep.mubr.f32.mxu1 %v8981_v63  ;;  %6649 = vmatpush3.bf16.msra.mxu1 %v9711_v56  ;;  %v3897_v63 = vmul.f32 %v9585_v5, %v3865_v35  ;;  %v3868_v5 = vld [vmem:[#allocation2 + $0x6f] sm:$0xff]  ;;  %v9719_v56 = vld [vmem:[#allocation64_spill] sm:$0xff] }
 0x494   : > { %6642 = vmatprep.subr.bf16.mxu1 %v9712_v18 }
 0x496   : > { %5309 = vmatmul.mubr.f32.gmra.mrb[38].mxu1 %v3862_v9  ;;  %v9721_v9 = vld [vmem:[#allocation14_spill] sm:$0xff] }
 0x497   : > { %5313 = vmatprep.mubr.f32.mxu1 %v8987_v32  ;;  %6650 = vmatpush3.bf16.msra.mxu1 %v9712_v18  ;;  %v9715_v32 = vld [vmem:[#allocation71_spill] sm:$0xff] }
 0x498   : > { %6643 = vmatprep.subr.bf16.mxu1 %v9713_v31 }
 0x49a   : > { %5314 = vmatmul.mubr.f32.gmra.mrb[40].mxu1 %v3895_v14 }
 0x49b   : > { %5318 = vmatprep.mubr.f32.mxu1 %v8994_v45  ;;  %6651 = vmatpush3.bf16.msra.mxu1 %v9713_v31  ;;  %v3866_v45 = vld [vmem:[#allocation2 + $0x5f] sm:$0xff] }
 0x49c   : > { %6644 = vmatprep.subr.bf16.mxu1 %v9714_v58 }
 0x49e   : > { %5319 = vmatmul.mubr.f32.gmra.mrb[42].mxu1 %v3864_v10  ;;  %v9722_v10 = vld [vmem:[#allocation78_spill] sm:$0xff] }
 0x49f   : > { %5323 = vmatprep.mubr.f32.mxu1 %v9000_v4  ;;  %6652 = vmatpush3.bf16.msra.mxu1 %v9714_v58  ;;  %v3899_v4 = vmul.f32 %v9646_v42, %v3867_v51  ;;  %v3903_v42 = vmul.f32 %v9650_v59, %v3871_v55 }
 0x4a0   : > { %6645 = vmatprep.subr.bf16.mxu1 %v9715_v32 }
 0x4a2   : > { %5324 = vmatmul.mubr.f32.gmra.mrb[44].mxu1 %v3897_v63 }
 0x4a3   : > { %5328 = vmatprep.mubr.f32.mxu1 %v9007_v46  ;;  %6653 = vmatpush3.bf16.msra.mxu1 %v9715_v32  ;;  %v3901_v46 = vmul.f32 %v9648_v13, %v3869_v24  ;;  %v9723_v32 = vld [vmem:[#allocation15_spill] sm:$0xff] }
 0x4a4   : > { %6646 = vmatprep.subr.bf16.mxu1 %v9716_v27 }
 0x4a6   : > { %5329 = vmatmul.mubr.f32.gmra.mrb[46].mxu1 %v3866_v45 }
 0x4a7   : > { %5333 = vmatprep.mubr.f32.mxu1 %v9013_v25  ;;  %6654 = vmatpush3.bf16.msra.mxu1 %v9716_v27  ;;  %v3872_v25 = vld [vmem:[#allocation2 + $0x8f] sm:$0xff] }
 0x4aa   : > { %5334 = vmatmul.mubr.f32.gmra.mrb[48].mxu1 %v3899_v4 }
 0x4ab   : > { %5338 = vmatprep.mubr.f32.mxu1 %v9020_v39  ;;  %v3873_v39 = vld [vmem:[#allocation2 + $0x97] sm:$0xff] }
 0x4ac   : > { %v3905_v13 = vmul.f32 %v9652_v52, %v3873_v39 }
 0x4ae   : > { %5339 = vmatmul.mubr.f32.gmra.mrb[50].mxu1 %v3868_v5  ;;  %v9724_v5 = vld [vmem:[#allocation44_spill] sm:$0xff] }
 0x4af   : > { %5343 = vmatprep.mubr.f32.mxu1 %v9026_v37  ;;  %v3874_v37 = vld [vmem:[#allocation2 + $0x9f] sm:$0xff] }
 0x4b2   : > { %5344 = vmatmul.mubr.f32.gmra.mrb[52].mxu1 %v3901_v46 }
 0x4b3   : > { %5348 = vmatprep.mubr.f32.mxu1 %v9033_v48  ;;  %v3875_v48 = vld [vmem:[#allocation2 + $0xa7] sm:$0xff] }
 0x4b4   : > { %v3907_v59 = vmul.f32 %v9654_v8, %v3875_v48 }
 0x4b6   : > { %5349 = vmatmul.mubr.f32.gmra.mrb[54].mxu1 %v3870_v23  ;;  %v9725_v23 = vld [vmem:[#allocation16_spill] sm:$0xff] }
 0x4b7   : > { %5353 = vmatprep.mubr.f32.mxu1 %v9039_v20  ;;  %v3876_v20 = vld [vmem:[#allocation2 + $0xaf] sm:$0xff] }
 0x4ba   : > { %5354 = vmatmul.mubr.f32.gmra.mrb[56].mxu1 %v3903_v42 }
 0x4bb   : > { %5358 = vmatprep.mubr.f32.mxu1 %v9046_v22  ;;  %v3877_v22 = vld [vmem:[#allocation2 + $0xb7] sm:$0xff] }
 0x4bc   : > { %v3909_v52 = vmul.f32 %v9656_v3, %v3877_v22 }
 0x4be   : > { %5359 = vmatmul.mubr.f32.gmra.mrb[58].mxu1 %v3872_v25 }
 0x4bf   : > { %5363 = vmatprep.mubr.f32.mxu1 %v9052_v26  ;;  %v3878_v26 = vld [vmem:[#allocation2 + $0xbf] sm:$0xff] }
 0x4c2   : > { %5364 = vmatmul.mubr.f32.gmra.mrb[60].mxu1 %v3905_v13  ;;  %v9726_v13 = vld [vmem:[#allocation58_spill] sm:$0xff] }
 0x4c3   : > { %5368 = vmatprep.mubr.f32.mxu1 %v9058_v49  ;;  %v3879_v49 = vld [vmem:[#allocation2 + $0xc7] sm:$0xff] }
 0x4c4   : > { %v3911_v8 = vmul.f32 %v9658_v28, %v3879_v49  ;;  %v9728_v49 = vld [vmem:[#allocation47_spill] sm:$0xff] }
 0x4c6   : > { %5369 = vmatmul.mubr.f32.gmra.mrb[62].mxu1 %v3874_v37 }
 0x4c7   : > { %5373 = vmatprep.mubr.f32.mxu1 %v9063_v17  ;;  %v3880_v17 = vld [vmem:[#allocation2 + $0xcf] sm:$0xff] }
 0x4ca   : > { %5374 = vmatmul.mubr.f32.gmra.mrb[64].mxu1 %v3907_v59  ;;  %v9727_v59 = vld [vmem:[#allocation17_spill] sm:$0xff] }
 0x4cb   : > { %5378 = vmatprep.mubr.f32.mxu1 %v9067_v21  ;;  %v3881_v21 = vld [vmem:[#allocation2 + $0xd7] sm:$0xff] }
 0x4cc   : > { %v3913_v3 = vmul.f32 %v9663_v60, %v3881_v21  ;;  %v9729_v21 = vld [vmem:[#allocation18_spill] sm:$0xff] }
 0x4ce   : > { %5379 = vmatmul.mubr.f32.gmra.mrb[66].mxu1 %v3876_v20 }
 0x4cf   : > { %5383 = vmatprep.mubr.f32.mxu1 %v9070_v50  ;;  %v3882_v50 = vld [vmem:[#allocation2 + $0xdf] sm:$0xff] }
 0x4d2   : > { %5384 = vmatmul.mubr.f32.gmra.mrb[68].mxu1 %v3909_v52 }
 0x4d3   : > { %5388 = vmatprep.mubr.f32.mxu1 %v9075_v16  ;;  %v3883_v16 = vld [vmem:[#allocation2 + $0xe7] sm:$0xff] }
 0x4d4   : > { %v3915_v28 = vmul.f32 %v9668_v30, %v3883_v16  ;;  %v3919_v30 = vmul.f32 %v9678_v40, %v8927_v38  ;;  %v4078_v40 = vmul.f32 %v9676_v7, %v8940_v36  ;;  %v4050_v38 = vld [vmem:[#allocation2 + $0x121] sm:$0xff] }
 0x4d5   : > { %v9720_v36 = vld [vmem:[#allocation77_spill] sm:$0xff] }
 0x4d6   : > { %5389 = vmatmul.mubr.f32.gmra.mrb[70].mxu1 %v3878_v26 }
 0x4d7   : > { %5393 = vmatprep.mubr.f32.mxu1 %v9079_v53  ;;  %v3884_v53 = vld [vmem:[#allocation2 + $0xef] sm:$0xff] }
 0x4da   : > { %5394 = vmatmul.mubr.f32.gmra.mrb[72].mxu1 %v3911_v8 }
 0x4db   : > { %5398 = vmatprep.mubr.f32.mxu1 %v9084_v57  ;;  %v3885_v57 = vld [vmem:[#allocation2 + $0xf7] sm:$0xff] }
 0x4dc   : > { %v3917_v60 = vmul.f32 %v9673_v0, %v3885_v57 }
 0x4de   : > { %5399 = vmatmul.mubr.f32.gmra.mrb[74].mxu1 %v3880_v17 }
 0x4df   : > { %5403 = vmatprep.mubr.f32.mxu1 %v9088_v43  ;;  %v3886_v43 = vld [vmem:[#allocation2 + $0xff] sm:$0xff] }
 0x4e2   : > { %5404 = vmatmul.mubr.f32.gmra.mrb[76].mxu1 %v3913_v3 }
 0x4e3   : > { %5408 = vmatprep.mubr.f32.mxu1 %v9093_v41  ;;  %v3983_v41 = vld [vmem:[#allocation2 + $0x108] sm:$0xff] }
 0x4e6   : > { %5409 = vmatmul.mubr.f32.gmra.mrb[78].mxu1 %v3882_v50 }
 0x4e7   : > { %5413 = vmatprep.mubr.f32.mxu1 %v9097_v33  ;;  %v3984_v33 = vld [vmem:[#allocation2 + $0x110] sm:$0xff] }
 0x4ea   : > { %5414 = vmatmul.mubr.f32.gmra.mrb[80].mxu1 %v3915_v28 }
 0x4eb   : > { %5418 = vmatprep.mubr.f32.mxu1 %v9102_v11  ;;  %v3889_v11 = vld [vmem:[#allocation2 + $0x117] sm:$0xff] }
 0x4ec   : > { %v3921_v0 = vmul.f32 %v9643_v1, %v3889_v11  ;;  %v9717_v1 = vld [vmem:[#allocation74_spill] sm:$0xff] }
 0x4ee   : > { %5419 = vmatmul.mubr.f32.gmra.mrb[82].mxu1 %v3884_v53  ;;  %v9730_v53 = vld [vmem:[#allocation79_spill] sm:$0xff] }
 0x4ef   : > { %5423 = vmatprep.mubr.f32.mxu1 %v9106_v29  ;;  %v3890_v29 = vld [vmem:[#allocation2 + $0x11f] sm:$0xff] }
 0x4f2   : > { %5424 = vmatmul.mubr.f32.gmra.mrb[84].mxu1 %v3917_v60 }
 0x4f3   : > { %5428 = vmatprep.mubr.f32.mxu1 %v9111_v6  ;;  %v4076_v6 = vmul.f32 %v9672_v12, %v8924_v34  ;;  %v9199_v12 = vld [vmem:[%s9380_s4] ss:$0 sm:$0xff] }
 0x4f6   : > { %5429 = vmatmul.mubr.f32.gmra.mrb[86].mxu1 %v3886_v43  ;;  %v9731_v43 = vld [vmem:[#allocation19_spill] sm:$0xff] }
 0x4f7   : > { %5433 = vmatprep.mubr.f32.mxu1 %v3983_v41 }
 0x4fa   : > { %5434 = vmatmul.mubr.f32.gmra.mrb[88].mxu1 %v3919_v30 }
 0x4fb   : > { %5438 = vmatprep.mubr.f32.mxu1 %v3984_v33 }
 0x4fe   : > { %5439 = vmatmul.mubr.f32.gmra.mrb[90].mxu1 %v8943_v2  ;;  %v9718_v2 = vld [vmem:[#allocation63_spill] sm:$0xff] }
 0x4ff   : > { %5443 = vmatprep.mubr.f32.mxu1 %v7182_v47  ;;  %v4080_v61 = vmul.f32 %v9718_v2, %v9717_v1 }
 0x502   : > { %5444 = vmatmul.mubr.f32.gmra.mrb[92].mxu1 %v3921_v0 }
 0x503   : > { %5448 = vmatprep.mubr.f32.mxu1 %v7182_v47  ;;  %v9732_v47 = vld [vmem:[#allocation48_spill] sm:$0xff] }
 0x506   : > { %5449 = vmatmul.mubr.f32.gmra.mrb[94].mxu1 %v3890_v29 }
 0x507   : > { %6179 = vmatprep.mubr.f32.mxu1 %v8922_v54  ;;  %v4082_v54 = vmul.f32 %v9719_v56, %v4050_v38 }
 0x50a   : > { %6180 = vmatmul.mubr.f32.vlgmr.msra.gmra.mrb[96].mxu1 %v4076_v6  ;;  %v9733_v6 = vld [vmem:[#allocation20_spill] sm:$0xff] }
 0x50b   : > { %6182 = vmatprep.mubr.f32.mxu1 %v8938_v62 }
 0x50e   : > { %6183 = vmatmul.mubr.f32.gmra.mrb[98].mxu1 %v4078_v40 }
 0x50f   : > { %6185 = vmatprep.mubr.f32.mxu1 %v9114_v19 }
 0x512   : > { %6186 = vmatmul.mubr.f32.gmra.mrb[100].mxu1 %v4080_v61  ;;  %v9734_v61 = vld [vmem:[#allocation80_spill] sm:$0xff] }
 0x513   : > { %6188 = vmatprep.mubr.f32.mxu1 %v4049_v44 }
 0x516   : > { %6189 = vmatmul.mubr.f32.gmra.mrb[102].mxu1 %v4082_v54  ;;  %v9735_v54 = vld [vmem:[#allocation21_spill] sm:$0xff] }
 0x55d   : > { %v5295_v7 = vpop.f32.mrb[32].mxu1 }
 0x55e   : > { %v6687_v34 = vadd.f32 %v9199_v12, %v5295_v7  ;;  %v5297_v62 = vpop.f32.mrb[33].mxu1 }
 0x560   : > { %v5521_v19 = vadd.f32 %v6687_v34, %v9720_v36 }
 0x561   : > { %v5300_v18 = vpop.f32.mrb[34].mxu1 }
 0x562   : > { %v5679_v15 = vadd.f32 %v5521_v19, %v9721_v9  ;;  %v6688_v14 = vadd.f32 %v9199_v12, %v5300_v18  ;;  %v5302_v31 = vpop.f32.mrb[35].mxu1  ;;  %v9736_v19 = vld [vmem:[#allocation49_spill] sm:$0xff] }
 0x564   : > { %v5711_v58 = vmax.f32 %v5679_v15, 0.0  ;;  %v5526_v35 = vadd.f32 %v6688_v14, %v9722_v10  ;;  %v9737_v15 = vld [vmem:[#allocation22_spill] sm:$0xff] }
 0x565   : > { %v5305_v63 = vpop.f32.mrb[36].mxu1 }
 0x566   : > { %5743 = vst [vmem:[%s9208_s10] sm:$0xff] %v5711_v58  ;;  %v5680_v27 = vadd.f32 %v5526_v35, %v9723_v32  ;;  %v6689_v45 = vadd.f32 %v9199_v12, %v5305_v63  ;;  %v5307_v51 = vpop.f32.mrb[37].mxu1  ;;  %v9738_v35 = vld [vmem:[#allocation81_spill] sm:$0xff] }
 0x568   : > { %v5712_v4 = vmax.f32 %v5680_v27, 0.0  ;;  %v5531_v24 = vadd.f32 %v6689_v45, %v9724_v5  ;;  %v9739_v27 = vld [vmem:[#allocation23_spill] sm:$0xff] }
 0x569   : > { %v5310_v46 = vpop.f32.mrb[38].mxu1 }
 0x56a   : > { %5744 = vst [vmem:[%s9208_s10 + $0x8] sm:$0xff] %v5712_v4  ;;  %v5681_v55 = vadd.f32 %v5531_v24, %v9725_v23  ;;  %v6690_v42 = vadd.f32 %v9199_v12, %v5310_v46  ;;  %v5312_v25 = vpop.f32.mrb[39].mxu1  ;;  %v9740_v24 = vld [vmem:[#allocation50_spill] sm:$0xff] }
 0x56c   : > { %v5713_v39 = vmax.f32 %v5681_v55, 0.0  ;;  %v5536_v37 = vadd.f32 %v6690_v42, %v9726_v13  ;;  %v9741_v55 = vld [vmem:[#allocation24_spill] sm:$0xff] }
 0x56d   : > { %v5315_v48 = vpop.f32.mrb[40].mxu1 }
 0x56e   : > { %5745 = vst [vmem:[%s9208_s10 + $0x10] sm:$0xff] %v5713_v39  ;;  %v5682_v20 = vadd.f32 %v5536_v37, %v9727_v59  ;;  %v6691_v22 = vadd.f32 %v9199_v12, %v5315_v48  ;;  %v5317_v52 = vpop.f32.mrb[41].mxu1  ;;  %v9742_v37 = vld [vmem:[#allocation82_spill] sm:$0xff] }
 0x570   : > { %v5714_v26 = vmax.f32 %v5682_v20, 0.0  ;;  %v5541_v8 = vadd.f32 %v6691_v22, %v9728_v49  ;;  %v9743_v20 = vld [vmem:[#allocation25_spill] sm:$0xff] }
 0x571   : > { %v5320_v17 = vpop.f32.mrb[42].mxu1 }
 0x572   : > { %5746 = vst [vmem:[%s9208_s10 + $0x18] sm:$0xff] %v5714_v26  ;;  %v5683_v3 = vadd.f32 %v5541_v8, %v9729_v21  ;;  %v6692_v50 = vadd.f32 %v9199_v12, %v5320_v17  ;;  %v5322_v16 = vpop.f32.mrb[43].mxu1  ;;  %v9744_v8 = vld [vmem:[#allocation51_spill] sm:$0xff] }
 0x574   : > { %v5715_v28 = vmax.f32 %v5683_v3, 0.0  ;;  %v5546_v57 = vadd.f32 %v6692_v50, %v9730_v53  ;;  %v9745_v3 = vld [vmem:[#allocation26_spill] sm:$0xff] }
 0x575   : > { %v5325_v60 = vpop.f32.mrb[44].mxu1 }
 0x576   : > { %5747 = vst [vmem:[%s9208_s10 + $0x20] sm:$0xff] %v5715_v28  ;;  %v5684_v41 = vadd.f32 %v5546_v57, %v9731_v43  ;;  %v6693_v30 = vadd.f32 %v9199_v12, %v5325_v60  ;;  %v5327_v33 = vpop.f32.mrb[45].mxu1  ;;  %v9746_v57 = vld [vmem:[#allocation83_spill] sm:$0xff] }
 0x578   : > { %v5716_v11 = vmax.f32 %v5684_v41, 0.0  ;;  %v5551_v0 = vadd.f32 %v6693_v30, %v9732_v47  ;;  %v9747_v41 = vld [vmem:[#allocation27_spill] sm:$0xff] }
 0x579   : > { %v5330_v29 = vpop.f32.mrb[46].mxu1 }
 0x57a   : > { %5748 = vst [vmem:[%s9208_s10 + $0x28] sm:$0xff] %v5716_v11  ;;  %v5685_v40 = vadd.f32 %v5551_v0, %v9733_v6  ;;  %v6694_v38 = vadd.f32 %v9199_v12, %v5330_v29  ;;  %v5332_v1 = vpop.f32.mrb[47].mxu1  ;;  %v9748_v0 = vld [vmem:[#allocation52_spill] sm:$0xff] }
 0x57c   : > { %v5717_v2 = vmax.f32 %v5685_v40, 0.0  ;;  %v5556_v44 = vadd.f32 %v6694_v38, %v9734_v61  ;;  %v9749_v40 = vld [vmem:[#allocation28_spill] sm:$0xff] }
 0x57d   : > { %v5335_v56 = vpop.f32.mrb[48].mxu1 }
 0x57e   : > { %5749 = vst [vmem:[%s9208_s10 + $0x30] sm:$0xff] %v5717_v2  ;;  %v5686_v7 = vadd.f32 %v5556_v44, %v9735_v54  ;;  %v6695_v34 = vadd.f32 %v9199_v12, %v5335_v56  ;;  %v5337_v62 = vpop.f32.mrb[49].mxu1  ;;  %v9750_v44 = vld [vmem:[#allocation84_spill] sm:$0xff] }
 0x580   : > { %v5718_v36 = vmax.f32 %v5686_v7, 0.0  ;;  %v5561_v18 = vadd.f32 %v6695_v34, %v9736_v19  ;;  %v9751_v7 = vld [vmem:[#allocation29_spill] sm:$0xff] }
 0x581   : > { %v5340_v9 = vpop.f32.mrb[50].mxu1 }
 0x582   : > { %5750 = vst [vmem:[%s9208_s10 + $0x38] sm:$0xff] %v5718_v36  ;;  %v5687_v14 = vadd.f32 %v5561_v18, %v9737_v15  ;;  %v6696_v31 = vadd.f32 %v9199_v12, %v5340_v9  ;;  %v5342_v58 = vpop.f32.mrb[51].mxu1  ;;  %v9752_v18 = vld [vmem:[#allocation53_spill] sm:$0xff] }
 0x584   : > { %v5719_v10 = vmax.f32 %v5687_v14, 0.0  ;;  %v5566_v63 = vadd.f32 %v6696_v31, %v9738_v35  ;;  %v9753_v14 = vld [vmem:[#allocation30_spill] sm:$0xff] }
 0x585   : > { %v5345_v32 = vpop.f32.mrb[52].mxu1 }
 0x586   : > { %5751 = vst [vmem:[%s9208_s10 + $0x40] sm:$0xff] %v5719_v10  ;;  %v5688_v45 = vadd.f32 %v5566_v63, %v9739_v27  ;;  %v6697_v51 = vadd.f32 %v9199_v12, %v5345_v32  ;;  %v5347_v4 = vpop.f32.mrb[53].mxu1  ;;  %v9754_v63 = vld [vmem:[#allocation85_spill] sm:$0xff] }
 0x588   : > { %v5720_v5 = vmax.f32 %v5688_v45, 0.0  ;;  %v5571_v46 = vadd.f32 %v6697_v51, %v9740_v24  ;;  %v9755_v45 = vld [vmem:[#allocation31_spill] sm:$0xff] }
 0x589   : > { %v5350_v23 = vpop.f32.mrb[54].mxu1 }
 0x58a   : > { %5752 = vst [vmem:[%s9208_s10 + $0x48] sm:$0xff] %v5720_v5  ;;  %v5689_v42 = vadd.f32 %v5571_v46, %v9741_v55  ;;  %v6698_v25 = vadd.f32 %v9199_v12, %v5350_v23  ;;  %v5352_v39 = vpop.f32.mrb[55].mxu1  ;;  %v9756_v46 = vld [vmem:[#allocation86_spill] sm:$0xff] }
 0x58c   : > { %v5721_v13 = vmax.f32 %v5689_v42, 0.0  ;;  %v5576_v48 = vadd.f32 %v6698_v25, %v9742_v37  ;;  %v9757_v42 = vld [vmem:[#allocation32_spill] sm:$0xff] }
 0x58d   : > { %v5355_v59 = vpop.f32.mrb[56].mxu1 }
 0x58e   : > { %5753 = vst [vmem:[%s9208_s10 + $0x50] sm:$0xff] %v5721_v13  ;;  %v5690_v22 = vadd.f32 %v5576_v48, %v9743_v20  ;;  %v6699_v52 = vadd.f32 %v9199_v12, %v5355_v59  ;;  %v5357_v26 = vpop.f32.mrb[57].mxu1  ;;  %v9758_v48 = vld [vmem:[#allocation88_spill] sm:$0xff] }
 0x590   : > { %v5722_v49 = vmax.f32 %v5690_v22, 0.0  ;;  %v5581_v17 = vadd.f32 %v6699_v52, %v9744_v8  ;;  %v9759_v22 = vld [vmem:[#allocation33_spill] sm:$0xff] }
 0x591   : > { %v5360_v21 = vpop.f32.mrb[58].mxu1 }
 0x592   : > { %5754 = vst [vmem:[%s9208_s10 + $0x58] sm:$0xff] %v5722_v49  ;;  %v5691_v50 = vadd.f32 %v5581_v17, %v9745_v3  ;;  %v6700_v16 = vadd.f32 %v9199_v12, %v5360_v21  ;;  %v5362_v28 = vpop.f32.mrb[59].mxu1  ;;  %v9760_v17 = vld [vmem:[#allocation89_spill] sm:$0xff] }
 0x594   : > { %v5723_v53 = vmax.f32 %v5691_v50, 0.0  ;;  %v5586_v60 = vadd.f32 %v6700_v16, %v9746_v57  ;;  %v9761_v50 = vld [vmem:[#allocation34_spill] sm:$0xff] }
 0x595   : > { %v5365_v43 = vpop.f32.mrb[60].mxu1 }
 0x596   : > { %5755 = vst [vmem:[%s9208_s10 + $0x60] sm:$0xff] %v5723_v53  ;;  %v5692_v30 = vadd.f32 %v5586_v60, %v9747_v41  ;;  %v6701_v33 = vadd.f32 %v9199_v12, %v5365_v43  ;;  %v5367_v11 = vpop.f32.mrb[61].mxu1  ;;  %v9762_v60 = vld [vmem:[#allocation59_spill] sm:$0xff] }
 0x598   : > { %v5724_v47 = vmax.f32 %v5692_v30, 0.0  ;;  %v5591_v29 = vadd.f32 %v6701_v33, %v9748_v0  ;;  %v9763_v30 = vld [vmem:[#allocation35_spill] sm:$0xff] }
 0x599   : > { %v5370_v6 = vpop.f32.mrb[62].mxu1 }
 0x59a   : > { %5756 = vst [vmem:[%s9208_s10 + $0x68] sm:$0xff] %v5724_v47  ;;  %v5693_v38 = vadd.f32 %v5591_v29, %v9749_v40  ;;  %v6702_v1 = vadd.f32 %v9199_v12, %v5370_v6  ;;  %v5372_v2 = vpop.f32.mrb[63].mxu1  ;;  %v9764_v29 = vld [vmem:[#allocation87_spill] sm:$0xff] }
 0x59c   : > { %v5725_v61 = vmax.f32 %v5693_v38, 0.0  ;;  %v5596_v56 = vadd.f32 %v6702_v1, %v9750_v44  ;;  %v9765_v38 = vld [vmem:[#allocation36_spill] sm:$0xff] }
 0x59d   : > { %v5375_v54 = vpop.f32.mrb[64].mxu1 }
 0x59e   : > { %5757 = vst [vmem:[%s9208_s10 + $0x70] sm:$0xff] %v5725_v61  ;;  %v5694_v34 = vadd.f32 %v5596_v56, %v9751_v7  ;;  %v6703_v62 = vadd.f32 %v9199_v12, %v5375_v54  ;;  %v5377_v36 = vpop.f32.mrb[65].mxu1  ;;  %v9766_v56 = vld [vmem:[#allocation54_spill] sm:$0xff] }
 0x5a0   : > { %v5726_v19 = vmax.f32 %v5694_v34, 0.0  ;;  %v5601_v9 = vadd.f32 %v6703_v62, %v9752_v18  ;;  %v9767_v34 = vld [vmem:[#allocation37_spill] sm:$0xff] }
 0x5a1   : > { %v5380_v15 = vpop.f32.mrb[66].mxu1 }
 0x5a2   : > { %5758 = vst [vmem:[%s9208_s10 + $0x78] sm:$0xff] %v5726_v19  ;;  %v5695_v31 = vadd.f32 %v5601_v9, %v9753_v14  ;;  %v6704_v58 = vadd.f32 %v9199_v12, %v5380_v15  ;;  %v5382_v10 = vpop.f32.mrb[67].mxu1 }
 0x5a4   : > { %v5727_v35 = vmax.f32 %v5695_v31, 0.0  ;;  %v5606_v32 = vadd.f32 %v6704_v58, %v9754_v63 }
 0x5a5   : > { %v5385_v27 = vpop.f32.mrb[68].mxu1 }
 0x5a6   : > { %5759 = vst [vmem:[%s9208_s10 + $0x80] sm:$0xff] %v5727_v35  ;;  %v5696_v51 = vadd.f32 %v5606_v32, %v9755_v45  ;;  %v6705_v4 = vadd.f32 %v9199_v12, %v5385_v27  ;;  %v5387_v5 = vpop.f32.mrb[69].mxu1 }
 0x5a8   : > { %v5728_v24 = vmax.f32 %v5696_v51, 0.0  ;;  %v5611_v23 = vadd.f32 %v6705_v4, %v9756_v46 }
 0x5a9   : > { %v5390_v55 = vpop.f32.mrb[70].mxu1 }
 0x5aa   : > { %5760 = vst [vmem:[%s9208_s10 + $0x88] sm:$0xff] %v5728_v24  ;;  %v5697_v25 = vadd.f32 %v5611_v23, %v9757_v42  ;;  %v6706_v39 = vadd.f32 %v9199_v12, %v5390_v55  ;;  %v5392_v13 = vpop.f32.mrb[71].mxu1 }
 0x5ac   : > { %v5729_v37 = vmax.f32 %v5697_v25, 0.0  ;;  %v5616_v59 = vadd.f32 %v6706_v39, %v9758_v48  ;;  %v9768_v39 = vld [vmem:[#allocation39_spill] sm:$0xff]  ;;  %v9769_v48 = vld [vmem:[#allocation38_spill] sm:$0xff] }
 0x5ad   : > { %v5395_v20 = vpop.f32.mrb[72].mxu1 }
 0x5ae   : > { %5761 = vst [vmem:[%s9208_s10 + $0x90] sm:$0xff] %v5729_v37  ;;  %v5698_v52 = vadd.f32 %v5616_v59, %v9759_v22  ;;  %v6707_v26 = vadd.f32 %v9199_v12, %v5395_v20  ;;  %v5397_v49 = vpop.f32.mrb[73].mxu1 }
 0x5b0   : > { %v5730_v8 = vmax.f32 %v5698_v52, 0.0  ;;  %v5621_v21 = vadd.f32 %v6707_v26, %v9760_v17 }
 0x5b1   : > { %v5400_v3 = vpop.f32.mrb[74].mxu1 }
 0x5b2   : > { %5762 = vst [vmem:[%s9208_s10 + $0x98] sm:$0xff] %v5730_v8  ;;  %v5699_v16 = vadd.f32 %v5621_v21, %v9761_v50  ;;  %v6708_v28 = vadd.f32 %v9199_v12, %v5400_v3  ;;  %v5402_v53 = vpop.f32.mrb[75].mxu1  ;;  %v9770_v21 = vld [vmem:[#allocation41_spill] sm:$0xff] }
 0x5b4   : > { %v5731_v57 = vmax.f32 %v5699_v16, 0.0  ;;  %v5626_v43 = vadd.f32 %v6708_v28, %v9762_v60  ;;  %v9771_v16 = vld [vmem:[#allocation40_spill] sm:$0xff] }
 0x5b5   : > { %v5405_v41 = vpop.f32.mrb[76].mxu1 }
 0x5b6   : > { %5763 = vst [vmem:[%s9208_s10 + $0xa0] sm:$0xff] %v5731_v57  ;;  %v5700_v33 = vadd.f32 %v5626_v43, %v9763_v30  ;;  %v6709_v11 = vadd.f32 %v9199_v12, %v5405_v41  ;;  %v5407_v47 = vpop.f32.mrb[77].mxu1 }
 0x5b8   : > { %v5732_v0 = vmax.f32 %v5700_v33, 0.0  ;;  %v5631_v6 = vadd.f32 %v6709_v11, %v9764_v29  ;;  %v9772_v11 = vld [vmem:[#allocation43_spill] sm:$0xff]  ;;  %v9773_v29 = vld [vmem:[#allocation42_spill] sm:$0xff] }
 0x5b9   : > { %v5410_v40 = vpop.f32.mrb[78].mxu1 }
 0x5ba   : > { %5764 = vst [vmem:[%s9208_s10 + $0xa8] sm:$0xff] %v5732_v0  ;;  %v5701_v1 = vadd.f32 %v5631_v6, %v9765_v38  ;;  %v6710_v2 = vadd.f32 %v9199_v12, %v5410_v40  ;;  %v5412_v61 = vpop.f32.mrb[79].mxu1 }
 0x5bc   : > { %v5733_v44 = vmax.f32 %v5701_v1, 0.0  ;;  %v5636_v54 = vadd.f32 %v6710_v2, %v9766_v56  ;;  %v9774_v56 = vld [vmem:[#allocation66_spill] sm:$0xff] }
 0x5bd   : > { %v5415_v7 = vpop.f32.mrb[80].mxu1 }
 0x5be   : > { %5765 = vst [vmem:[%s9208_s10 + $0xb0] sm:$0xff] %v5733_v44  ;;  %v5702_v62 = vadd.f32 %v5636_v54, %v9767_v34  ;;  %v5417_v36 = vpop.f32.mrb[81].mxu1  ;;  %v6711_v24 = vadd.f32 %v9199_v12, %v5415_v7 }
 0x5c0   : > { %v5734_v19 = vmax.f32 %v5702_v62, 0.0 }
 0x5c1   : > { %v5420_v18 = vpop.f32.mrb[82].mxu1 }
 0x5c2   : > { %5766 = vst [vmem:[%s9208_s10 + $0xb8] sm:$0xff] %v5734_v19  ;;  %v5422_v9 = vpop.f32.mrb[83].mxu1  ;;  %v6712_v5 = vadd.f32 %v9199_v12, %v5420_v18 }
 0x5c5   : > { %v5425_v15 = vpop.f32.mrb[84].mxu1 }
 0x5c6   : > { %v5427_v14 = vpop.f32.mrb[85].mxu1  ;;  %v6713_v37 = vadd.f32 %v9199_v12, %v5425_v15 }
 0x5c9   : > { %v5430_v31 = vpop.f32.mrb[86].mxu1 }
 0x5ca   : > { %v5432_v58 = vpop.f32.mrb[87].mxu1  ;;  %v6714_v25 = vadd.f32 %v9199_v12, %v5430_v31 }
 0x5cd   : > { %v5435_v10 = vpop.f32.mrb[88].mxu1 }
 0x5ce   : > { %v5437_v35 = vpop.f32.mrb[89].mxu1  ;;  %v6715_v50 = vadd.f32 %v9199_v12, %v5435_v10 }
 0x5d1   : > { %v5440_v63 = vpop.f32.mrb[90].mxu1 }
 0x5d2   : > { %v5442_v32 = vpop.f32.mrb[91].mxu1  ;;  %v6716_v17 = vadd.f32 %v9199_v12, %v5440_v63 }
 0x5d5   : > { %v5445_v27 = vpop.f32.mrb[92].mxu1 }
 0x5d6   : > { %v5447_v45 = vpop.f32.mrb[93].mxu1  ;;  %v6717_v0 = vadd.f32 %v9199_v12, %v5445_v27 }
 0x5d9   : > { %v5450_v51 = vpop.f32.mrb[94].mxu1 }
 0x5da   : > { %v5452_v4 = vpop.f32.mrb[95].mxu1  ;;  %v6718_v33 = vadd.f32 %v9199_v12, %v5450_v51  ;;  %v9775_v12 = vld [vmem:[#allocation65_spill] sm:$0xff] }
 0x5dd   : > { %v6181_v46 = vpop.f32.mrb[96].mxu1 }
 0x5de   : > { %v5646_v23 = vadd.f32 %v6712_v5, %v6181_v46  ;;  %v5640_v55 = vpop.f32.mrb[97].mxu1 }
 0x5df   : > { %v5641_v42 = vadd.f32 %v6711_v24, %v5640_v55 }
 0x5e0   : > { %v5704_v13 = vadd.f32 %v5646_v23, %v9768_v39 }
 0x5e1   : > { %v5703_v59 = vadd.f32 %v5641_v42, %v9769_v48  ;;  %v6184_v20 = vpop.f32.mrb[98].mxu1 }
 0x5e2   : > { %v5736_v22 = vmax.f32 %v5704_v13, 0.0  ;;  %v5656_v52 = vadd.f32 %v6714_v25, %v6184_v20  ;;  %v5650_v26 = vpop.f32.mrb[99].mxu1 }
 0x5e3   : > { %v5735_v49 = vmax.f32 %v5703_v59, 0.0  ;;  %v5651_v8 = vadd.f32 %v6713_v37, %v5650_v26 }
 0x5e4   : > { %5768 = vst [vmem:[%s9208_s10 + $0xc8] sm:$0xff] %v5736_v22  ;;  %v5706_v3 = vadd.f32 %v5656_v52, %v9770_v21 }
 0x5e5   : > { %5767 = vst [vmem:[%s9208_s10 + $0xc0] sm:$0xff] %v5735_v49  ;;  %v5705_v28 = vadd.f32 %v5651_v8, %v9771_v16  ;;  %v6187_v53 = vpop.f32.mrb[100].mxu1 }
 0x5e6   : > { %v5738_v57 = vmax.f32 %v5706_v3, 0.0  ;;  %v5666_v60 = vadd.f32 %v6716_v17, %v6187_v53  ;;  %v5660_v43 = vpop.f32.mrb[101].mxu1 }
 0x5e7   : > { %v5737_v41 = vmax.f32 %v5705_v28, 0.0  ;;  %v5661_v30 = vadd.f32 %v6715_v50, %v5660_v43 }
 0x5e8   : > { %5770 = vst [vmem:[%s9208_s10 + $0xd8] sm:$0xff] %v5738_v57  ;;  %v5708_v47 = vadd.f32 %v5666_v60, %v9772_v11 }
 0x5e9   : > { %5769 = vst [vmem:[%s9208_s10 + $0xd0] sm:$0xff] %v5737_v41  ;;  %v5707_v6 = vadd.f32 %v5661_v30, %v9773_v29  ;;  %v6190_v40 = vpop.f32.mrb[102].mxu1 }
 0x5ea   : > { %v5740_v38 = vmax.f32 %v5708_v47, 0.0  ;;  %v5676_v1 = vadd.f32 %v6718_v33, %v6190_v40  ;;  %v5670_v2 = vpop.f32.mrb[103].mxu1 }
 0x5eb   : > { %v5739_v61 = vmax.f32 %v5707_v6, 0.0  ;;  %v5671_v44 = vadd.f32 %v6717_v0, %v5670_v2 }
 0x5ec   : > { %5772 = vst [vmem:[%s9208_s10 + $0xe8] sm:$0xff] %v5740_v38  ;;  %v5710_v54 = vadd.f32 %v9774_v56, %v5676_v1 }
 0x5ed   : > { %5771 = vst [vmem:[%s9208_s10 + $0xe0] sm:$0xff] %v5739_v61  ;;  %v5709_v7 = vadd.f32 %v9775_v12, %v5671_v44 }
 0x5ee   : > { %v5742_v34 = vmax.f32 %v5710_v54, 0.0 }
 0x5ef   : > { %v5741_v62 = vmax.f32 %v5709_v7, 0.0 }
 0x5f0   : > { %5774 = vst [vmem:[%s9208_s10 + $0xf8] sm:$0xff] %v5742_v34 }
 0x5f1   : > { %5773 = vst [vmem:[%s9208_s10 + $0xf0] sm:$0xff] %v5741_v62 }
 0x5f2   : > { %7282 = shalt.err (!%p7279_p1)
}
 0x5f3   : > { %s7283_s12 = scalar_lea.hbm %s9328_s11, 4096  ;;  %s7287_s15 = scalar_lea.hbm %s9381_s5, 8192 }
 0x5f4   : > { %p7284_p13 = scmp.ne.s32.totalorder %s9328_s11, %s7283_s12  ;;  %p7288_p4 = scmp.lt.u32.totalorder %s9328_s11, %s9381_s5 }
 0x5f5   : > { %p7289_p5 = scmp.lt.u32.totalorder %s7287_s15, %s7283_s12  ;;  %p7291_p11 = scmp.lt.u32.totalorder %s7283_s12, %s9328_s11 }
 0x5f6   : > { %p7285_p6 = pnand %p7284_p13, %p9776_p0 }
 0x5f7   : > { %p7290_p8 = por %p7289_p5, %p7288_p4 }
 0x5f8   : > { %p7286_p10 = pneg %p7285_p6 }
 0x5f9   : > { %p7292_p2 = por %p7291_p11, %p7290_p8 }
 0x5fb   : > { %p7293_p3 = pnand %p7292_p2, %p7286_p10 }
 0x5fd   : > { %7296 = shalt.err (!%p7293_p3)
}
 0x5fe   : > { %s7349_s28 = smov 128   ;;  %s7350_s9 = smov 8  }
 0x5ff   : > { %7113 = dma.vmem_to_hbm [thread:$0]  (%p9776_p0), %s9330_s13, 4096, %s9328_s11, %s5776_s22, %s7349_s28, %s7349_s28, %s7350_s9  }
 0x600 PF: > { %s5804_s30 = sand.u32 1, %s7327_s18   ;;  %p9777_p7 = scmp.ne.s32.totalorder %s9520_s25, 0 }
 0x601   : > { %p9778_p9 = scmp.ge.s32.totalorder %s7339_s21, 2  ;;  %s5805_s17 = scalar_lea.sflag [#allocation6], %s5804_s30 }
 0x603   : > { %p7127_p12 = pnand %p9778_p9, %p9777_p7 }
 0x605   : > { %7322 = dma.done.wait (!%p7127_p12), %s5805_s17, 4096  }
 0x606   : > { %7324 = vsyncadd (!%p7127_p12), %s5805_s17, 4294963200  ;;  %p19_p1 = scmp.ge.s32.totalorder %s7497_s29, 4   ;;  %s9779_s18 = smov %s7331_s19 }
 0x607   : > { %s9780_s19 = smov %s7335_s20  ;;  %s9781_s20 = smov %s7513_s27 }
 0x608   : > { %s9782_s21 = smov %s7497_s29  ;;  %21 = sbr.rel (!%p19_p1) target bundleno = 6 (0x6), region = 93 }
 0x60f   :  { %5810 = vsyncpa [#allocation5], 1 }
 0x610   :  { %5812 = vsyncpa [#allocation5 + $0x1], 1 }
 0x611   :  { %5813 = vsyncpa [#allocation8], 1 }
 0x612   :  { %5814 = vsyncpa [#allocation6], 1 }
 0x613   :  { %5816 = vsyncpa [#allocation6 + $0x1], 1 }

</bundles_post_ra>
